<compile_context>
chip_gen: v6e
topology: v6e:2x2x1
jax: 0.10.0
libtpu: 0.0.40
codegen_flags: <defaults>
</compile_context>

<pallas_src>
import jax
import jax.numpy as jnp
from jax.experimental import pallas as pl
from jax.experimental.pallas import tpu as pltpu


def resblock_kernel(x_ref, w1_ref, w2_ref, b1_ref, b2_ref, o_ref,
                    p1_scr, h1pad_scr, p2_scr):
    """One (image, row-tile) per grid step.

    x_ref     : (1, H+4, W+2, Cin) f32  zero-padded input, resident per image;
                its un-padded interior doubles as the identity branch.
    w1_ref    : (9*Cin,  Cout) bf16     conv1 weight, BN1 scale folded in
    w2_ref    : (9*Cout, Cout) bf16     conv2 weight, BN2 scale folded in
    b1_ref    : (1, Cout) f32           BN1 shift
    b2_ref    : (1, Cout) f32           BN2 shift
    o_ref     : (1, tH, W, Cout)        output row-tile
    p1_scr    : (tH+2, W, 9*Cin)  bf16  conv1 im2col scratch
    h1pad_scr : (tH+2, W+2, Cout) f32   conv1 activation with zero W-halo
    p2_scr    : (tH,   W, 9*Cout) bf16  conv2 im2col scratch
    """
    tH = o_ref.shape[1]
    W = o_ref.shape[2]
    Cout = o_ref.shape[3]
    Cin = x_ref.shape[3]

    hidx = pl.program_id(1)
    # First output row of this tile; in padded-x coordinates (offset +2) the
    # conv1 window for the tile starts exactly at padded row r0.
    r0 = pl.multiple_of(hidx * tH, tH)
    x_img = x_ref.at[0]                      # (H+4, W+2, Cin) view, no load

    # ---- conv1 im2col: tH+2 output rows (1-row halo each side, for conv2).
    # Data is cast to bf16 exactly once, at this scratch write.
    for dh in range(3):
        for dw in range(3):
            k = dh * 3 + dw
            p1_scr[:, :, k * Cin:(k + 1) * Cin] = (
                x_img[pl.ds(r0 + dh, tH + 2), dw:dw + W, :].astype(jnp.bfloat16))

    # ---- conv1: ONE MXU matmul, contraction 9*Cin, f32 accumulate ----
    h1 = jnp.dot(p1_scr[...].reshape((tH + 2) * W, 9 * Cin), w1_ref[...],
                 preferred_element_type=jnp.float32)
    h1 = jnp.maximum(h1 + b1_ref[...], 0.0)          # BN1 (scale folded) + ReLU

    # ---- stash conv1 activation with a zero W-halo (f32 scratch) ----
    h1pad_scr[:, 0:1, :] = jnp.zeros((tH + 2, 1, Cout), jnp.float32)
    h1pad_scr[:, W + 1:W + 2, :] = jnp.zeros((tH + 2, 1, Cout), jnp.float32)
    h1pad_scr[:, 1:W + 1, :] = h1.reshape(tH + 2, W, Cout)

    # conv2 zero-pads in H: a conv1 halo row that lies outside the image is 0.
    @pl.when(hidx == 0)
    def _():
        h1pad_scr[0:1, :, :] = jnp.zeros((1, W + 2, Cout), jnp.float32)

    @pl.when(hidx == pl.num_programs(1) - 1)
    def _():
        h1pad_scr[tH + 1:tH + 2, :, :] = jnp.zeros((1, W + 2, Cout), jnp.float32)

    # ---- conv2 im2col over the tH output rows of this tile ----
    for dh in range(3):
        for dw in range(3):
            k = dh * 3 + dw
            p2_scr[:, :, k * Cout:(k + 1) * Cout] = (
                h1pad_scr[dh:dh + tH, dw:dw + W, :].astype(jnp.bfloat16))

    h2 = jnp.dot(p2_scr[...].reshape(tH * W, 9 * Cout), w2_ref[...],
                 preferred_element_type=jnp.float32)
    h2 = h2 + b2_ref[...]                             # BN2 (scale folded into w2)

    # ---- residual add (f32 identity from the same input block) + final ReLU
    ident = x_img[pl.ds(r0 + 2, tH), 1:W + 1, :].reshape(tH * W, Cin)
    out = jnp.maximum(h2 + ident, 0.0)
    o_ref[0] = out.reshape(tH, W, Cout).astype(o_ref.dtype)


def _prepare_conv_bn(w_oihw, bn_params, eps):
    """OIHW weight + BN(gamma,beta,mean,var) -> ((9*Cin,Cout) bf16, (1,Cout) f32)."""
    gamma, beta, mean, var = bn_params
    scale = gamma / jnp.sqrt(var + eps)                       # (Cout,)
    shift = beta - mean * scale                               # (Cout,)
    w_hwio = jnp.transpose(w_oihw, (2, 3, 1, 0)).astype(jnp.float32)  # (3,3,Cin,Cout)
    cin, cout = w_hwio.shape[2], w_hwio.shape[3]
    w_mat = w_hwio.reshape(9 * cin, cout) * scale[None, :]    # fold BN scale (f32)
    return w_mat.astype(jnp.bfloat16), shift.reshape(1, -1).astype(jnp.float32)


def _pick_tile_h(H, W, C, budget_bytes=128 * 1024):
    """Pick tH so the per-tile f32 accumulator (~tH*W*C*4B) stays small."""
    rows = max(1, budget_bytes // max(1, W * C * 4))
    rows = min(rows, H)
    while H % rows:
        rows -= 1
    return rows


def resblock_forward(x_nchw, w1_oihw, w2_oihw, bn1, bn2, eps=1e-5, tile_h=None):
    """x_nchw: (N, C, H, W) float32; weights in PyTorch OIHW layout."""
    N, Cin, H, W = x_nchw.shape
    Cout = w1_oihw.shape[0]
    assert Cin == Cout, "downsample=None requires in_chnls == out_chnls"

    if tile_h is None:
        tile_h = _pick_tile_h(H, W, Cout)
    assert H % tile_h == 0, "H must be divisible by tile_h"
    n_h = H // tile_h

    x_nhwc = jnp.transpose(x_nchw, (0, 2, 3, 1)).astype(jnp.float32)
    # Pad once in XLA: +2 rows each side (conv1 pad + conv2 halo), +1 col each
    # side (conv pad).  The kernel reads this single array exactly once per
    # image (its block index is constant across the H grid axis).
    x_pad = jnp.pad(x_nhwc, ((0, 0), (2, 2), (1, 1), (0, 0)))

    w1_mat, b1 = _prepare_conv_bn(w1_oihw, bn1, eps)
    w2_mat, b2 = _prepare_conv_bn(w2_oihw, bn2, eps)

    out_nhwc = pl.pallas_call(
        resblock_kernel,
        out_shape=jax.ShapeDtypeStruct((N, H, W, Cout), jnp.float32),
        grid_spec=pltpu.PrefetchScalarGridSpec(
            num_scalar_prefetch=0,
            grid=(N, n_h),
            in_specs=[
                pl.BlockSpec((1, H + 4, W + 2, Cin), lambda n, h: (n, 0, 0, 0)),
                pl.BlockSpec((9 * Cin, Cout), lambda n, h: (0, 0)),
                pl.BlockSpec((9 * Cout, Cout), lambda n, h: (0, 0)),
                pl.BlockSpec((1, Cout), lambda n, h: (0, 0)),
                pl.BlockSpec((1, Cout), lambda n, h: (0, 0)),
            ],
            out_specs=pl.BlockSpec((1, tile_h, W, Cout), lambda n, h: (n, h, 0, 0)),
            scratch_shapes=[
                pltpu.VMEM((tile_h + 2, W, 9 * Cin), jnp.bfloat16),   # conv1 im2col
                pltpu.VMEM((tile_h + 2, W + 2, Cout), jnp.float32),   # conv1 act + W halo
                pltpu.VMEM((tile_h, W, 9 * Cout), jnp.bfloat16),      # conv2 im2col
            ],
        ),
        compiler_params=pltpu.CompilerParams(
            dimension_semantics=("parallel", "arbitrary"),
            # Sized for v7x's 64 MiB physical VMEM; can be raised on v5e/v6e.
            vmem_limit_bytes=48 * 1024 * 1024,
        ),
    )(x_pad, w1_mat, w2_mat, b1, b2)

    return jnp.transpose(out_nhwc, (0, 3, 1, 2))  # back to NCHW


def resblock_reference(x_nchw, w1, w2, bn1, bn2, eps=1e-5):
    """Pure-JAX f32 reference matching the PyTorch forward (eval-mode BN)."""
    def conv(x, w):
        return jax.lax.conv_general_dilated(
            x, w, window_strides=(1, 1), padding=((1, 1), (1, 1)),
            dimension_numbers=("NCHW", "OIHW", "NCHW"))

    def bn(x, p):
        g, b, m, v = p
        inv = g / jnp.sqrt(v + eps)
        return (x - m[None, :, None, None]) * inv[None, :, None, None] \
            + b[None, :, None, None]

    out = jax.nn.relu(bn(conv(x_nchw, w1), bn1))
    out = bn(conv(out, w2), bn2)
    return jax.nn.relu(out + x_nchw)


if __name__ == "__main__":
    N, C, H, W = 2, 4, 16, 16   # in_chnls == out_chnls == 4, stride=1

    key = jax.random.PRNGKey(0)
    k_x, k_w1, k_w2 = jax.random.split(key, 3)

    x = jax.random.normal(k_x, (N, C, H, W), dtype=jnp.float32)
    w1 = 0.1 * jax.random.normal(k_w1, (C, C, 3, 3), dtype=jnp.float32)  # OIHW
    w2 = 0.1 * jax.random.normal(k_w2, (C, C, 3, 3), dtype=jnp.float32)

    # deterministic BatchNorm parameters: (gamma, beta, running_mean, running_var)
    idx = jnp.arange(C, dtype=jnp.float32)
    bn1 = (1.0 + 0.10 * idx, 0.05 * idx, 0.01 * idx, 1.0 + 0.02 * idx)
    bn2 = (1.0 - 0.05 * idx, -0.03 * idx, 0.02 * idx, 1.0 + 0.01 * idx)

    # tile_h=8 -> two H tiles per image, exercising the halo / boundary logic.
    out = resblock_forward(x, w1, w2, bn1, bn2, tile_h=8)
    out = jax.block_until_ready(out)

    ref = resblock_reference(x, w1, w2, bn1, bn2)
    assert out.shape == (N, C, H, W)
    # bf16 MXU operands (f32 accumulate) -> loosened tolerance vs. pure-f32 ref.
    assert jnp.allclose(out, ref, atol=5e-2, rtol=5e-2), \
        float(jnp.max(jnp.abs(out - ref)))

    print("KERNEL_OK")
</pallas_src>

<mosaic_0001>
module attributes {stable_mosaic.version = 11 : i64} {
  func.func @resblock_kernel(%arg0: i32, %arg1: i32, %arg2: memref<1x20x18x4xf32, #tpu.memory_space<vmem>>, %arg3: memref<36x4xbf16, #tpu.memory_space<vmem>>, %arg4: memref<36x4xbf16, #tpu.memory_space<vmem>>, %arg5: memref<1x4xf32, #tpu.memory_space<vmem>>, %arg6: memref<1x4xf32, #tpu.memory_space<vmem>>, %arg7: memref<1x8x16x4xf32, #tpu.memory_space<vmem>>, %arg8: memref<10x16x36xbf16, #tpu.memory_space<vmem>>, %arg9: memref<10x18x4xf32, #tpu.memory_space<vmem>>, %arg10: memref<8x16x36xbf16, #tpu.memory_space<vmem>>) attributes {dimension_semantics = [#tpu.dimension_semantics<parallel>, #tpu.dimension_semantics<arbitrary>], iteration_bounds = array<i64: 2, 2>, scalar_prefetch = 0 : i64, scratch_operands = 3 : i64, tpu.core_type = #tpu.core_type<tc>, window_params = [{transform_indices = @transform_0, window_bounds = array<i64: 1, 20, 18, 4>}, {pipeline_mode = #tpu.pipeline_mode<synchronous>, transform_indices = @transform_1, window_bounds = array<i64: 36, 4>}, {pipeline_mode = #tpu.pipeline_mode<synchronous>, transform_indices = @transform_2, window_bounds = array<i64: 36, 4>}, {pipeline_mode = #tpu.pipeline_mode<synchronous>, transform_indices = @transform_3, window_bounds = array<i64: 1, 4>}, {pipeline_mode = #tpu.pipeline_mode<synchronous>, transform_indices = @transform_4, window_bounds = array<i64: 1, 4>}, {transform_indices = @transform_5, window_bounds = array<i64: 1, 8, 16, 4>}]} {
    %c8_i32 = arith.constant 8 : i32
    %0 = arith.muli %arg1, %c8_i32 : i32
    %1 = tpu.assume_multiple %0, 8 : i32
    %c0_i32 = arith.constant 0 : i32
    %2 = arith.addi %1, %c0_i32 : i32
    %c0_i32_0 = arith.constant 0 : i32
    %c0_i32_1 = arith.constant 0 : i32
    %c0_i32_2 = arith.constant 0 : i32
    %c0_i32_3 = arith.constant 0 : i32
    %3 = tpu.memref_slice %arg2[%c0_i32_0, %c0_i32_1, %c0_i32_2, %c0_i32_3] : memref<1x20x18x4xf32, #tpu.memory_space<vmem>> -> memref<1x20x18x4xf32, #tpu.memory_space<vmem>>
    %4 = tpu.memref_squeeze %3 : memref<1x20x18x4xf32, #tpu.memory_space<vmem>> -> memref<20x18x4xf32, #tpu.memory_space<vmem>>
    %5 = arith.index_cast %2 : i32 to index
    %c0 = arith.constant 0 : index
    %c0_4 = arith.constant 0 : index
    %6 = vector.load %4[%5, %c0, %c0_4] : memref<20x18x4xf32, #tpu.memory_space<vmem>>, vector<10x16x4xf32>
    %7 = arith.truncf %6 : vector<10x16x4xf32> to vector<10x16x4xbf16>
    %c0_5 = arith.constant 0 : index
    %c0_6 = arith.constant 0 : index
    %c0_7 = arith.constant 0 : index
    %8 = vector.load %arg8[%c0_5, %c0_6, %c0_7] : memref<10x16x36xbf16, #tpu.memory_space<vmem>>, vector<10x16x4xbf16>
    tpu.vector_store %arg8[%c0_5, %c0_6, %c0_7], %7 {strides = array<i32>} : memref<10x16x36xbf16, #tpu.memory_space<vmem>>, vector<10x16x4xbf16>,
    %c0_i32_8 = arith.constant 0 : i32
    %9 = arith.addi %1, %c0_i32_8 : i32
    %c0_i32_9 = arith.constant 0 : i32
    %c0_i32_10 = arith.constant 0 : i32
    %c0_i32_11 = arith.constant 0 : i32
    %c0_i32_12 = arith.constant 0 : i32
    %10 = tpu.memref_slice %arg2[%c0_i32_9, %c0_i32_10, %c0_i32_11, %c0_i32_12] : memref<1x20x18x4xf32, #tpu.memory_space<vmem>> -> memref<1x20x18x4xf32, #tpu.memory_space<vmem>>
    %11 = tpu.memref_squeeze %10 : memref<1x20x18x4xf32, #tpu.memory_space<vmem>> -> memref<20x18x4xf32, #tpu.memory_space<vmem>>
    %12 = arith.index_cast %9 : i32 to index
    %c1 = arith.constant 1 : index
    %c0_13 = arith.constant 0 : index
    %13 = vector.load %11[%12, %c1, %c0_13] : memref<20x18x4xf32, #tpu.memory_space<vmem>>, vector<10x16x4xf32>
    %14 = arith.truncf %13 : vector<10x16x4xf32> to vector<10x16x4xbf16>
    %c0_14 = arith.constant 0 : index
    %c0_15 = arith.constant 0 : index
    %c4 = arith.constant 4 : index
    %15 = vector.load %arg8[%c0_14, %c0_15, %c4] : memref<10x16x36xbf16, #tpu.memory_space<vmem>>, vector<10x16x4xbf16>
    tpu.vector_store %arg8[%c0_14, %c0_15, %c4], %14 {strides = array<i32>} : memref<10x16x36xbf16, #tpu.memory_space<vmem>>, vector<10x16x4xbf16>,
    %c0_i32_16 = arith.constant 0 : i32
    %16 = arith.addi %1, %c0_i32_16 : i32
    %c0_i32_17 = arith.constant 0 : i32
    %c0_i32_18 = arith.constant 0 : i32
    %c0_i32_19 = arith.constant 0 : i32
    %c0_i32_20 = arith.constant 0 : i32
    %17 = tpu.memref_slice %arg2[%c0_i32_17, %c0_i32_18, %c0_i32_19, %c0_i32_20] : memref<1x20x18x4xf32, #tpu.memory_space<vmem>> -> memref<1x20x18x4xf32, #tpu.memory_space<vmem>>
    %18 = tpu.memref_squeeze %17 : memref<1x20x18x4xf32, #tpu.memory_space<vmem>> -> memref<20x18x4xf32, #tpu.memory_space<vmem>>
    %19 = arith.index_cast %16 : i32 to index
    %c2 = arith.constant 2 : index
    %c0_21 = arith.constant 0 : index
    %20 = vector.load %18[%19, %c2, %c0_21] : memref<20x18x4xf32, #tpu.memory_space<vmem>>, vector<10x16x4xf32>
    %21 = arith.truncf %20 : vector<10x16x4xf32> to vector<10x16x4xbf16>
    %c0_22 = arith.constant 0 : index
    %c0_23 = arith.constant 0 : index
    %c8 = arith.constant 8 : index
    %22 = vector.load %arg8[%c0_22, %c0_23, %c8] : memref<10x16x36xbf16, #tpu.memory_space<vmem>>, vector<10x16x4xbf16>
    tpu.vector_store %arg8[%c0_22, %c0_23, %c8], %21 {strides = array<i32>} : memref<10x16x36xbf16, #tpu.memory_space<vmem>>, vector<10x16x4xbf16>,
    %c1_i32 = arith.constant 1 : i32
    %23 = arith.addi %1, %c1_i32 : i32
    %c0_i32_24 = arith.constant 0 : i32
    %c0_i32_25 = arith.constant 0 : i32
    %c0_i32_26 = arith.constant 0 : i32
    %c0_i32_27 = arith.constant 0 : i32
    %24 = tpu.memref_slice %arg2[%c0_i32_24, %c0_i32_25, %c0_i32_26, %c0_i32_27] : memref<1x20x18x4xf32, #tpu.memory_space<vmem>> -> memref<1x20x18x4xf32, #tpu.memory_space<vmem>>
    %25 = tpu.memref_squeeze %24 : memref<1x20x18x4xf32, #tpu.memory_space<vmem>> -> memref<20x18x4xf32, #tpu.memory_space<vmem>>
    %26 = arith.index_cast %23 : i32 to index
    %c0_28 = arith.constant 0 : index
    %c0_29 = arith.constant 0 : index
    %27 = vector.load %25[%26, %c0_28, %c0_29] : memref<20x18x4xf32, #tpu.memory_space<vmem>>, vector<10x16x4xf32>
    %28 = arith.truncf %27 : vector<10x16x4xf32> to vector<10x16x4xbf16>
    %c0_30 = arith.constant 0 : index
    %c0_31 = arith.constant 0 : index
    %c12 = arith.constant 12 : index
    %29 = vector.load %arg8[%c0_30, %c0_31, %c12] : memref<10x16x36xbf16, #tpu.memory_space<vmem>>, vector<10x16x4xbf16>
    tpu.vector_store %arg8[%c0_30, %c0_31, %c12], %28 {strides = array<i32>} : memref<10x16x36xbf16, #tpu.memory_space<vmem>>, vector<10x16x4xbf16>,
    %c1_i32_32 = arith.constant 1 : i32
    %30 = arith.addi %1, %c1_i32_32 : i32
    %c0_i32_33 = arith.constant 0 : i32
    %c0_i32_34 = arith.constant 0 : i32
    %c0_i32_35 = arith.constant 0 : i32
    %c0_i32_36 = arith.constant 0 : i32
    %31 = tpu.memref_slice %arg2[%c0_i32_33, %c0_i32_34, %c0_i32_35, %c0_i32_36] : memref<1x20x18x4xf32, #tpu.memory_space<vmem>> -> memref<1x20x18x4xf32, #tpu.memory_space<vmem>>
    %32 = tpu.memref_squeeze %31 : memref<1x20x18x4xf32, #tpu.memory_space<vmem>> -> memref<20x18x4xf32, #tpu.memory_space<vmem>>
    %33 = arith.index_cast %30 : i32 to index
    %c1_37 = arith.constant 1 : index
    %c0_38 = arith.constant 0 : index
    %34 = vector.load %32[%33, %c1_37, %c0_38] : memref<20x18x4xf32, #tpu.memory_space<vmem>>, vector<10x16x4xf32>
    %35 = arith.truncf %34 : vector<10x16x4xf32> to vector<10x16x4xbf16>
    %c0_39 = arith.constant 0 : index
    %c0_40 = arith.constant 0 : index
    %c16 = arith.constant 16 : index
    %36 = vector.load %arg8[%c0_39, %c0_40, %c16] : memref<10x16x36xbf16, #tpu.memory_space<vmem>>, vector<10x16x4xbf16>
    tpu.vector_store %arg8[%c0_39, %c0_40, %c16], %35 {strides = array<i32>} : memref<10x16x36xbf16, #tpu.memory_space<vmem>>, vector<10x16x4xbf16>,
    %c1_i32_41 = arith.constant 1 : i32
    %37 = arith.addi %1, %c1_i32_41 : i32
    %c0_i32_42 = arith.constant 0 : i32
    %c0_i32_43 = arith.constant 0 : i32
    %c0_i32_44 = arith.constant 0 : i32
    %c0_i32_45 = arith.constant 0 : i32
    %38 = tpu.memref_slice %arg2[%c0_i32_42, %c0_i32_43, %c0_i32_44, %c0_i32_45] : memref<1x20x18x4xf32, #tpu.memory_space<vmem>> -> memref<1x20x18x4xf32, #tpu.memory_space<vmem>>
    %39 = tpu.memref_squeeze %38 : memref<1x20x18x4xf32, #tpu.memory_space<vmem>> -> memref<20x18x4xf32, #tpu.memory_space<vmem>>
    %40 = arith.index_cast %37 : i32 to index
    %c2_46 = arith.constant 2 : index
    %c0_47 = arith.constant 0 : index
    %41 = vector.load %39[%40, %c2_46, %c0_47] : memref<20x18x4xf32, #tpu.memory_space<vmem>>, vector<10x16x4xf32>
    %42 = arith.truncf %41 : vector<10x16x4xf32> to vector<10x16x4xbf16>
    %c0_48 = arith.constant 0 : index
    %c0_49 = arith.constant 0 : index
    %c20 = arith.constant 20 : index
    %43 = vector.load %arg8[%c0_48, %c0_49, %c20] : memref<10x16x36xbf16, #tpu.memory_space<vmem>>, vector<10x16x4xbf16>
    tpu.vector_store %arg8[%c0_48, %c0_49, %c20], %42 {strides = array<i32>} : memref<10x16x36xbf16, #tpu.memory_space<vmem>>, vector<10x16x4xbf16>,
    %c2_i32 = arith.constant 2 : i32
    %44 = arith.addi %1, %c2_i32 : i32
    %c0_i32_50 = arith.constant 0 : i32
    %c0_i32_51 = arith.constant 0 : i32
    %c0_i32_52 = arith.constant 0 : i32
    %c0_i32_53 = arith.constant 0 : i32
    %45 = tpu.memref_slice %arg2[%c0_i32_50, %c0_i32_51, %c0_i32_52, %c0_i32_53] : memref<1x20x18x4xf32, #tpu.memory_space<vmem>> -> memref<1x20x18x4xf32, #tpu.memory_space<vmem>>
    %46 = tpu.memref_squeeze %45 : memref<1x20x18x4xf32, #tpu.memory_space<vmem>> -> memref<20x18x4xf32, #tpu.memory_space<vmem>>
    %47 = arith.index_cast %44 : i32 to index
    %c0_54 = arith.constant 0 : index
    %c0_55 = arith.constant 0 : index
    %48 = vector.load %46[%47, %c0_54, %c0_55] : memref<20x18x4xf32, #tpu.memory_space<vmem>>, vector<10x16x4xf32>
    %49 = arith.truncf %48 : vector<10x16x4xf32> to vector<10x16x4xbf16>
    %c0_56 = arith.constant 0 : index
    %c0_57 = arith.constant 0 : index
    %c24 = arith.constant 24 : index
    %50 = vector.load %arg8[%c0_56, %c0_57, %c24] : memref<10x16x36xbf16, #tpu.memory_space<vmem>>, vector<10x16x4xbf16>
    tpu.vector_store %arg8[%c0_56, %c0_57, %c24], %49 {strides = array<i32>} : memref<10x16x36xbf16, #tpu.memory_space<vmem>>, vector<10x16x4xbf16>,
    %c2_i32_58 = arith.constant 2 : i32
    %51 = arith.addi %1, %c2_i32_58 : i32
    %c0_i32_59 = arith.constant 0 : i32
    %c0_i32_60 = arith.constant 0 : i32
    %c0_i32_61 = arith.constant 0 : i32
    %c0_i32_62 = arith.constant 0 : i32
    %52 = tpu.memref_slice %arg2[%c0_i32_59, %c0_i32_60, %c0_i32_61, %c0_i32_62] : memref<1x20x18x4xf32, #tpu.memory_space<vmem>> -> memref<1x20x18x4xf32, #tpu.memory_space<vmem>>
    %53 = tpu.memref_squeeze %52 : memref<1x20x18x4xf32, #tpu.memory_space<vmem>> -> memref<20x18x4xf32, #tpu.memory_space<vmem>>
    %54 = arith.index_cast %51 : i32 to index
    %c1_63 = arith.constant 1 : index
    %c0_64 = arith.constant 0 : index
    %55 = vector.load %53[%54, %c1_63, %c0_64] : memref<20x18x4xf32, #tpu.memory_space<vmem>>, vector<10x16x4xf32>
    %56 = arith.truncf %55 : vector<10x16x4xf32> to vector<10x16x4xbf16>
    %c0_65 = arith.constant 0 : index
    %c0_66 = arith.constant 0 : index
    %c28 = arith.constant 28 : index
    %57 = vector.load %arg8[%c0_65, %c0_66, %c28] : memref<10x16x36xbf16, #tpu.memory_space<vmem>>, vector<10x16x4xbf16>
    tpu.vector_store %arg8[%c0_65, %c0_66, %c28], %56 {strides = array<i32>} : memref<10x16x36xbf16, #tpu.memory_space<vmem>>, vector<10x16x4xbf16>,
    %c2_i32_67 = arith.constant 2 : i32
    %58 = arith.addi %1, %c2_i32_67 : i32
    %c0_i32_68 = arith.constant 0 : i32
    %c0_i32_69 = arith.constant 0 : i32
    %c0_i32_70 = arith.constant 0 : i32
    %c0_i32_71 = arith.constant 0 : i32
    %59 = tpu.memref_slice %arg2[%c0_i32_68, %c0_i32_69, %c0_i32_70, %c0_i32_71] : memref<1x20x18x4xf32, #tpu.memory_space<vmem>> -> memref<1x20x18x4xf32, #tpu.memory_space<vmem>>
    %60 = tpu.memref_squeeze %59 : memref<1x20x18x4xf32, #tpu.memory_space<vmem>> -> memref<20x18x4xf32, #tpu.memory_space<vmem>>
    %61 = arith.index_cast %58 : i32 to index
    %c2_72 = arith.constant 2 : index
    %c0_73 = arith.constant 0 : index
    %62 = vector.load %60[%61, %c2_72, %c0_73] : memref<20x18x4xf32, #tpu.memory_space<vmem>>, vector<10x16x4xf32>
    %63 = arith.truncf %62 : vector<10x16x4xf32> to vector<10x16x4xbf16>
    %c0_74 = arith.constant 0 : index
    %c0_75 = arith.constant 0 : index
    %c32 = arith.constant 32 : index
    %64 = vector.load %arg8[%c0_74, %c0_75, %c32] : memref<10x16x36xbf16, #tpu.memory_space<vmem>>, vector<10x16x4xbf16>
    tpu.vector_store %arg8[%c0_74, %c0_75, %c32], %63 {strides = array<i32>} : memref<10x16x36xbf16, #tpu.memory_space<vmem>>, vector<10x16x4xbf16>,
    %c0_76 = arith.constant 0 : index
    %c0_77 = arith.constant 0 : index
    %c0_78 = arith.constant 0 : index
    %65 = vector.load %arg8[%c0_76, %c0_77, %c0_78] : memref<10x16x36xbf16, #tpu.memory_space<vmem>>, vector<10x16x36xbf16>
    %66 = vector.shape_cast %65 : vector<10x16x36xbf16> to vector<160x36xbf16>
    %c0_79 = arith.constant 0 : index
    %c0_80 = arith.constant 0 : index
    %67 = vector.load %arg3[%c0_79, %c0_80] : memref<36x4xbf16, #tpu.memory_space<vmem>>, vector<36x4xbf16>
    %cst = arith.constant dense<0.000000e+00> : vector<160x4xf32>
    %68 = tpu.matmul %66, %67, %cst {dimension_numbers = #tpu.dot_dimension_numbers<[1], [0], [0], [1], [0, 0, 1, 1], [], []>} : vector<160x36xbf16>, vector<36x4xbf16>, vector<160x4xf32> -> vector<160x4xf32>
    %c0_81 = arith.constant 0 : index
    %c0_82 = arith.constant 0 : index
    %69 = vector.load %arg5[%c0_81, %c0_82] : memref<1x4xf32, #tpu.memory_space<vmem>>, vector<1x4xf32>
    %70 = vector.broadcast %69 : vector<1x4xf32> to vector<160x4xf32>
    %71 = arith.addf %68, %70 : vector<160x4xf32>
    %cst_83 = arith.constant 0.000000e+00 : f32
    %72 = vector.broadcast %cst_83 : f32 to vector<160x4xf32>
    %73 = arith.maximumf %71, %72 : vector<160x4xf32>
    %cst_84 = arith.constant 0.000000e+00 : f32
    %74 = vector.broadcast %cst_84 : f32 to vector<10x1x4xf32>
    %c0_85 = arith.constant 0 : index
    %c0_86 = arith.constant 0 : index
    %c0_87 = arith.constant 0 : index
    %75 = vector.load %arg9[%c0_85, %c0_86, %c0_87] : memref<10x18x4xf32, #tpu.memory_space<vmem>>, vector<10x1x4xf32>
    tpu.vector_store %arg9[%c0_85, %c0_86, %c0_87], %74 {strides = array<i32>} : memref<10x18x4xf32, #tpu.memory_space<vmem>>, vector<10x1x4xf32>,
    %cst_88 = arith.constant 0.000000e+00 : f32
    %76 = vector.broadcast %cst_88 : f32 to vector<10x1x4xf32>
    %c0_89 = arith.constant 0 : index
    %c17 = arith.constant 17 : index
    %c0_90 = arith.constant 0 : index
    %77 = vector.load %arg9[%c0_89, %c17, %c0_90] : memref<10x18x4xf32, #tpu.memory_space<vmem>>, vector<10x1x4xf32>
    tpu.vector_store %arg9[%c0_89, %c17, %c0_90], %76 {strides = array<i32>} : memref<10x18x4xf32, #tpu.memory_space<vmem>>, vector<10x1x4xf32>,
    %78 = vector.shape_cast %73 : vector<160x4xf32> to vector<10x16x4xf32>
    %c0_91 = arith.constant 0 : index
    %c1_92 = arith.constant 1 : index
    %c0_93 = arith.constant 0 : index
    %79 = vector.load %arg9[%c0_91, %c1_92, %c0_93] : memref<10x18x4xf32, #tpu.memory_space<vmem>>, vector<10x16x4xf32>
    tpu.vector_store %arg9[%c0_91, %c1_92, %c0_93], %78 {strides = array<i32>} : memref<10x18x4xf32, #tpu.memory_space<vmem>>, vector<10x16x4xf32>,
    %c0_i32_94 = arith.constant 0 : i32
    %80 = arith.cmpi eq, %arg1, %c0_i32_94 : i32
    %81 = arith.extui %80 : i1 to i32
    %c0_i32_95 = arith.constant 0 : i32
    %82 = arith.cmpi ne, %81, %c0_i32_95 : i32
    scf.if %82 {
      %cst_172 = arith.constant 0.000000e+00 : f32
      %133 = vector.broadcast %cst_172 : f32 to vector<1x18x4xf32>
      %c0_173 = arith.constant 0 : index
      %c0_174 = arith.constant 0 : index
      %c0_175 = arith.constant 0 : index
      %134 = vector.load %arg9[%c0_173, %c0_174, %c0_175] : memref<10x18x4xf32, #tpu.memory_space<vmem>>, vector<1x18x4xf32>
      tpu.vector_store %arg9[%c0_173, %c0_174, %c0_175], %133 {strides = array<i32>} : memref<10x18x4xf32, #tpu.memory_space<vmem>>, vector<1x18x4xf32>,
    } else {
    }
    %c1_i32_96 = arith.constant 1 : i32
    %83 = arith.cmpi eq, %arg1, %c1_i32_96 : i32
    %84 = arith.extui %83 : i1 to i32
    %c0_i32_97 = arith.constant 0 : i32
    %85 = arith.cmpi ne, %84, %c0_i32_97 : i32
    scf.if %85 {
      %cst_172 = arith.constant 0.000000e+00 : f32
      %133 = vector.broadcast %cst_172 : f32 to vector<1x18x4xf32>
      %c9 = arith.constant 9 : index
      %c0_173 = arith.constant 0 : index
      %c0_174 = arith.constant 0 : index
      %134 = vector.load %arg9[%c9, %c0_173, %c0_174] : memref<10x18x4xf32, #tpu.memory_space<vmem>>, vector<1x18x4xf32>
      tpu.vector_store %arg9[%c9, %c0_173, %c0_174], %133 {strides = array<i32>} : memref<10x18x4xf32, #tpu.memory_space<vmem>>, vector<1x18x4xf32>,
    } else {
    }
    %c0_98 = arith.constant 0 : index
    %c0_99 = arith.constant 0 : index
    %c0_100 = arith.constant 0 : index
    %86 = vector.load %arg9[%c0_98, %c0_99, %c0_100] : memref<10x18x4xf32, #tpu.memory_space<vmem>>, vector<8x16x4xf32>
    %87 = arith.truncf %86 : vector<8x16x4xf32> to vector<8x16x4xbf16>
    %c0_101 = arith.constant 0 : index
    %c0_102 = arith.constant 0 : index
    %c0_103 = arith.constant 0 : index
    %88 = vector.load %arg10[%c0_101, %c0_102, %c0_103] : memref<8x16x36xbf16, #tpu.memory_space<vmem>>, vector<8x16x4xbf16>
    tpu.vector_store %arg10[%c0_101, %c0_102, %c0_103], %87 {strides = array<i32>} : memref<8x16x36xbf16, #tpu.memory_space<vmem>>, vector<8x16x4xbf16>,
    %c0_104 = arith.constant 0 : index
    %c1_105 = arith.constant 1 : index
    %c0_106 = arith.constant 0 : index
    %89 = vector.load %arg9[%c0_104, %c1_105, %c0_106] : memref<10x18x4xf32, #tpu.memory_space<vmem>>, vector<8x16x4xf32>
    %90 = arith.truncf %89 : vector<8x16x4xf32> to vector<8x16x4xbf16>
    %c0_107 = arith.constant 0 : index
    %c0_108 = arith.constant 0 : index
    %c4_109 = arith.constant 4 : index
    %91 = vector.load %arg10[%c0_107, %c0_108, %c4_109] : memref<8x16x36xbf16, #tpu.memory_space<vmem>>, vector<8x16x4xbf16>
    tpu.vector_store %arg10[%c0_107, %c0_108, %c4_109], %90 {strides = array<i32>} : memref<8x16x36xbf16, #tpu.memory_space<vmem>>, vector<8x16x4xbf16>,
    %c0_110 = arith.constant 0 : index
    %c2_111 = arith.constant 2 : index
    %c0_112 = arith.constant 0 : index
    %92 = vector.load %arg9[%c0_110, %c2_111, %c0_112] : memref<10x18x4xf32, #tpu.memory_space<vmem>>, vector<8x16x4xf32>
    %93 = arith.truncf %92 : vector<8x16x4xf32> to vector<8x16x4xbf16>
    %c0_113 = arith.constant 0 : index
    %c0_114 = arith.constant 0 : index
    %c8_115 = arith.constant 8 : index
    %94 = vector.load %arg10[%c0_113, %c0_114, %c8_115] : memref<8x16x36xbf16, #tpu.memory_space<vmem>>, vector<8x16x4xbf16>
    tpu.vector_store %arg10[%c0_113, %c0_114, %c8_115], %93 {strides = array<i32>} : memref<8x16x36xbf16, #tpu.memory_space<vmem>>, vector<8x16x4xbf16>,
    %c1_116 = arith.constant 1 : index
    %c0_117 = arith.constant 0 : index
    %c0_118 = arith.constant 0 : index
    %95 = vector.load %arg9[%c1_116, %c0_117, %c0_118] : memref<10x18x4xf32, #tpu.memory_space<vmem>>, vector<8x16x4xf32>
    %96 = arith.truncf %95 : vector<8x16x4xf32> to vector<8x16x4xbf16>
    %c0_119 = arith.constant 0 : index
    %c0_120 = arith.constant 0 : index
    %c12_121 = arith.constant 12 : index
    %97 = vector.load %arg10[%c0_119, %c0_120, %c12_121] : memref<8x16x36xbf16, #tpu.memory_space<vmem>>, vector<8x16x4xbf16>
    tpu.vector_store %arg10[%c0_119, %c0_120, %c12_121], %96 {strides = array<i32>} : memref<8x16x36xbf16, #tpu.memory_space<vmem>>, vector<8x16x4xbf16>,
    %c1_122 = arith.constant 1 : index
    %c1_123 = arith.constant 1 : index
    %c0_124 = arith.constant 0 : index
    %98 = vector.load %arg9[%c1_122, %c1_123, %c0_124] : memref<10x18x4xf32, #tpu.memory_space<vmem>>, vector<8x16x4xf32>
    %99 = arith.truncf %98 : vector<8x16x4xf32> to vector<8x16x4xbf16>
    %c0_125 = arith.constant 0 : index
    %c0_126 = arith.constant 0 : index
    %c16_127 = arith.constant 16 : index
    %100 = vector.load %arg10[%c0_125, %c0_126, %c16_127] : memref<8x16x36xbf16, #tpu.memory_space<vmem>>, vector<8x16x4xbf16>
    tpu.vector_store %arg10[%c0_125, %c0_126, %c16_127], %99 {strides = array<i32>} : memref<8x16x36xbf16, #tpu.memory_space<vmem>>, vector<8x16x4xbf16>,
    %c1_128 = arith.constant 1 : index
    %c2_129 = arith.constant 2 : index
    %c0_130 = arith.constant 0 : index
    %101 = vector.load %arg9[%c1_128, %c2_129, %c0_130] : memref<10x18x4xf32, #tpu.memory_space<vmem>>, vector<8x16x4xf32>
    %102 = arith.truncf %101 : vector<8x16x4xf32> to vector<8x16x4xbf16>
    %c0_131 = arith.constant 0 : index
    %c0_132 = arith.constant 0 : index
    %c20_133 = arith.constant 20 : index
    %103 = vector.load %arg10[%c0_131, %c0_132, %c20_133] : memref<8x16x36xbf16, #tpu.memory_space<vmem>>, vector<8x16x4xbf16>
    tpu.vector_store %arg10[%c0_131, %c0_132, %c20_133], %102 {strides = array<i32>} : memref<8x16x36xbf16, #tpu.memory_space<vmem>>, vector<8x16x4xbf16>,
    %c2_134 = arith.constant 2 : index
    %c0_135 = arith.constant 0 : index
    %c0_136 = arith.constant 0 : index
    %104 = vector.load %arg9[%c2_134, %c0_135, %c0_136] : memref<10x18x4xf32, #tpu.memory_space<vmem>>, vector<8x16x4xf32>
    %105 = arith.truncf %104 : vector<8x16x4xf32> to vector<8x16x4xbf16>
    %c0_137 = arith.constant 0 : index
    %c0_138 = arith.constant 0 : index
    %c24_139 = arith.constant 24 : index
    %106 = vector.load %arg10[%c0_137, %c0_138, %c24_139] : memref<8x16x36xbf16, #tpu.memory_space<vmem>>, vector<8x16x4xbf16>
    tpu.vector_store %arg10[%c0_137, %c0_138, %c24_139], %105 {strides = array<i32>} : memref<8x16x36xbf16, #tpu.memory_space<vmem>>, vector<8x16x4xbf16>,
    %c2_140 = arith.constant 2 : index
    %c1_141 = arith.constant 1 : index
    %c0_142 = arith.constant 0 : index
    %107 = vector.load %arg9[%c2_140, %c1_141, %c0_142] : memref<10x18x4xf32, #tpu.memory_space<vmem>>, vector<8x16x4xf32>
    %108 = arith.truncf %107 : vector<8x16x4xf32> to vector<8x16x4xbf16>
    %c0_143 = arith.constant 0 : index
    %c0_144 = arith.constant 0 : index
    %c28_145 = arith.constant 28 : index
    %109 = vector.load %arg10[%c0_143, %c0_144, %c28_145] : memref<8x16x36xbf16, #tpu.memory_space<vmem>>, vector<8x16x4xbf16>
    tpu.vector_store %arg10[%c0_143, %c0_144, %c28_145], %108 {strides = array<i32>} : memref<8x16x36xbf16, #tpu.memory_space<vmem>>, vector<8x16x4xbf16>,
    %c2_146 = arith.constant 2 : index
    %c2_147 = arith.constant 2 : index
    %c0_148 = arith.constant 0 : index
    %110 = vector.load %arg9[%c2_146, %c2_147, %c0_148] : memref<10x18x4xf32, #tpu.memory_space<vmem>>, vector<8x16x4xf32>
    %111 = arith.truncf %110 : vector<8x16x4xf32> to vector<8x16x4xbf16>
    %c0_149 = arith.constant 0 : index
    %c0_150 = arith.constant 0 : index
    %c32_151 = arith.constant 32 : index
    %112 = vector.load %arg10[%c0_149, %c0_150, %c32_151] : memref<8x16x36xbf16, #tpu.memory_space<vmem>>, vector<8x16x4xbf16>
    tpu.vector_store %arg10[%c0_149, %c0_150, %c32_151], %111 {strides = array<i32>} : memref<8x16x36xbf16, #tpu.memory_space<vmem>>, vector<8x16x4xbf16>,
    %c0_152 = arith.constant 0 : index
    %c0_153 = arith.constant 0 : index
    %c0_154 = arith.constant 0 : index
    %113 = vector.load %arg10[%c0_152, %c0_153, %c0_154] : memref<8x16x36xbf16, #tpu.memory_space<vmem>>, vector<8x16x36xbf16>
    %114 = vector.shape_cast %113 : vector<8x16x36xbf16> to vector<128x36xbf16>
    %c0_155 = arith.constant 0 : index
    %c0_156 = arith.constant 0 : index
    %115 = vector.load %arg4[%c0_155, %c0_156] : memref<36x4xbf16, #tpu.memory_space<vmem>>, vector<36x4xbf16>
    %cst_157 = arith.constant dense<0.000000e+00> : vector<128x4xf32>
    %116 = tpu.matmul %114, %115, %cst_157 {dimension_numbers = #tpu.dot_dimension_numbers<[1], [0], [0], [1], [0, 0, 1, 1], [], []>} : vector<128x36xbf16>, vector<36x4xbf16>, vector<128x4xf32> -> vector<128x4xf32>
    %c0_158 = arith.constant 0 : index
    %c0_159 = arith.constant 0 : index
    %117 = vector.load %arg6[%c0_158, %c0_159] : memref<1x4xf32, #tpu.memory_space<vmem>>, vector<1x4xf32>
    %118 = vector.broadcast %117 : vector<1x4xf32> to vector<128x4xf32>
    %119 = arith.addf %116, %118 : vector<128x4xf32>
    %c2_i32_160 = arith.constant 2 : i32
    %120 = arith.addi %1, %c2_i32_160 : i32
    %c0_i32_161 = arith.constant 0 : i32
    %c0_i32_162 = arith.constant 0 : i32
    %c0_i32_163 = arith.constant 0 : i32
    %c0_i32_164 = arith.constant 0 : i32
    %121 = tpu.memref_slice %arg2[%c0_i32_161, %c0_i32_162, %c0_i32_163, %c0_i32_164] : memref<1x20x18x4xf32, #tpu.memory_space<vmem>> -> memref<1x20x18x4xf32, #tpu.memory_space<vmem>>
    %122 = tpu.memref_squeeze %121 : memref<1x20x18x4xf32, #tpu.memory_space<vmem>> -> memref<20x18x4xf32, #tpu.memory_space<vmem>>
    %123 = arith.index_cast %120 : i32 to index
    %c1_165 = arith.constant 1 : index
    %c0_166 = arith.constant 0 : index
    %124 = vector.load %122[%123, %c1_165, %c0_166] : memref<20x18x4xf32, #tpu.memory_space<vmem>>, vector<8x16x4xf32>
    %125 = vector.shape_cast %124 : vector<8x16x4xf32> to vector<128x4xf32>
    %126 = arith.addf %119, %125 : vector<128x4xf32>
    %cst_167 = arith.constant 0.000000e+00 : f32
    %127 = vector.broadcast %cst_167 : f32 to vector<128x4xf32>
    %128 = arith.maximumf %126, %127 : vector<128x4xf32>
    %129 = vector.shape_cast %128 : vector<128x4xf32> to vector<8x16x4xf32>
    %c0_168 = arith.constant 0 : index
    %c0_169 = arith.constant 0 : index
    %c0_170 = arith.constant 0 : index
    %c0_171 = arith.constant 0 : index
    %130 = vector.load %arg7[%c0_168, %c0_169, %c0_170, %c0_171] : memref<1x8x16x4xf32, #tpu.memory_space<vmem>>, vector<1x8x16x4xf32>
    %131 = vector.shape_cast %130 : vector<1x8x16x4xf32> to vector<8x16x4xf32>
    %132 = vector.shape_cast %129 : vector<8x16x4xf32> to vector<1x8x16x4xf32>
    tpu.vector_store %arg7[%c0_168, %c0_169, %c0_170, %c0_171], %132 {strides = array<i32>} : memref<1x8x16x4xf32, #tpu.memory_space<vmem>>, vector<1x8x16x4xf32>,
    return
  }
  func.func @transform_0(%arg0: i32, %arg1: i32) -> (i32, i32, i32, i32) {
    %c0_i32 = arith.constant 0 : i32
    %c0_i32_0 = arith.constant 0 : i32
    %c0_i32_1 = arith.constant 0 : i32
    %c0_i32_2 = arith.constant 0 : i32
    return %arg0, %c0_i32, %c0_i32_0, %c0_i32_1 : i32, i32, i32, i32
  }
  func.func @transform_1(%arg0: i32, %arg1: i32) -> (i32, i32) {
    %c0_i32 = arith.constant 0 : i32
    %c0_i32_0 = arith.constant 0 : i32
    %c0_i32_1 = arith.constant 0 : i32
    return %c0_i32, %c0_i32_0 : i32, i32
  }
  func.func @transform_2(%arg0: i32, %arg1: i32) -> (i32, i32) {
    %c0_i32 = arith.constant 0 : i32
    %c0_i32_0 = arith.constant 0 : i32
    %c0_i32_1 = arith.constant 0 : i32
    return %c0_i32, %c0_i32_0 : i32, i32
  }
  func.func @transform_3(%arg0: i32, %arg1: i32) -> (i32, i32) {
    %c0_i32 = arith.constant 0 : i32
    %c0_i32_0 = arith.constant 0 : i32
    %c0_i32_1 = arith.constant 0 : i32
    return %c0_i32, %c0_i32_0 : i32, i32
  }
  func.func @transform_4(%arg0: i32, %arg1: i32) -> (i32, i32) {
    %c0_i32 = arith.constant 0 : i32
    %c0_i32_0 = arith.constant 0 : i32
    %c0_i32_1 = arith.constant 0 : i32
    return %c0_i32, %c0_i32_0 : i32, i32
  }
  func.func @transform_5(%arg0: i32, %arg1: i32) -> (i32, i32, i32, i32) {
    %c0_i32 = arith.constant 0 : i32
    %c0_i32_0 = arith.constant 0 : i32
    %c0_i32_1 = arith.constant 0 : i32
    return %arg0, %arg1, %c0_i32, %c0_i32_0 : i32, i32, i32, i32
  }
}

</mosaic_0001>

<bundles_post_ra>
// kernel: tpu_custom_call.1
= control target key start
LH: loop header
LB: loop body
LE: loop exit
PB: predicated region body
PF: predicated region fallthrough
CT: control target
= control target key end

     0   :  { %s4565_s18 = smov 0   ;;  %s4567_s19 = smov 0   ;;  %s5785_s0 = inlined_call_operand.vmem [shape: f32[2,20,18,4], index: 0, kind: input, shape index: {}]   ;;  %s5786_s1 = inlined_call_operand.vmem [shape: bf16[36,4], index: 1, kind: input, shape index: {}]   ;;  %s5787_s2 = inlined_call_operand.vmem [shape: bf16[36,4], index: 2, kind: input, shape index: {}]   ;;  %s5788_s3 = inlined_call_operand.vmem [shape: f32[1,4], index: 3, kind: input, shape index: {}]   ;;  %s5789_s4 = inlined_call_operand.vmem [shape: f32[1,4], index: 4, kind: input, shape index: {}]   ;;  %s5790_s5 = inlined_call_operand.vmem [shape: f32[2,16,16,4], index: 5, kind: output, shape index: {}]  }
   0x1   :  { %s4569_s20 = smov 0   ;;  %s4571_s21 = smov 0  }
   0x2   :  { %s4573_s22 = smov 0  }
   0x3 LB: > { %s24_s23 = sadd.s32 1, %s4514_s20  ;;  %s27_s24 = sadd.s32 1, %s4518_s21  ;;  %s4522_s22 = sphi %s4573_s22, %s15_s22   ;;  %s4518_s21 = sphi %s4571_s21, %s5794_s21   ;;  %s4514_s20 = sphi %s4569_s20, %s5793_s20   ;;  %s4510_s19 = sphi %s4567_s19, %s5792_s19   ;;  %s4506_s18 = sphi %s4565_s18, %s5791_s18  }
   0x4   : > { %p25_p0 = scmp.ge.s32.totalorder %s24_s23, 2  ;;  %p3490_p1 = scmp.ge.s32.totalorder %s4522_s22, 1 }
   0x5   : > { %p201_p2 = scmp.lt.s32.totalorder %s4522_s22, 5 }
   0x6   : > { %s5796_s23 = smov (%p25_p0, %s24_s23), 0  ;;  %s5798_s24 = smov (!%p25_p0, %s27_s24), %s4518_s21 }
   0x7   : > { %p202_p3 = pnand %p3490_p1, %p201_p2  ;;  %p29_p4 = scmp.ge.s32.totalorder %s5798_s24, 2 }
   0x8   : > { %p234_p5 = scmp.lt.s32.totalorder (!%p202_p3), %s4510_s19, 1  ;;  %s3492_s25 = sshll.u32 (!%p202_p3), %s4506_s18, 3 }
   0x9   : > { %s5800_s24 = smov (%p29_p4, %s5798_s24), 0  ;;  %205 = sbr.rel (%p202_p3) target bundleno = 1262 (0x4ee), region = 40 }
   0xa   : > { %p242_p6 = scmp.lt.s32.totalorder (!%p202_p3), %s3492_s25, 15  ;;  %s3497_s26 = smul.u32 (!%p202_p3), 192, %s4506_s18 }
   0xb   : > { %s4524_s14 = smov (!%p202_p3), 4   ;;  %s4525_s15 = smov (!%p202_p3), 8  }
   0xc   : > { %s4526_s16 = smov (!%p202_p3), 12   ;;  %s4527_s17 = smov (!%p202_p3), 16  }
   0xd   : > { %p3826_p7 = scmp.ne.s32.totalorder (!%p202_p3), %s4506_s18, 0 }
   0xe   : > { %s5802_s19 = smov (!%p234_p5, %s4510_s19), 1  ;;  %s5804_s25 = smov (!%p242_p6, %s3492_s25), 15  ;;  %vm354_vm0 = vcmask 27648   ;;  %v4460_v57 = vld [vmem:[%s5786_s1 + $0x10] ss:$0 sps:$4 sm:$0x33]  }
   0xf   : > { %s4408_s27 = smul.u32 480, %s5802_s19  ;;  %s3494_s28 = sshll.u32 %s5802_s19, 5  ;;  %vm1797_vm1 = vcmask 1041408   ;;  %v4461_v61 = vld [vmem:[%s5786_s1 + $0x8] sm:$0xff]   ;;  %v4462_v63 = vld [vmem:[%s5786_s1] sm:$0xff]   ;;  %vm515_vm2 = vcmask 60448  }
  0x10   : > { %s3493_s29 = sshll.u32 %s5804_s25, 1  ;;  %s4528_s19 = smov 20   ;;  %v1799_v59 = vsel %vm1797_vm1, %v4460_v57, 0  ;;  %4406 = vmatprep.subr.msk.bf16.mxu0 %vm1797_vm1, %v4460_v57  ;;  %vm676_vm3 = vcmask 93248   ;;  %vm840_vm4 = vcmask 126048   ;;  %vm1001_vm5 = vcmask 158848  }
  0x11   : > { %s238_s7 = scalar_lea.vmem %s5785_s0, %s4408_s27  ;;  %s246_s8 = sadd.s32 %s3494_s28, %s3493_s29  ;;  %4359 = vmatpush3.bf16.msra.mxu0 %v1799_v59  ;;  %vm1162_vm6 = vcmask 191648   ;;  %vm1326_vm7 = vcmask 224448   ;;  %vm1487_vm8 = vcmask 257248   ;;  %vm1648_vm9 = vcmask 290048  }
  0x12   : > { %s3495_s9 = sshll.u32 %s246_s8, 3  ;;  %s4602_s10 = scalar_lea.vmem %s238_s7, %s3497_s26  ;;  %4360 = vmatprep.subr.bf16.mxu0 %v4461_v61  ;;  %vm1766_vm10 = vcmask 293888   ;;  %vm1955_vm11 = vcmask 31744   ;;  %vm1934_vm12 = vcmask 24576  }
  0x13   : > { %s4607_s13 = scalar_lea.vmem %s5790_s5, %s3495_s9  ;;  %v377_v0 = vld [vmem:[%s4602_s10 + $0x19] sm:$0xff]  ;;  %v375_v1 = vld [vmem:[%s4602_s10 + $0x1] sm:$0xff]  ;;  %v376_v5 = vld [vmem:[%s4602_s10 + $0x9] sm:$0xff]  ;;  %s4529_s25 = smov 24  }
  0x14   : > { %v378_v2 = vld [vmem:[%s4602_s10 + $0x21] sm:$0xff]  ;;  %v4612_v3 = vpack.c.bf16 %v377_v0, %v377_v0  ;;  %v4030_v4 = vpack.c.bf16 %v375_v1, %v375_v1  ;;  %v3560_v6 = vld [vmem:[%s4602_s10 + $0x18] sm:$0xff]  ;;  %v4031_v8 = vpack.c.bf16 %v376_v5, %v376_v5  ;;  %v3562_v11 = vld [vmem:[%s4602_s10 + $0x30] sm:$0xff]  ;;  %s4530_s28 = smov 28   ;;  %s4531_s8 = smov 32  }
  0x15   : > { %v4619_v7 = vpack.c.bf16 %v378_v2, %v378_v2  ;;  %v536_v9 = vld [vmem:[%s4602_s10 + $0x2] sm:$0xff]  ;;  %v4070_v10 = vpack.c.bf16 %v3560_v6, %v3560_v6  ;;  %v379_v12 = vld [vmem:[%s4602_s10 + $0x31] sm:$0xff]  ;;  %v4624_v13 = vpack.c.bf16 %v3562_v11, %v3562_v11  ;;  %v538_v23 = vld [vmem:[%s4602_s10 + $0x1a] sm:$0xff]  ;;  %4361 = vmatpush3.bf16.msra.mxu0 %v4461_v61 }
  0x16   : > { %459 = vrot.lane.b32.xlu1 %v4612_v3, %s4524_s14  ;;  %455 = vrot.lane.b32.xlu0 %v4030_v4, %s4524_s14  ;;  %v3561_v14 = vld [vmem:[%s4602_s10 + $0x20] sm:$0xff]  ;;  %v3563_v15 = vld [vmem:[%s4602_s10 + $0x38] sm:$0xff]  ;;  %v4050_v21 = vpack.c.bf16 %v536_v9, %v536_v9  ;;  %v4640_v22 = vpack.c.bf16 %v379_v12, %v379_v12  ;;  %v4052_v30 = vpack.c.bf16 %v538_v23, %v538_v23 }
  0x17   : > { %v4071_v16 = vpack.c.bf16 %v3561_v14, %v3561_v14  ;;  %v4628_v17 = vpack.c.bf16 %v3563_v15, %v3563_v15  ;;  %v3684_v18 = vld [vmem:[%s4602_s10 + $0x48] sm:$0xff]  ;;  %357 = vst.msk [vmem:[#allocation2 + $0x8] sm:$0xf] %vm354_vm0, %v4070_v10  ;;  %v3685_v20 = vld [vmem:[%s4602_s10 + $0x50] sm:$0xff]  ;;  %359 = vst.msk [vmem:[#allocation2 + $0x10] sm:$0xf] %vm354_vm0, %v4624_v13  ;;  %4362 = vmatprep.subr.bf16.mxu0 %v4462_v63 }
  0x18   : > { %v4632_v19 = vpack.c.bf16 %v3684_v18, %v3684_v18  ;;  %v537_v24 = vld [vmem:[%s4602_s10 + $0xa] sm:$0xff]  ;;  %v4644_v25 = vpack.c.bf16 %v3685_v20, %v3685_v20  ;;  %v3566_v27 = vld [vmem:[%s4602_s10 + $0x60] sm:$0xff]  ;;  %v3688_v33 = vld [vmem:[%s4602_s10 + $0x78] sm:$0xff] }
  0x19   : > { %358 = vst.msk [vmem:[#allocation2 + $0xc] sm:$0xf] %vm354_vm0, %v4071_v16  ;;  %360 = vst.msk [vmem:[#allocation2 + $0x14] sm:$0xf] %vm354_vm0, %v4628_v17  ;;  %v3567_v26 = vld [vmem:[%s4602_s10 + $0x68] sm:$0xff]  ;;  %v4655_v29 = vpack.c.bf16 %v3566_v27, %v3566_v27  ;;  %v4051_v31 = vpack.c.bf16 %v537_v24, %v537_v24  ;;  %v3689_v32 = vld [vmem:[%s4602_s10 + $0x80] sm:$0xff]  ;;  %v4667_v36 = vpack.c.bf16 %v3688_v33, %v3688_v33  ;;  %4363 = vmatpush3.bf16.msra.mxu0 %v4462_v63 }
  0x1a   : > { %461 = vrot.lane.b32.xlu1 %v4619_v7, %s4524_s14  ;;  %457 = vrot.lane.b32.xlu0 %v4031_v8, %s4524_s14  ;;  %361 = vst.msk [vmem:[#allocation2 + $0x18] sm:$0xf] %vm354_vm0, %v4632_v19  ;;  %v4653_v28 = vpack.c.bf16 %v3567_v26, %v3567_v26  ;;  %362 = vst.msk [vmem:[#allocation2 + $0x1c] sm:$0xf] %vm354_vm0, %v4644_v25  ;;  %v254_v34 = vld [vmem:[%s4602_s10] sm:$0xff]  ;;  %v4665_v35 = vpack.c.bf16 %v3689_v32, %v3689_v32  ;;  %v255_v39 = vld [vmem:[%s4602_s10 + $0x8] sm:$0xff] }
  0x1b   : > { %v4010_v37 = vpack.c.bf16 %v254_v34, %v254_v34  ;;  %363 = vst.msk [vmem:[#allocation2 + $0x20] sm:$0xf] %vm354_vm0, %v4655_v29  ;;  %v539_v38 = vld [vmem:[%s4602_s10 + $0x22] sm:$0xff]  ;;  %v4011_v40 = vpack.c.bf16 %v255_v39, %v255_v39  ;;  %365 = vst.msk [vmem:[#allocation2 + $0x28] sm:$0xf] %vm354_vm0, %v4667_v36  ;;  %v3571_v42 = vld [vmem:[%s4602_s10 + $0x98] sm:$0xff] }
  0x1c   : > { %364 = vst.msk [vmem:[#allocation2 + $0x24] sm:$0xf] %vm354_vm0, %v4653_v28  ;;  %366 = vst.msk [vmem:[#allocation2 + $0x2c] sm:$0xf] %vm354_vm0, %v4665_v35  ;;  %v4053_v41 = vpack.c.bf16 %v539_v38, %v539_v38  ;;  %v3570_v43 = vld [vmem:[%s4602_s10 + $0x90] sm:$0xff]  ;;  %v4687_v44 = vpack.c.bf16 %v3571_v42, %v3571_v42  ;;  %v3603_v46 = vld [vmem:[%s4602_s10 + $0x39] sm:$0xff] }
  0x1d   : > { %355 = vst.msk [vmem:[#allocation2] sm:$0xf] %vm354_vm0, %v4010_v37  ;;  %356 = vst.msk [vmem:[#allocation2 + $0x4] sm:$0xf] %vm354_vm0, %v4011_v40  ;;  %v4689_v45 = vpack.c.bf16 %v3570_v43, %v3570_v43  ;;  %v4093_v47 = vpack.c.bf16 %v3603_v46, %v3603_v46  ;;  %v3642_v48 = vld [vmem:[%s4602_s10 + $0x32] sm:$0xff]  ;;  %v3643_v50 = vld [vmem:[%s4602_s10 + $0x3a] sm:$0xff] }
  0x1e   : > { %616 = vrot.lane.b32.xlu1 %v4050_v21, %s4525_s15  ;;  %463 = vrot.lane.b32.xlu0 %v4640_v22, %s4524_s14  ;;  %368 = vst.msk [vmem:[#allocation2 + $0x34] sm:$0xf] %vm354_vm0, %v4687_v44  ;;  %v4112_v49 = vpack.c.bf16 %v3642_v48, %v3642_v48  ;;  %v4113_v51 = vpack.c.bf16 %v3643_v50, %v3643_v50  ;;  %v3693_v52 = vld [vmem:[%s4602_s10 + $0xb0] sm:$0xff]  ;;  %v3692_v53 = vld [vmem:[%s4602_s10 + $0xa8] sm:$0xff] }
  0x1f   : > { %367 = vst.msk [vmem:[#allocation2 + $0x30] sm:$0xf] %vm354_vm0, %v4689_v45  ;;  %v4718_v54 = vpack.c.bf16 %v3693_v52, %v3693_v52  ;;  %v4720_v55 = vpack.c.bf16 %v3692_v53, %v3692_v53  ;;  %v3724_v56 = vld [vmem:[%s4602_s10 + $0x49] sm:$0xff]  ;;  %v3725_v60 = vld [vmem:[%s4602_s10 + $0x51] sm:$0xff]  ;;  %v3574_v5 = vld [vmem:[%s4602_s10 + $0xc0] sm:$0xff] }
  0x20   : > { %v4152_v58 = vpack.c.bf16 %v3724_v56, %v3724_v56  ;;  %v4153_v62 = vpack.c.bf16 %v3725_v60, %v3725_v60  ;;  %v3765_v0 = vld [vmem:[%s4602_s10 + $0x52] sm:$0xff]  ;;  %v3764_v1 = vld [vmem:[%s4602_s10 + $0x4a] sm:$0xff]  ;;  %v3606_v9 = vld [vmem:[%s4602_s10 + $0x61] sm:$0xff] }
  0x21   : > { %370 = vst.msk [vmem:[#allocation2 + $0x3c] sm:$0xf] %vm354_vm0, %v4718_v54  ;;  %369 = vst.msk [vmem:[#allocation2 + $0x38] sm:$0xf] %vm354_vm0, %v4720_v55  ;;  %v4173_v2 = vpack.c.bf16 %v3765_v0, %v3765_v0  ;;  %v3575_v4 = vld [vmem:[%s4602_s10 + $0xc8] sm:$0xff]  ;;  %v4096_v11 = vpack.c.bf16 %v3606_v9, %v3606_v9  ;;  %v3728_v21 = vld [vmem:[%s4602_s10 + $0x79] sm:$0xff] }
  0x22   : > { %620 = vrot.lane.b32.xlu1 %v4052_v30, %s4525_s15  ;;  %618 = vrot.lane.b32.xlu0 %v4051_v31, %s4525_s15  ;;  %v4769_v6 = vpack.c.bf16 %v3575_v4, %v3575_v4  ;;  %v3607_v8 = vld [vmem:[%s4602_s10 + $0x69] sm:$0xff]  ;;  %v3729_v20 = vld [vmem:[%s4602_s10 + $0x81] sm:$0xff]  ;;  %v4817_v23 = vpack.c.bf16 %v3728_v21, %v3728_v21 }
  0x23   : > { %v3647_v12 = vld [vmem:[%s4602_s10 + $0x6a] sm:$0xff]  ;;  %v3611_v50 = vld [vmem:[%s4602_s10 + $0x99] sm:$0xff] }
  0x24   : > { %372 = vst.msk [vmem:[#allocation2 + $0x44] sm:$0xf] %vm354_vm0, %v4769_v6  ;;  %v4117_v14 = vpack.c.bf16 %v3647_v12, %v3647_v12  ;;  %v3650_v59 = vld [vmem:[%s4602_s10 + $0x92] sm:$0xff]  ;;  %v3732_v9 = vld [vmem:[%s4602_s10 + $0xa9] sm:$0xff] }
  0x25   : > { %v4901_v63 = vpack.c.bf16 %v3650_v59, %v3650_v59 }
  0x26   : > { %780 = vrot.lane.b32.xlu1 %v4070_v10, %s4526_s16  ;;  %622 = vrot.lane.b32.xlu0 %v4053_v41, %s4525_s15  ;;  %v4097_v10 = vpack.c.bf16 %v3607_v8, %v3607_v8  ;;  %v3733_v8 = vld [vmem:[%s4602_s10 + $0xb1] sm:$0xff] }
  0x2a   : > { %784 = vrot.lane.b32.xlu1 %v4624_v13, %s4526_s16  ;;  %782 = vrot.lane.b32.xlu0 %v4071_v16, %s4526_s16  ;;  %v3697_v16 = vld [vmem:[%s4602_s10 + $0xe0] sm:$0xff] }
  0x2b   : > { %v4799_v18 = vpack.c.bf16 %v3697_v16, %v3697_v16 }
  0x2d   : > { %374 = vst.msk [vmem:[#allocation2 + $0x4c] sm:$0xf] %vm354_vm0, %v4799_v18 }
  0x2e   : > { %941 = vrot.lane.b32.xlu1 %v4612_v3, %s4527_s17  ;;  %786 = vrot.lane.b32.xlu0 %v4628_v17, %s4526_s16  ;;  %v4172_v3 = vpack.c.bf16 %v3764_v1, %v3764_v1 }
  0x32   : > { %945 = vrot.lane.b32.xlu1 %v4640_v22, %s4527_s17  ;;  %943 = vrot.lane.b32.xlu0 %v4619_v7, %s4527_s17  ;;  %v4771_v7 = vpack.c.bf16 %v3574_v5, %v3574_v5 }
  0x34   : > { %371 = vst.msk [vmem:[#allocation2 + $0x40] sm:$0xf] %vm354_vm0, %v4771_v7 }
  0x36   : > { %1102 = vrot.lane.b32.xlu1 %v4052_v30, %s4528_s19  ;;  %947 = vrot.lane.b32.xlu0 %v4093_v47, %s4527_s17 }
  0x3a   : > { %1106 = vrot.lane.b32.xlu1 %v4112_v49, %s4528_s19  ;;  %1104 = vrot.lane.b32.xlu0 %v4053_v41, %s4528_s19 }
  0x3e   : > { %1266 = vrot.lane.b32.xlu1 %v4624_v13, %s4529_s25  ;;  %1108 = vrot.lane.b32.xlu0 %v4113_v51, %s4528_s19  ;;  %v3646_v13 = vld [vmem:[%s4602_s10 + $0x62] sm:$0xff] }
  0x3f   : > { %v4116_v15 = vpack.c.bf16 %v3646_v13, %v3646_v13 }
  0x42   : > { %1270 = vrot.lane.b32.xlu1 %v4632_v19, %s4529_s25  ;;  %1268 = vrot.lane.b32.xlu0 %v4628_v17, %s4529_s25  ;;  %v3696_v17 = vld [vmem:[%s4602_s10 + $0xd8] sm:$0xff] }
  0x46   : > { %1427 = vrot.lane.b32.xlu1 %v4640_v22, %s4530_s28  ;;  %1272 = vrot.lane.b32.xlu0 %v4644_v25, %s4529_s25  ;;  %v4815_v22 = vpack.c.bf16 %v3729_v20, %v3729_v20  ;;  %v3772_v20 = vld [vmem:[%s4602_s10 + $0xaa] sm:$0xff] }
  0x4a   : > { %1431 = vrot.lane.b32.xlu1 %v4152_v58, %s4530_s28  ;;  %1429 = vrot.lane.b32.xlu0 %v4093_v47, %s4530_s28 }
  0x4e   : > { %1588 = vrot.lane.b32.xlu1 %v4112_v49, %s4531_s8  ;;  %1433 = vrot.lane.b32.xlu0 %v4153_v62, %s4530_s28 }
  0x52   : > { %465 = vrot.lane.b32.xlu1 %v4093_v47, %s4524_s14  ;;  %1590 = vrot.lane.b32.xlu0 %v4113_v51, %s4531_s8 }
  0x56   : > { %1594 = vrot.lane.b32.xlu1 %v4173_v2, %s4531_s8  ;;  %1592 = vrot.lane.b32.xlu0 %v4172_v3, %s4531_s8 }
  0x5a   : > { %469 = vrot.lane.b32.xlu1 %v4153_v62, %s4524_s14  ;;  %467 = vrot.lane.b32.xlu0 %v4152_v58, %s4524_s14 }
  0x5e   : > { %626 = vrot.lane.b32.xlu1 %v4113_v51, %s4525_s15  ;;  %624 = vrot.lane.b32.xlu0 %v4112_v49, %s4525_s15  ;;  %v3610_v51 = vld [vmem:[%s4602_s10 + $0x91] sm:$0xff] }
  0x5f   : > { %v4883_v53 = vpack.c.bf16 %v3610_v51, %v3610_v51 }
  0x62   : > { %630 = vrot.lane.b32.xlu1 %v4173_v2, %s4525_s15  ;;  %628 = vrot.lane.b32.xlu0 %v4172_v3, %s4525_s15 }
  0x66   : > { %790 = vrot.lane.b32.xlu1 %v4644_v25, %s4526_s16  ;;  %788 = vrot.lane.b32.xlu0 %v4632_v19, %s4526_s16  ;;  %v4801_v19 = vpack.c.bf16 %v3696_v17, %v3696_v17  ;;  %v3773_v17 = vld [vmem:[%s4602_s10 + $0xb2] sm:$0xff] }
  0x68   : > { %373 = vst.msk [vmem:[#allocation2 + $0x48] sm:$0xf] %vm354_vm0, %v4801_v19 }
  0x6a   : > { %794 = vrot.lane.b32.xlu1 %v4653_v28, %s4526_s16  ;;  %792 = vrot.lane.b32.xlu0 %v4655_v29, %s4526_s16 }
  0x6e   : > { %951 = vrot.lane.b32.xlu1 %v4153_v62, %s4527_s17  ;;  %949 = vrot.lane.b32.xlu0 %v4152_v58, %s4527_s17  ;;  %v3651_v58 = vld [vmem:[%s4602_s10 + $0x9a] sm:$0xff] }
  0x6f   : > { %v4899_v62 = vpack.c.bf16 %v3651_v58, %v3651_v58 }
  0x72   : > { %955 = vrot.lane.b32.xlu1 %v4097_v10, %s4527_s17  ;;  %953 = vrot.lane.b32.xlu0 %v4096_v11, %s4527_s17 }
  0x76   : > { %1112 = vrot.lane.b32.xlu1 %v4173_v2, %s4528_s19  ;;  %1110 = vrot.lane.b32.xlu0 %v4172_v3, %s4528_s19 }
  0x7a   : > { %1116 = vrot.lane.b32.xlu1 %v4117_v14, %s4528_s19  ;;  %1114 = vrot.lane.b32.xlu0 %v4116_v15, %s4528_s19 }
  0x7e   : > { %1276 = vrot.lane.b32.xlu1 %v4653_v28, %s4529_s25  ;;  %1274 = vrot.lane.b32.xlu0 %v4655_v29, %s4529_s25  ;;  %v3769_v28 = vld [vmem:[%s4602_s10 + $0x82] sm:$0xff]  ;;  %v3768_v29 = vld [vmem:[%s4602_s10 + $0x7a] sm:$0xff] }
  0x7f   : > { %v4835_v32 = vpack.c.bf16 %v3769_v28, %v3769_v28  ;;  %v4837_v33 = vpack.c.bf16 %v3768_v29, %v3768_v29 }
  0x82   : > { %1280 = vrot.lane.b32.xlu1 %v4665_v35, %s4529_s25  ;;  %1278 = vrot.lane.b32.xlu0 %v4667_v36, %s4529_s25 }
  0x86   : > { %1437 = vrot.lane.b32.xlu1 %v4097_v10, %s4530_s28  ;;  %1435 = vrot.lane.b32.xlu0 %v4096_v11, %s4530_s28 }
  0x88   : > { %v460_v24 = vpop.permute.xlu1 %459  ;;  %v456_v25 = vpop.permute.xlu0 %455 }
  0x89   : > { %518 = vst.msk [vmem:[#allocation2 + $0x8] sm:$0xf] %vm515_vm2, %v460_v24  ;;  %516 = vst.msk [vmem:[#allocation2] sm:$0xf] %vm515_vm2, %v456_v25  ;;  %v4181_v24 = vpack.c.bf16 %v3773_v17, %v3773_v17  ;;  %v4180_v25 = vpack.c.bf16 %v3772_v20, %v3772_v20 }
  0x8a   : > { %1441 = vrot.lane.b32.xlu1 %v4815_v22, %s4530_s28  ;;  %1439 = vrot.lane.b32.xlu0 %v4817_v23, %s4530_s28 }
  0x8c   : > { %v462_v26 = vpop.permute.xlu1 %461  ;;  %v458_v27 = vpop.permute.xlu0 %457 }
  0x8d   : > { %519 = vst.msk [vmem:[#allocation2 + $0xc] sm:$0xf] %vm515_vm2, %v462_v26  ;;  %517 = vst.msk [vmem:[#allocation2 + $0x4] sm:$0xf] %vm515_vm2, %v458_v27 }
  0x8e   : > { %1598 = vrot.lane.b32.xlu1 %v4117_v14, %s4531_s8  ;;  %1596 = vrot.lane.b32.xlu0 %v4116_v15, %s4531_s8 }
  0x90   : > { %v617_v30 = vpop.permute.xlu1 %616  ;;  %v464_v31 = vpop.permute.xlu0 %463 }
  0x91   : > { %677 = vst.msk [vmem:[#allocation2] sm:$0xf] %vm676_vm3, %v617_v30 }
  0x92   : > { %520 = vst.msk [vmem:[#allocation2 + $0x10] sm:$0xf] %vm515_vm2, %v464_v31  ;;  %473 = vrot.lane.b32.xlu1 %v4097_v10, %s4524_s14  ;;  %471 = vrot.lane.b32.xlu0 %v4096_v11, %s4524_s14  ;;  %v4931_v11 = vpack.c.bf16 %v3732_v9, %v3732_v9 }
  0x94   : > { %v621_v34 = vpop.permute.xlu1 %620  ;;  %v619_v37 = vpop.permute.xlu0 %618 }
  0x95   : > { %679 = vst.msk [vmem:[#allocation2 + $0x8] sm:$0xf] %vm676_vm3, %v621_v34  ;;  %678 = vst.msk [vmem:[#allocation2 + $0x4] sm:$0xf] %vm676_vm3, %v619_v37 }
  0x96   : > { %1602 = vrot.lane.b32.xlu1 %v4835_v32, %s4531_s8  ;;  %1600 = vrot.lane.b32.xlu0 %v4837_v33, %s4531_s8 }
  0x98   : > { %v781_v38 = vpop.permute.xlu1 %780  ;;  %v623_v39 = vpop.permute.xlu0 %622 }
  0x99   : > { %841 = vst.msk [vmem:[#allocation2] sm:$0xf] %vm840_vm4, %v781_v38 }
  0x9a   : > { %680 = vst.msk [vmem:[#allocation2 + $0xc] sm:$0xf] %vm676_vm3, %v623_v39  ;;  %477 = vrot.lane.b32.xlu1 %v4815_v22, %s4524_s14  ;;  %475 = vrot.lane.b32.xlu0 %v4817_v23, %s4524_s14 }
  0x9c   : > { %v785_v40 = vpop.permute.xlu1 %784  ;;  %v783_v41 = vpop.permute.xlu0 %782 }
  0x9d   : > { %843 = vst.msk [vmem:[#allocation2 + $0x8] sm:$0xf] %vm840_vm4, %v785_v40  ;;  %842 = vst.msk [vmem:[#allocation2 + $0x4] sm:$0xf] %vm840_vm4, %v783_v41  ;;  %v3615_v40 = vld [vmem:[%s4602_s10 + $0xc9] sm:$0xff]  ;;  %v3614_v41 = vld [vmem:[%s4602_s10 + $0xc1] sm:$0xff] }
  0x9e   : > { %634 = vrot.lane.b32.xlu1 %v4117_v14, %s4525_s15  ;;  %632 = vrot.lane.b32.xlu0 %v4116_v15, %s4525_s15 }
  0xa0   : > { %v942_v42 = vpop.permute.xlu1 %941  ;;  %v787_v43 = vpop.permute.xlu0 %786 }
  0xa1   : > { %1002 = vst.msk [vmem:[#allocation2] sm:$0xf] %vm1001_vm5, %v942_v42 }
  0xa2   : > { %844 = vst.msk [vmem:[#allocation2 + $0xc] sm:$0xf] %vm840_vm4, %v787_v43  ;;  %638 = vrot.lane.b32.xlu1 %v4835_v32, %s4525_s15  ;;  %636 = vrot.lane.b32.xlu0 %v4837_v33, %s4525_s15  ;;  %v4997_v43 = vpack.c.bf16 %v3614_v41, %v3614_v41 }
  0xa4   : > { %v946_v46 = vpop.permute.xlu1 %945  ;;  %v944_v47 = vpop.permute.xlu0 %943 }
  0xa5   : > { %1004 = vst.msk [vmem:[#allocation2 + $0x8] sm:$0xf] %vm1001_vm5, %v946_v46  ;;  %1003 = vst.msk [vmem:[#allocation2 + $0x4] sm:$0xf] %vm1001_vm5, %v944_v47 }
  0xa6   : > { %798 = vrot.lane.b32.xlu1 %v4665_v35, %s4526_s16  ;;  %796 = vrot.lane.b32.xlu0 %v4667_v36, %s4526_s16  ;;  %v4881_v36 = vpack.c.bf16 %v3611_v50, %v3611_v50 }
  0xa8   : > { %v1103_v48 = vpop.permute.xlu1 %1102  ;;  %v948_v49 = vpop.permute.xlu0 %947 }
  0xa9   : > { %1163 = vst.msk [vmem:[#allocation2] sm:$0xf] %vm1162_vm6, %v1103_v48  ;;  %v3655_v48 = vld [vmem:[%s4602_s10 + $0xca] sm:$0xff] }
  0xaa   : > { %1005 = vst.msk [vmem:[#allocation2 + $0xc] sm:$0xf] %vm1001_vm5, %v948_v49  ;;  %802 = vrot.lane.b32.xlu1 %v4687_v44, %s4526_s16  ;;  %800 = vrot.lane.b32.xlu0 %v4689_v45, %s4526_s16  ;;  %v3654_v49 = vld [vmem:[%s4602_s10 + $0xc2] sm:$0xff] }
  0xac   : > { %v1107_v35 = vpop.permute.xlu1 %1106  ;;  %v1105_v52 = vpop.permute.xlu0 %1104 }
  0xad   : > { %1165 = vst.msk [vmem:[#allocation2 + $0x8] sm:$0xf] %vm1162_vm6, %v1107_v35  ;;  %1164 = vst.msk [vmem:[#allocation2 + $0x4] sm:$0xf] %vm1162_vm6, %v1105_v52  ;;  %v5011_v35 = vpack.c.bf16 %v3655_v48, %v3655_v48  ;;  %v5013_v52 = vpack.c.bf16 %v3654_v49, %v3654_v49 }
  0xae   : > { %959 = vrot.lane.b32.xlu1 %v4815_v22, %s4527_s17  ;;  %957 = vrot.lane.b32.xlu0 %v4817_v23, %s4527_s17 }
  0xb0   : > { %v1267_v56 = vpop.permute.xlu1 %1266  ;;  %v1109_v57 = vpop.permute.xlu0 %1108 }
  0xb1   : > { %1327 = vst.msk [vmem:[#allocation2] sm:$0xf] %vm1326_vm7, %v1267_v56 }
  0xb2   : > { %1166 = vst.msk [vmem:[#allocation2 + $0xc] sm:$0xf] %vm1162_vm6, %v1109_v57  ;;  %963 = vrot.lane.b32.xlu1 %v4881_v36, %s4527_s17  ;;  %961 = vrot.lane.b32.xlu0 %v4883_v53, %s4527_s17 }
  0xb4   : > { %v1271_v60 = vpop.permute.xlu1 %1270  ;;  %v1269_v61 = vpop.permute.xlu0 %1268 }
  0xb5   : > { %1329 = vst.msk [vmem:[#allocation2 + $0x8] sm:$0xf] %vm1326_vm7, %v1271_v60  ;;  %1328 = vst.msk [vmem:[#allocation2 + $0x4] sm:$0xf] %vm1326_vm7, %v1269_v61  ;;  %v3737_v60 = vld [vmem:[%s4602_s10 + $0xe1] sm:$0xff]  ;;  %v3736_v61 = vld [vmem:[%s4602_s10 + $0xd9] sm:$0xff] }
  0xb6   : > { %1120 = vrot.lane.b32.xlu1 %v4835_v32, %s4528_s19  ;;  %1118 = vrot.lane.b32.xlu0 %v4837_v33, %s4528_s19 }
  0xb8   : > { %v1428_v0 = vpop.permute.xlu1 %1427  ;;  %v1273_v1 = vpop.permute.xlu0 %1272 }
  0xb9   : > { %1488 = vst.msk [vmem:[#allocation2] sm:$0xf] %vm1487_vm8, %v1428_v0 }
  0xba   : > { %1330 = vst.msk [vmem:[#allocation2 + $0xc] sm:$0xf] %vm1326_vm7, %v1273_v1  ;;  %1124 = vrot.lane.b32.xlu1 %v4899_v62, %s4528_s19  ;;  %1122 = vrot.lane.b32.xlu0 %v4901_v63, %s4528_s19 }
  0xbc   : > { %v1432_v2 = vpop.permute.xlu1 %1431  ;;  %v1430_v3 = vpop.permute.xlu0 %1429 }
  0xbd   : > { %1490 = vst.msk [vmem:[#allocation2 + $0x8] sm:$0xf] %vm1487_vm8, %v1432_v2  ;;  %1489 = vst.msk [vmem:[#allocation2 + $0x4] sm:$0xf] %vm1487_vm8, %v1430_v3 }
  0xbe   : > { %1284 = vrot.lane.b32.xlu1 %v4687_v44, %s4529_s25  ;;  %1282 = vrot.lane.b32.xlu0 %v4689_v45, %s4529_s25  ;;  %v4929_v45 = vpack.c.bf16 %v3733_v8, %v3733_v8  ;;  %v3776_v8 = vld [vmem:[%s4602_s10 + $0xda] sm:$0xff] }
  0xc0   : > { %v1589_v4 = vpop.permute.xlu1 %1588  ;;  %v1434_v5 = vpop.permute.xlu0 %1433 }
  0xc1   : > { %1649 = vst.msk [vmem:[#allocation2] sm:$0xf] %vm1648_vm9, %v1589_v4 }
  0xc2   : > { %1491 = vst.msk [vmem:[#allocation2 + $0xc] sm:$0xf] %vm1487_vm8, %v1434_v5  ;;  %1288 = vrot.lane.b32.xlu1 %v4718_v54, %s4529_s25  ;;  %1286 = vrot.lane.b32.xlu0 %v4720_v55, %s4529_s25  ;;  %v3777_v5 = vld [vmem:[%s4602_s10 + $0xe2] sm:$0xff] }
  0xc4   : > { %v466_v10 = vpop.permute.xlu1 %465  ;;  %v1591_v44 = vpop.permute.xlu0 %1590 }
  0xc5   : > { %521 = vst.msk [vmem:[#allocation2 + $0x14] sm:$0xf] %vm515_vm2, %v466_v10 }
  0xc6   : > { %1650 = vst.msk [vmem:[#allocation2 + $0x4] sm:$0xf] %vm1648_vm9, %v1591_v44  ;;  %1445 = vrot.lane.b32.xlu1 %v4881_v36, %s4530_s28  ;;  %1443 = vrot.lane.b32.xlu0 %v4883_v53, %s4530_s28 }
  0xc8   : > { %v1595_v12 = vpop.permute.xlu1 %1594  ;;  %v1593_v13 = vpop.permute.xlu0 %1592 }
  0xc9   : > { %1652 = vst.msk [vmem:[#allocation2 + $0xc] sm:$0xf] %vm1648_vm9, %v1595_v12  ;;  %1651 = vst.msk [vmem:[#allocation2 + $0x8] sm:$0xf] %vm1648_vm9, %v1593_v13 }
  0xca   : > { %1449 = vrot.lane.b32.xlu1 %v4929_v45, %s4530_s28  ;;  %1447 = vrot.lane.b32.xlu0 %v4931_v11, %s4530_s28 }
  0xcc   : > { %v470_v14 = vpop.permute.xlu1 %469  ;;  %v468_v15 = vpop.permute.xlu0 %467 }
  0xcd   : > { %v4463_v16 = vld [vmem:[#allocation2] sm:$0xff]   ;;  %523 = vst.msk [vmem:[#allocation2 + $0x1c] sm:$0xf] %vm515_vm2, %v470_v14  ;;  %522 = vst.msk [vmem:[#allocation2 + $0x18] sm:$0xf] %vm515_vm2, %v468_v15 }
  0xce   : > { %1606 = vrot.lane.b32.xlu1 %v4899_v62, %s4531_s8  ;;  %1604 = vrot.lane.b32.xlu0 %v4901_v63, %s4531_s8 }
  0xcf   : > { %4364 = vmatprep.mubr.msk.bf16.mxu0 %vm1766_vm10, %v4463_v16 }
  0xd0   : > { %v627_v21 = vpop.permute.xlu1 %626  ;;  %v625_v22 = vpop.permute.xlu0 %624  ;;  %v4464_v23 = vld [vmem:[#allocation2 + $0x8] sm:$0xff]  }
  0xd1   : > { %682 = vst.msk [vmem:[#allocation2 + $0x14] sm:$0xf] %vm676_vm3, %v627_v21  ;;  %681 = vst.msk [vmem:[#allocation2 + $0x10] sm:$0xf] %vm676_vm3, %v625_v22  ;;  %4365 = vmatmul.mubr.msk.bf16.vlgmr.msra.gmra.mxu0 %vm1766_vm10, %v4464_v23  ;;  %v3579_v22 = vld [vmem:[%s4602_s10 + $0xf8] sm:$0xff]  ;;  %v3578_v23 = vld [vmem:[%s4602_s10 + $0xf0] sm:$0xff] }
  0xd2   : > { %481 = vrot.lane.b32.xlu1 %v4881_v36, %s4524_s14  ;;  %479 = vrot.lane.b32.xlu0 %v4883_v53, %s4524_s14 }
  0xd4   : > { %v631_v26 = vpop.permute.xlu1 %630  ;;  %v629_v27 = vpop.permute.xlu0 %628 }
  0xd5   : > { %684 = vst.msk [vmem:[#allocation2 + $0x1c] sm:$0xf] %vm676_vm3, %v631_v26  ;;  %683 = vst.msk [vmem:[#allocation2 + $0x18] sm:$0xf] %vm676_vm3, %v629_v27  ;;  %v4089_v26 = vpack.c.bf16 %v3579_v22, %v3579_v22  ;;  %v4088_v27 = vpack.c.bf16 %v3578_v23, %v3578_v23 }
  0xd6   : > { %1610 = vrot.lane.b32.xlu1 %v4181_v24, %s4531_s8  ;;  %1608 = vrot.lane.b32.xlu0 %v4180_v25, %s4531_s8 }
  0xd8   : > { %v791_v28 = vpop.permute.xlu1 %790  ;;  %v789_v29 = vpop.permute.xlu0 %788 }
  0xd9   : > { %846 = vst.msk [vmem:[#allocation2 + $0x14] sm:$0xf] %vm840_vm4, %v791_v28  ;;  %845 = vst.msk [vmem:[#allocation2 + $0x10] sm:$0xf] %vm840_vm4, %v789_v29 }
  0xda   : > { %485 = vrot.lane.b32.xlu1 %v4929_v45, %s4524_s14  ;;  %483 = vrot.lane.b32.xlu0 %v4931_v11, %s4524_s14 }
  0xdc   : > { %v795_v30 = vpop.permute.xlu1 %794  ;;  %v793_v31 = vpop.permute.xlu0 %792 }
  0xdd   : > { %848 = vst.msk [vmem:[#allocation2 + $0x1c] sm:$0xf] %vm840_vm4, %v795_v30  ;;  %847 = vst.msk [vmem:[#allocation2 + $0x18] sm:$0xf] %vm840_vm4, %v793_v31  ;;  %v3619_v30 = vld [vmem:[%s4602_s10 + $0xf9] sm:$0xff]  ;;  %v3618_v31 = vld [vmem:[%s4602_s10 + $0xf1] sm:$0xff] }
  0xde   : > { %642 = vrot.lane.b32.xlu1 %v4899_v62, %s4525_s15  ;;  %640 = vrot.lane.b32.xlu0 %v4901_v63, %s4525_s15 }
  0xe0   : > { %v952_v32 = vpop.permute.xlu1 %951  ;;  %v950_v33 = vpop.permute.xlu0 %949 }
  0xe1   : > { %1007 = vst.msk [vmem:[#allocation2 + $0x14] sm:$0xf] %vm1001_vm5, %v952_v32  ;;  %1006 = vst.msk [vmem:[#allocation2 + $0x10] sm:$0xf] %vm1001_vm5, %v950_v33  ;;  %v4108_v33 = vpack.c.bf16 %v3618_v31, %v3618_v31 }
  0xe2   : > { %646 = vrot.lane.b32.xlu1 %v4181_v24, %s4525_s15  ;;  %644 = vrot.lane.b32.xlu0 %v4180_v25, %s4525_s15 }
  0xe4   : > { %v956_v34 = vpop.permute.xlu1 %955  ;;  %v954_v37 = vpop.permute.xlu0 %953 }
  0xe5   : > { %1009 = vst.msk [vmem:[#allocation2 + $0x1c] sm:$0xf] %vm1001_vm5, %v956_v34  ;;  %1008 = vst.msk [vmem:[#allocation2 + $0x18] sm:$0xf] %vm1001_vm5, %v954_v37 }
  0xe6   : > { %806 = vrot.lane.b32.xlu1 %v4718_v54, %s4526_s16  ;;  %804 = vrot.lane.b32.xlu0 %v4720_v55, %s4526_s16  ;;  %v4995_v55 = vpack.c.bf16 %v3615_v40, %v3615_v40 }
  0xe8   : > { %v1113_v38 = vpop.permute.xlu1 %1112  ;;  %v1111_v39 = vpop.permute.xlu0 %1110 }
  0xe9   : > { %1168 = vst.msk [vmem:[#allocation2 + $0x14] sm:$0xf] %vm1162_vm6, %v1113_v38  ;;  %1167 = vst.msk [vmem:[#allocation2 + $0x10] sm:$0xf] %vm1162_vm6, %v1111_v39  ;;  %v3659_v38 = vld [vmem:[%s4602_s10 + $0xfa] sm:$0xff]  ;;  %v3658_v39 = vld [vmem:[%s4602_s10 + $0xf2] sm:$0xff] }
  0xea   : > { %810 = vrot.lane.b32.xlu1 %v4769_v6, %s4526_s16  ;;  %808 = vrot.lane.b32.xlu0 %v4771_v7, %s4526_s16 }
  0xec   : > { %v1117_v54 = vpop.permute.xlu1 %1116  ;;  %v1115_v42 = vpop.permute.xlu0 %1114 }
  0xed   : > { %1170 = vst.msk [vmem:[#allocation2 + $0x1c] sm:$0xf] %vm1162_vm6, %v1117_v54  ;;  %1169 = vst.msk [vmem:[#allocation2 + $0x18] sm:$0xf] %vm1162_vm6, %v1115_v42  ;;  %v4129_v54 = vpack.c.bf16 %v3659_v38, %v3659_v38  ;;  %v4128_v42 = vpack.c.bf16 %v3658_v39, %v3658_v39 }
  0xee   : > { %967 = vrot.lane.b32.xlu1 %v4929_v45, %s4527_s17  ;;  %965 = vrot.lane.b32.xlu0 %v4931_v11, %s4527_s17  ;;  %v5066_v45 = vpack.c.bf16 %v3777_v5, %v3777_v5  ;;  %v5068_v11 = vpack.c.bf16 %v3776_v8, %v3776_v8 }
  0xf0   : > { %v1277_v46 = vpop.permute.xlu1 %1276  ;;  %v1275_v47 = vpop.permute.xlu0 %1274 }
  0xf1   : > { %1332 = vst.msk [vmem:[#allocation2 + $0x14] sm:$0xf] %vm1326_vm7, %v1277_v46  ;;  %1331 = vst.msk [vmem:[#allocation2 + $0x10] sm:$0xf] %vm1326_vm7, %v1275_v47  ;;  %v3701_v46 = vld [vmem:[%s4602_s10 + $0x110] sm:$0xff]  ;;  %v3700_v47 = vld [vmem:[%s4602_s10 + $0x108] sm:$0xff] }
  0xf2   : > { %971 = vrot.lane.b32.xlu1 %v4995_v55, %s4527_s17  ;;  %969 = vrot.lane.b32.xlu0 %v4997_v43, %s4527_s17 }
  0xf4   : > { %v1281_v50 = vpop.permute.xlu1 %1280  ;;  %v1279_v51 = vpop.permute.xlu0 %1278 }
  0xf5   : > { %1334 = vst.msk [vmem:[#allocation2 + $0x1c] sm:$0xf] %vm1326_vm7, %v1281_v50  ;;  %1333 = vst.msk [vmem:[#allocation2 + $0x18] sm:$0xf] %vm1326_vm7, %v1279_v51  ;;  %v4149_v50 = vpack.c.bf16 %v3701_v46, %v3701_v46  ;;  %v4148_v51 = vpack.c.bf16 %v3700_v47, %v3700_v47 }
  0xf6   : > { %1128 = vrot.lane.b32.xlu1 %v4181_v24, %s4528_s19  ;;  %1126 = vrot.lane.b32.xlu0 %v4180_v25, %s4528_s19 }
  0xf8   : > { %v1438_v36 = vpop.permute.xlu1 %1437  ;;  %v1436_v53 = vpop.permute.xlu0 %1435 }
  0xf9   : > { %1493 = vst.msk [vmem:[#allocation2 + $0x14] sm:$0xf] %vm1487_vm8, %v1438_v36  ;;  %1492 = vst.msk [vmem:[#allocation2 + $0x10] sm:$0xf] %vm1487_vm8, %v1436_v53  ;;  %v3741_v36 = vld [vmem:[%s4602_s10 + $0x111] sm:$0xff]  ;;  %v3740_v53 = vld [vmem:[%s4602_s10 + $0x109] sm:$0xff] }
  0xfa   : > { %1132 = vrot.lane.b32.xlu1 %v5011_v35, %s4528_s19  ;;  %1130 = vrot.lane.b32.xlu0 %v5013_v52, %s4528_s19 }
  0xfc   : > { %v1442_v56 = vpop.permute.xlu1 %1441  ;;  %v1440_v57 = vpop.permute.xlu0 %1439 }
  0xfd   : > { %1495 = vst.msk [vmem:[#allocation2 + $0x1c] sm:$0xf] %vm1487_vm8, %v1442_v56  ;;  %1494 = vst.msk [vmem:[#allocation2 + $0x18] sm:$0xf] %vm1487_vm8, %v1440_v57 }
  0xfe   : > { %1292 = vrot.lane.b32.xlu1 %v4769_v6, %s4529_s25  ;;  %1290 = vrot.lane.b32.xlu0 %v4771_v7, %s4529_s25  ;;  %v5041_v6 = vpack.c.bf16 %v3737_v60, %v3737_v60  ;;  %v5043_v7 = vpack.c.bf16 %v3736_v61, %v3736_v61 }
 0x100   : > { %v1599_v58 = vpop.permute.xlu1 %1598  ;;  %v1597_v59 = vpop.permute.xlu0 %1596 }
 0x101   : > { %1654 = vst.msk [vmem:[#allocation2 + $0x14] sm:$0xf] %vm1648_vm9, %v1599_v58  ;;  %1653 = vst.msk [vmem:[#allocation2 + $0x10] sm:$0xf] %vm1648_vm9, %v1597_v59  ;;  %v4169_v58 = vpack.c.bf16 %v3741_v36, %v3741_v36  ;;  %v4168_v59 = vpack.c.bf16 %v3740_v53, %v3740_v53 }
 0x102   : > { %1296 = vrot.lane.b32.xlu1 %v4799_v18, %s4529_s25  ;;  %1294 = vrot.lane.b32.xlu0 %v4801_v19, %s4529_s25 }
 0x104   : > { %v474_v62 = vpop.permute.xlu1 %473  ;;  %v472_v63 = vpop.permute.xlu0 %471 }
 0x105   : > { %525 = vst.msk [vmem:[#allocation2 + $0x24] sm:$0xf] %vm515_vm2, %v474_v62  ;;  %524 = vst.msk [vmem:[#allocation2 + $0x20] sm:$0xf] %vm515_vm2, %v472_v63  ;;  %v3781_v63 = vld [vmem:[%s4602_s10 + $0x112] sm:$0xff] }
 0x106   : > { %1453 = vrot.lane.b32.xlu1 %v4995_v55, %s4530_s28  ;;  %1451 = vrot.lane.b32.xlu0 %v4997_v43, %s4530_s28 }
 0x108   : > { %v1603_v0 = vpop.permute.xlu1 %1602  ;;  %v1601_v1 = vpop.permute.xlu0 %1600  ;;  %v4465_v2 = vld [vmem:[#allocation2 + $0x10] sm:$0xff]  }
 0x109   : > { %1656 = vst.msk [vmem:[#allocation2 + $0x1c] sm:$0xf] %vm1648_vm9, %v1603_v0  ;;  %1655 = vst.msk [vmem:[#allocation2 + $0x18] sm:$0xf] %vm1648_vm9, %v1601_v1  ;;  %4368 = vmatprep.mubr.msk.bf16.mxu0 %vm1766_vm10, %v4465_v2  ;;  %v4189_v1 = vpack.c.bf16 %v3781_v63, %v3781_v63 }
 0x10a   : > { %1457 = vrot.lane.b32.xlu1 %v5041_v6, %s4530_s28  ;;  %1455 = vrot.lane.b32.xlu0 %v5043_v7, %s4530_s28 }
 0x10c   : > { %v478_v3 = vpop.permute.xlu1 %477  ;;  %v476_v4 = vpop.permute.xlu0 %475 }
 0x10d   : > { %527 = vst.msk [vmem:[#allocation2 + $0x2c] sm:$0xf] %vm515_vm2, %v478_v3  ;;  %526 = vst.msk [vmem:[#allocation2 + $0x28] sm:$0xf] %vm515_vm2, %v476_v4 }
 0x10e   : > { %1614 = vrot.lane.b32.xlu1 %v5011_v35, %s4531_s8  ;;  %1612 = vrot.lane.b32.xlu0 %v5013_v52, %s4531_s8 }
 0x110   : > { %v635_v9 = vpop.permute.xlu1 %634  ;;  %v633_v10 = vpop.permute.xlu0 %632  ;;  %v4466_v44 = vld [vmem:[#allocation2 + $0x18] sm:$0xff]  }
 0x111   : > { %686 = vst.msk [vmem:[#allocation2 + $0x24] sm:$0xf] %vm676_vm3, %v635_v9  ;;  %685 = vst.msk [vmem:[#allocation2 + $0x20] sm:$0xf] %vm676_vm3, %v633_v10  ;;  %4369 = vmatmul.mubr.msk.bf16.gmra.mxu0 %vm1766_vm10, %v4466_v44 }
 0x112   : > { %489 = vrot.lane.b32.xlu1 %v4995_v55, %s4524_s14  ;;  %487 = vrot.lane.b32.xlu0 %v4997_v43, %s4524_s14 }
 0x114   : > { %v639_v12 = vpop.permute.xlu1 %638  ;;  %v637_v13 = vpop.permute.xlu0 %636 }
 0x115   : > { %688 = vst.msk [vmem:[#allocation2 + $0x2c] sm:$0xf] %vm676_vm3, %v639_v12  ;;  %687 = vst.msk [vmem:[#allocation2 + $0x28] sm:$0xf] %vm676_vm3, %v637_v13 }
 0x116   : > { %1618 = vrot.lane.b32.xlu1 %v5066_v45, %s4531_s8  ;;  %1616 = vrot.lane.b32.xlu0 %v5068_v11, %s4531_s8 }
 0x118   : > { %v799_v14 = vpop.permute.xlu1 %798  ;;  %v797_v15 = vpop.permute.xlu0 %796 }
 0x119   : > { %850 = vst.msk [vmem:[#allocation2 + $0x24] sm:$0xf] %vm840_vm4, %v799_v14  ;;  %849 = vst.msk [vmem:[#allocation2 + $0x20] sm:$0xf] %vm840_vm4, %v797_v15 }
 0x11a   : > { %493 = vrot.lane.b32.xlu1 %v5041_v6, %s4524_s14  ;;  %491 = vrot.lane.b32.xlu0 %v5043_v7, %s4524_s14 }
 0x11c   : > { %v803_v16 = vpop.permute.xlu1 %802  ;;  %v801_v17 = vpop.permute.xlu0 %800 }
 0x11d   : > { %852 = vst.msk [vmem:[#allocation2 + $0x2c] sm:$0xf] %vm840_vm4, %v803_v16  ;;  %851 = vst.msk [vmem:[#allocation2 + $0x28] sm:$0xf] %vm840_vm4, %v801_v17 }
 0x11e   : > { %650 = vrot.lane.b32.xlu1 %v5011_v35, %s4525_s15  ;;  %648 = vrot.lane.b32.xlu0 %v5013_v52, %s4525_s15 }
 0x120   : > { %v960_v20 = vpop.permute.xlu1 %959  ;;  %v958_v21 = vpop.permute.xlu0 %957 }
 0x121   : > { %1011 = vst.msk [vmem:[#allocation2 + $0x24] sm:$0xf] %vm1001_vm5, %v960_v20  ;;  %1010 = vst.msk [vmem:[#allocation2 + $0x20] sm:$0xf] %vm1001_vm5, %v958_v21 }
 0x122   : > { %654 = vrot.lane.b32.xlu1 %v5066_v45, %s4525_s15  ;;  %652 = vrot.lane.b32.xlu0 %v5068_v11, %s4525_s15 }
 0x124   : > { %v964_v24 = vpop.permute.xlu1 %963  ;;  %v962_v25 = vpop.permute.xlu0 %961 }
 0x125   : > { %1013 = vst.msk [vmem:[#allocation2 + $0x2c] sm:$0xf] %vm1001_vm5, %v964_v24  ;;  %1012 = vst.msk [vmem:[#allocation2 + $0x28] sm:$0xf] %vm1001_vm5, %v962_v25 }
 0x126   : > { %814 = vrot.lane.b32.xlu1 %v4799_v18, %s4526_s16  ;;  %812 = vrot.lane.b32.xlu0 %v4801_v19, %s4526_s16  ;;  %v4109_v19 = vpack.c.bf16 %v3619_v30, %v3619_v30 }
 0x128   : > { %v1121_v28 = vpop.permute.xlu1 %1120  ;;  %v1119_v29 = vpop.permute.xlu0 %1118 }
 0x129   : > { %1172 = vst.msk [vmem:[#allocation2 + $0x24] sm:$0xf] %vm1162_vm6, %v1121_v28  ;;  %1171 = vst.msk [vmem:[#allocation2 + $0x20] sm:$0xf] %vm1162_vm6, %v1119_v29 }
 0x12a   : > { %818 = vrot.lane.b32.xlu1 %v4089_v26, %s4526_s16  ;;  %816 = vrot.lane.b32.xlu0 %v4088_v27, %s4526_s16 }
 0x12c   : > { %v1125_v18 = vpop.permute.xlu1 %1124  ;;  %v1123_v32 = vpop.permute.xlu0 %1122 }
 0x12d   : > { %1174 = vst.msk [vmem:[#allocation2 + $0x2c] sm:$0xf] %vm1162_vm6, %v1125_v18  ;;  %1173 = vst.msk [vmem:[#allocation2 + $0x28] sm:$0xf] %vm1162_vm6, %v1123_v32 }
 0x12e   : > { %975 = vrot.lane.b32.xlu1 %v5041_v6, %s4527_s17  ;;  %973 = vrot.lane.b32.xlu0 %v5043_v7, %s4527_s17  ;;  %v3780_v6 = vld [vmem:[%s4602_s10 + $0x10a] sm:$0xff] }
 0x12f   : > { %v4188_v2 = vpack.c.bf16 %v3780_v6, %v3780_v6 }
 0x130   : > { %v1285_v34 = vpop.permute.xlu1 %1284  ;;  %v1283_v37 = vpop.permute.xlu0 %1282 }
 0x131   : > { %1336 = vst.msk [vmem:[#allocation2 + $0x24] sm:$0xf] %vm1326_vm7, %v1285_v34  ;;  %1335 = vst.msk [vmem:[#allocation2 + $0x20] sm:$0xf] %vm1326_vm7, %v1283_v37 }
 0x132   : > { %979 = vrot.lane.b32.xlu1 %v4109_v19, %s4527_s17  ;;  %977 = vrot.lane.b32.xlu0 %v4108_v33, %s4527_s17 }
 0x134   : > { %v1289_v40 = vpop.permute.xlu1 %1288  ;;  %v1287_v41 = vpop.permute.xlu0 %1286 }
 0x135   : > { %1338 = vst.msk [vmem:[#allocation2 + $0x2c] sm:$0xf] %vm1326_vm7, %v1289_v40  ;;  %1337 = vst.msk [vmem:[#allocation2 + $0x28] sm:$0xf] %vm1326_vm7, %v1287_v41 }
 0x136   : > { %1136 = vrot.lane.b32.xlu1 %v5066_v45, %s4528_s19  ;;  %1134 = vrot.lane.b32.xlu0 %v5068_v11, %s4528_s19 }
 0x138   : > { %v1446_v55 = vpop.permute.xlu1 %1445  ;;  %v1444_v43 = vpop.permute.xlu0 %1443 }
 0x139   : > { %1497 = vst.msk [vmem:[#allocation2 + $0x24] sm:$0xf] %vm1487_vm8, %v1446_v55  ;;  %1496 = vst.msk [vmem:[#allocation2 + $0x20] sm:$0xf] %vm1487_vm8, %v1444_v43 }
 0x13a   : > { %1140 = vrot.lane.b32.xlu1 %v4129_v54, %s4528_s19  ;;  %1138 = vrot.lane.b32.xlu0 %v4128_v42, %s4528_s19 }
 0x13c   : > { %v1450_v48 = vpop.permute.xlu1 %1449  ;;  %v1448_v49 = vpop.permute.xlu0 %1447 }
 0x13d   : > { %1499 = vst.msk [vmem:[#allocation2 + $0x2c] sm:$0xf] %vm1487_vm8, %v1450_v48  ;;  %1498 = vst.msk [vmem:[#allocation2 + $0x28] sm:$0xf] %vm1487_vm8, %v1448_v49 }
 0x13e   : > { %1300 = vrot.lane.b32.xlu1 %v4089_v26, %s4529_s25  ;;  %1298 = vrot.lane.b32.xlu0 %v4088_v27, %s4529_s25 }
 0x140   : > { %v1607_v35 = vpop.permute.xlu1 %1606  ;;  %v1605_v52 = vpop.permute.xlu0 %1604 }
 0x141   : > { %1658 = vst.msk [vmem:[#allocation2 + $0x24] sm:$0xf] %vm1648_vm9, %v1607_v35  ;;  %1657 = vst.msk [vmem:[#allocation2 + $0x20] sm:$0xf] %vm1648_vm9, %v1605_v52 }
 0x142   : > { %1304 = vrot.lane.b32.xlu1 %v4149_v50, %s4529_s25  ;;  %1302 = vrot.lane.b32.xlu0 %v4148_v51, %s4529_s25 }
 0x144   : > { %v482_v56 = vpop.permute.xlu1 %481  ;;  %v480_v57 = vpop.permute.xlu0 %479 }
 0x145   : > { %529 = vst.msk [vmem:[#allocation2 + $0x34] sm:$0xf] %vm515_vm2, %v482_v56  ;;  %528 = vst.msk [vmem:[#allocation2 + $0x30] sm:$0xf] %vm515_vm2, %v480_v57 }
 0x146   : > { %1461 = vrot.lane.b32.xlu1 %v4109_v19, %s4530_s28  ;;  %1459 = vrot.lane.b32.xlu0 %v4108_v33, %s4530_s28 }
 0x148   : > { %v1611_v60 = vpop.permute.xlu1 %1610  ;;  %v1609_v61 = vpop.permute.xlu0 %1608  ;;  %v4467_v62 = vld [vmem:[#allocation2 + $0x20] sm:$0xff]  }
 0x149   : > { %1660 = vst.msk [vmem:[#allocation2 + $0x2c] sm:$0xf] %vm1648_vm9, %v1611_v60  ;;  %1659 = vst.msk [vmem:[#allocation2 + $0x28] sm:$0xf] %vm1648_vm9, %v1609_v61  ;;  %4372 = vmatprep.mubr.msk.bf16.mxu0 %vm1766_vm10, %v4467_v62 }
 0x14a   : > { %1465 = vrot.lane.b32.xlu1 %v4169_v58, %s4530_s28  ;;  %1463 = vrot.lane.b32.xlu0 %v4168_v59, %s4530_s28 }
 0x14c   : > { %v486_v7 = vpop.permute.xlu1 %485  ;;  %v484_v0 = vpop.permute.xlu0 %483 }
 0x14d   : > { %531 = vst.msk [vmem:[#allocation2 + $0x3c] sm:$0xf] %vm515_vm2, %v486_v7  ;;  %530 = vst.msk [vmem:[#allocation2 + $0x38] sm:$0xf] %vm515_vm2, %v484_v0 }
 0x14e   : > { %1622 = vrot.lane.b32.xlu1 %v4129_v54, %s4531_s8  ;;  %1620 = vrot.lane.b32.xlu0 %v4128_v42, %s4531_s8  ;;  %v5199_v54 = vld [vmem:[%s5788_s3] ss:$0 sm:$0xff] }
 0x150   : > { %v643_v3 = vpop.permute.xlu1 %642  ;;  %v641_v4 = vpop.permute.xlu0 %640  ;;  %v4468_v5 = vld [vmem:[#allocation2 + $0x28] sm:$0xff]  }
 0x151   : > { %690 = vst.msk [vmem:[#allocation2 + $0x34] sm:$0xf] %vm676_vm3, %v643_v3  ;;  %689 = vst.msk [vmem:[#allocation2 + $0x30] sm:$0xf] %vm676_vm3, %v641_v4  ;;  %4373 = vmatmul.mubr.msk.bf16.gmra.mxu0 %vm1766_vm10, %v4468_v5 }
 0x152   : > { %1626 = vrot.lane.b32.xlu1 %v4189_v1, %s4531_s8  ;;  %1624 = vrot.lane.b32.xlu0 %v4188_v2, %s4531_s8 }
 0x154   : > { %v647_v8 = vpop.permute.xlu1 %646  ;;  %v645_v9 = vpop.permute.xlu0 %644 }
 0x155   : > { %692 = vst.msk [vmem:[#allocation2 + $0x3c] sm:$0xf] %vm676_vm3, %v647_v8  ;;  %691 = vst.msk [vmem:[#allocation2 + $0x38] sm:$0xf] %vm676_vm3, %v645_v9 }
 0x158   : > { %v807_v10 = vpop.permute.xlu1 %806  ;;  %v805_v44 = vpop.permute.xlu0 %804 }
 0x159   : > { %854 = vst.msk [vmem:[#allocation2 + $0x34] sm:$0xf] %vm840_vm4, %v807_v10  ;;  %853 = vst.msk [vmem:[#allocation2 + $0x30] sm:$0xf] %vm840_vm4, %v805_v44 }
 0x15c   : > { %v811_v45 = vpop.permute.xlu1 %810  ;;  %v809_v11 = vpop.permute.xlu0 %808 }
 0x15d   : > { %856 = vst.msk [vmem:[#allocation2 + $0x3c] sm:$0xf] %vm840_vm4, %v811_v45  ;;  %855 = vst.msk [vmem:[#allocation2 + $0x38] sm:$0xf] %vm840_vm4, %v809_v11 }
 0x160   : > { %v968_v12 = vpop.permute.xlu1 %967  ;;  %v966_v13 = vpop.permute.xlu0 %965 }
 0x161   : > { %1015 = vst.msk [vmem:[#allocation2 + $0x34] sm:$0xf] %vm1001_vm5, %v968_v12  ;;  %1014 = vst.msk [vmem:[#allocation2 + $0x30] sm:$0xf] %vm1001_vm5, %v966_v13 }
 0x164   : > { %v972_v14 = vpop.permute.xlu1 %971  ;;  %v970_v15 = vpop.permute.xlu0 %969 }
 0x165   : > { %1017 = vst.msk [vmem:[#allocation2 + $0x3c] sm:$0xf] %vm1001_vm5, %v972_v14  ;;  %1016 = vst.msk [vmem:[#allocation2 + $0x38] sm:$0xf] %vm1001_vm5, %v970_v15 }
 0x168   : > { %v1129_v16 = vpop.permute.xlu1 %1128  ;;  %v1127_v17 = vpop.permute.xlu0 %1126 }
 0x169   : > { %1176 = vst.msk [vmem:[#allocation2 + $0x34] sm:$0xf] %vm1162_vm6, %v1129_v16  ;;  %1175 = vst.msk [vmem:[#allocation2 + $0x30] sm:$0xf] %vm1162_vm6, %v1127_v17 }
 0x16c   : > { %v1133_v20 = vpop.permute.xlu1 %1132  ;;  %v1131_v21 = vpop.permute.xlu0 %1130 }
 0x16d   : > { %1178 = vst.msk [vmem:[#allocation2 + $0x3c] sm:$0xf] %vm1162_vm6, %v1133_v20  ;;  %1177 = vst.msk [vmem:[#allocation2 + $0x38] sm:$0xf] %vm1162_vm6, %v1131_v21 }
 0x170   : > { %v1293_v22 = vpop.permute.xlu1 %1292  ;;  %v1291_v23 = vpop.permute.xlu0 %1290 }
 0x171   : > { %1340 = vst.msk [vmem:[#allocation2 + $0x34] sm:$0xf] %vm1326_vm7, %v1293_v22  ;;  %1339 = vst.msk [vmem:[#allocation2 + $0x30] sm:$0xf] %vm1326_vm7, %v1291_v23 }
 0x174   : > { %v1297_v24 = vpop.permute.xlu1 %1296  ;;  %v1295_v25 = vpop.permute.xlu0 %1294 }
 0x175   : > { %1342 = vst.msk [vmem:[#allocation2 + $0x3c] sm:$0xf] %vm1326_vm7, %v1297_v24  ;;  %1341 = vst.msk [vmem:[#allocation2 + $0x38] sm:$0xf] %vm1326_vm7, %v1295_v25 }
 0x178   : > { %v1454_v26 = vpop.permute.xlu1 %1453  ;;  %v1452_v27 = vpop.permute.xlu0 %1451 }
 0x179   : > { %1501 = vst.msk [vmem:[#allocation2 + $0x34] sm:$0xf] %vm1487_vm8, %v1454_v26  ;;  %1500 = vst.msk [vmem:[#allocation2 + $0x30] sm:$0xf] %vm1487_vm8, %v1452_v27 }
 0x17c   : > { %v1458_v28 = vpop.permute.xlu1 %1457  ;;  %v1456_v29 = vpop.permute.xlu0 %1455 }
 0x17d   : > { %1503 = vst.msk [vmem:[#allocation2 + $0x3c] sm:$0xf] %vm1487_vm8, %v1458_v28  ;;  %1502 = vst.msk [vmem:[#allocation2 + $0x38] sm:$0xf] %vm1487_vm8, %v1456_v29 }
 0x180   : > { %v1615_v30 = vpop.permute.xlu1 %1614  ;;  %v1613_v31 = vpop.permute.xlu0 %1612 }
 0x181   : > { %1662 = vst.msk [vmem:[#allocation2 + $0x34] sm:$0xf] %vm1648_vm9, %v1615_v30  ;;  %1661 = vst.msk [vmem:[#allocation2 + $0x30] sm:$0xf] %vm1648_vm9, %v1613_v31 }
 0x184   : > { %v490_v18 = vpop.permute.xlu1 %489  ;;  %v488_v32 = vpop.permute.xlu0 %487 }
 0x185   : > { %533 = vst.msk [vmem:[#allocation2 + $0x44] sm:$0xf] %vm515_vm2, %v490_v18  ;;  %532 = vst.msk [vmem:[#allocation2 + $0x40] sm:$0xf] %vm515_vm2, %v488_v32 }
 0x188   : > { %v1619_v19 = vpop.permute.xlu1 %1618  ;;  %v1617_v33 = vpop.permute.xlu0 %1616  ;;  %v4469_v34 = vld [vmem:[#allocation2 + $0x30] sm:$0xff]  }
 0x189   : > { %1664 = vst.msk [vmem:[#allocation2 + $0x3c] sm:$0xf] %vm1648_vm9, %v1619_v19  ;;  %1663 = vst.msk [vmem:[#allocation2 + $0x38] sm:$0xf] %vm1648_vm9, %v1617_v33  ;;  %4376 = vmatprep.mubr.msk.bf16.mxu0 %vm1766_vm10, %v4469_v34 }
 0x18c   : > { %v494_v37 = vpop.permute.xlu1 %493  ;;  %v492_v38 = vpop.permute.xlu0 %491 }
 0x18d   : > { %535 = vst.msk [vmem:[#allocation2 + $0x4c] sm:$0xf] %vm515_vm2, %v494_v37  ;;  %534 = vst.msk [vmem:[#allocation2 + $0x48] sm:$0xf] %vm515_vm2, %v492_v38 }
 0x190   : > { %v651_v39 = vpop.permute.xlu1 %650  ;;  %v649_v40 = vpop.permute.xlu0 %648  ;;  %v4470_v41 = vld [vmem:[#allocation2 + $0x38] sm:$0xff]  }
 0x191   : > { %694 = vst.msk [vmem:[#allocation2 + $0x44] sm:$0xf] %vm676_vm3, %v651_v39  ;;  %693 = vst.msk [vmem:[#allocation2 + $0x40] sm:$0xf] %vm676_vm3, %v649_v40  ;;  %4377 = vmatmul.mubr.msk.bf16.gmra.mxu0 %vm1766_vm10, %v4470_v41  ;;  %v4366_v42 = vpop.f32.mrf.mxu0 }
 0x192   : > { %v1844_v55 = vadd.f32 %v4366_v42, %v5199_v54  ;;  %v4532_v42 = vmov 0.0  }
 0x193   : > { %v1835_v47 = vpop.f32.mrf.mxu0  ;;  %1935 = vst.msk [vmem:[#allocation3] sm:$0x1] %vm1934_vm12, %v4532_v42  ;;  %1936 = vst.msk [vmem:[#allocation3 + $0x18] sm:$0x1] %vm1934_vm12, %v4532_v42 }
 0x194   : > { %v655_v43 = vpop.permute.xlu1 %654  ;;  %v653_v46 = vpop.permute.xlu0 %652  ;;  %v1916_v48 = vmax.f32 %v1844_v55, 0.0  ;;  %v1836_v49 = vadd.f32 %v5199_v54, %v1835_v47  ;;  %1937 = vst.msk [vmem:[#allocation3 + $0x30] sm:$0x1] %vm1934_vm12, %v4532_v42  ;;  %1938 = vst.msk [vmem:[#allocation3 + $0x48] sm:$0x1] %vm1934_vm12, %v4532_v42 }
 0x195   : > { %696 = vst.msk [vmem:[#allocation2 + $0x4c] sm:$0xf] %vm676_vm3, %v655_v43  ;;  %695 = vst.msk [vmem:[#allocation2 + $0x48] sm:$0xf] %vm676_vm3, %v653_v46  ;;  %v4367_v50 = vpop.f32.mrf.mxu0 }
 0x196   : > { %1958 = vst.msk [vmem:[#allocation3 + $0x19] sm:$0xff] %vm1955_vm11, %v1916_v48  ;;  %v1914_v51 = vmax.f32 %v1836_v49, 0.0  ;;  %v1847_v35 = vadd.f32 %v4367_v50, %v5199_v54 }
 0x197   : > { %v1838_v53 = vpop.f32.mrf.mxu0  ;;  %1939 = vst.msk [vmem:[#allocation3 + $0x60] sm:$0x1] %vm1934_vm12, %v4532_v42  ;;  %1940 = vst.msk [vmem:[#allocation3 + $0x78] sm:$0x1] %vm1934_vm12, %v4532_v42 }
 0x198   : > { %v815_v52 = vpop.permute.xlu1 %814  ;;  %v813_v36 = vpop.permute.xlu0 %812  ;;  %1956 = vst.msk [vmem:[#allocation3 + $0x1] sm:$0xff] %vm1955_vm11, %v1914_v51  ;;  %v1917_v56 = vmax.f32 %v1847_v35, 0.0  ;;  %v1839_v57 = vadd.f32 %v5199_v54, %v1838_v53 }
 0x199   : > { %858 = vst.msk [vmem:[#allocation2 + $0x44] sm:$0xf] %vm840_vm4, %v815_v52  ;;  %857 = vst.msk [vmem:[#allocation2 + $0x40] sm:$0xf] %vm840_vm4, %v813_v36 }
 0x19a   : > { %1959 = vst.msk [vmem:[#allocation3 + $0x21] sm:$0xff] %vm1955_vm11, %v1917_v56  ;;  %v1915_v58 = vmax.f32 %v1839_v57, 0.0 }
 0x19b   : > { %1941 = vst.msk [vmem:[#allocation3 + $0x90] sm:$0x1] %vm1934_vm12, %v4532_v42  ;;  %1942 = vst.msk [vmem:[#allocation3 + $0xa8] sm:$0x1] %vm1934_vm12, %v4532_v42 }
 0x19c   : > { %v819_v59 = vpop.permute.xlu1 %818  ;;  %v817_v60 = vpop.permute.xlu0 %816  ;;  %1957 = vst.msk [vmem:[#allocation3 + $0x9] sm:$0xff] %vm1955_vm11, %v1915_v58 }
 0x19d   : > { %860 = vst.msk [vmem:[#allocation2 + $0x4c] sm:$0xf] %vm840_vm4, %v819_v59  ;;  %859 = vst.msk [vmem:[#allocation2 + $0x48] sm:$0xf] %vm840_vm4, %v817_v60 }
 0x19e   : > { %1943 = vst.msk [vmem:[#allocation3 + $0xc0] sm:$0x1] %vm1934_vm12, %v4532_v42  ;;  %1944 = vst.msk [vmem:[#allocation3 + $0xd8] sm:$0x1] %vm1934_vm12, %v4532_v42 }
 0x19f   : > { %1945 = vst.msk [vmem:[#allocation3 + $0x11] sm:$0x1] %vm1934_vm12, %v4532_v42  ;;  %1946 = vst.msk [vmem:[#allocation3 + $0x29] sm:$0x1] %vm1934_vm12, %v4532_v42 }
 0x1a0   : > { %v976_v61 = vpop.permute.xlu1 %975  ;;  %v974_v62 = vpop.permute.xlu0 %973  ;;  %1947 = vst.msk [vmem:[#allocation3 + $0x41] sm:$0x1] %vm1934_vm12, %v4532_v42  ;;  %1948 = vst.msk [vmem:[#allocation3 + $0x59] sm:$0x1] %vm1934_vm12, %v4532_v42 }
 0x1a1   : > { %1019 = vst.msk [vmem:[#allocation2 + $0x44] sm:$0xf] %vm1001_vm5, %v976_v61  ;;  %1018 = vst.msk [vmem:[#allocation2 + $0x40] sm:$0xf] %vm1001_vm5, %v974_v62 }
 0x1a2   : > { %1949 = vst.msk [vmem:[#allocation3 + $0x71] sm:$0x1] %vm1934_vm12, %v4532_v42  ;;  %1950 = vst.msk [vmem:[#allocation3 + $0x89] sm:$0x1] %vm1934_vm12, %v4532_v42 }
 0x1a3   : > { %1951 = vst.msk [vmem:[#allocation3 + $0xa1] sm:$0x1] %vm1934_vm12, %v4532_v42  ;;  %1952 = vst.msk [vmem:[#allocation3 + $0xb9] sm:$0x1] %vm1934_vm12, %v4532_v42 }
 0x1a4   : > { %v980_v63 = vpop.permute.xlu1 %979  ;;  %v978_v6 = vpop.permute.xlu0 %977  ;;  %1953 = vst.msk [vmem:[#allocation3 + $0xd1] sm:$0x1] %vm1934_vm12, %v4532_v42  ;;  %1954 = vst.msk [vmem:[#allocation3 + $0xe9] sm:$0x1] %vm1934_vm12, %v4532_v42 }
 0x1a5   : > { %1021 = vst.msk [vmem:[#allocation2 + $0x4c] sm:$0xf] %vm1001_vm5, %v980_v63  ;;  %1020 = vst.msk [vmem:[#allocation2 + $0x48] sm:$0xf] %vm1001_vm5, %v978_v6 }
 0x1a8   : > { %v1137_v7 = vpop.permute.xlu1 %1136  ;;  %v1135_v0 = vpop.permute.xlu0 %1134 }
 0x1a9   : > { %1180 = vst.msk [vmem:[#allocation2 + $0x44] sm:$0xf] %vm1162_vm6, %v1137_v7  ;;  %1179 = vst.msk [vmem:[#allocation2 + $0x40] sm:$0xf] %vm1162_vm6, %v1135_v0 }
 0x1ac   : > { %v1141_v1 = vpop.permute.xlu1 %1140  ;;  %v1139_v2 = vpop.permute.xlu0 %1138 }
 0x1ad   : > { %1182 = vst.msk [vmem:[#allocation2 + $0x4c] sm:$0xf] %vm1162_vm6, %v1141_v1  ;;  %1181 = vst.msk [vmem:[#allocation2 + $0x48] sm:$0xf] %vm1162_vm6, %v1139_v2 }
 0x1b0   : > { %v1301_v3 = vpop.permute.xlu1 %1300  ;;  %v1299_v4 = vpop.permute.xlu0 %1298 }
 0x1b1   : > { %1344 = vst.msk [vmem:[#allocation2 + $0x44] sm:$0xf] %vm1326_vm7, %v1301_v3  ;;  %1343 = vst.msk [vmem:[#allocation2 + $0x40] sm:$0xf] %vm1326_vm7, %v1299_v4 }
 0x1b4   : > { %v1305_v5 = vpop.permute.xlu1 %1304  ;;  %v1303_v8 = vpop.permute.xlu0 %1302 }
 0x1b5   : > { %1346 = vst.msk [vmem:[#allocation2 + $0x4c] sm:$0xf] %vm1326_vm7, %v1305_v5  ;;  %1345 = vst.msk [vmem:[#allocation2 + $0x48] sm:$0xf] %vm1326_vm7, %v1303_v8 }
 0x1b8   : > { %v1462_v9 = vpop.permute.xlu1 %1461  ;;  %v1460_v10 = vpop.permute.xlu0 %1459 }
 0x1b9   : > { %1505 = vst.msk [vmem:[#allocation2 + $0x44] sm:$0xf] %vm1487_vm8, %v1462_v9  ;;  %1504 = vst.msk [vmem:[#allocation2 + $0x40] sm:$0xf] %vm1487_vm8, %v1460_v10 }
 0x1bc   : > { %v1466_v44 = vpop.permute.xlu1 %1465  ;;  %v1464_v45 = vpop.permute.xlu0 %1463 }
 0x1bd   : > { %1507 = vst.msk [vmem:[#allocation2 + $0x4c] sm:$0xf] %vm1487_vm8, %v1466_v44  ;;  %1506 = vst.msk [vmem:[#allocation2 + $0x48] sm:$0xf] %vm1487_vm8, %v1464_v45 }
 0x1c0   : > { %v1623_v11 = vpop.permute.xlu1 %1622  ;;  %v1621_v12 = vpop.permute.xlu0 %1620 }
 0x1c1   : > { %1666 = vst.msk [vmem:[#allocation2 + $0x44] sm:$0xf] %vm1648_vm9, %v1623_v11  ;;  %1665 = vst.msk [vmem:[#allocation2 + $0x40] sm:$0xf] %vm1648_vm9, %v1621_v12 }
 0x1c4   : > { %v1627_v13 = vpop.permute.xlu1 %1626  ;;  %v1625_v14 = vpop.permute.xlu0 %1624 }
 0x1c5   : > { %1668 = vst.msk [vmem:[#allocation2 + $0x4c] sm:$0xf] %vm1648_vm9, %v1627_v13  ;;  %1667 = vst.msk [vmem:[#allocation2 + $0x48] sm:$0xf] %vm1648_vm9, %v1625_v14 }
 0x1c8   : > { %v4471_v15 = vld [vmem:[#allocation2 + $0x40] sm:$0xff]  }
 0x1c9   : > { %4380 = vmatprep.mubr.msk.bf16.mxu0 %vm1766_vm10, %v4471_v15 }
 0x1cc   : > { %v4472_v16 = vld [vmem:[#allocation2 + $0x48] sm:$0xff]  }
 0x1cd   : > { %4381 = vmatmul.mubr.msk.bf16.gmra.mxu0 %vm1766_vm10, %v4472_v16 }
 0x1d1   : > { %v4370_v17 = vpop.f32.mrf.mxu0 }
 0x1d2   : > { %v1860_v20 = vadd.f32 %v4370_v17, %v5199_v54 }
 0x1d3   : > { %v1851_v21 = vpop.f32.mrf.mxu0 }
 0x1d4   : > { %v1920_v22 = vmax.f32 %v1860_v20, 0.0  ;;  %v1852_v23 = vadd.f32 %v5199_v54, %v1851_v21 }
 0x1d5   : > { %v4371_v24 = vpop.f32.mrf.mxu0 }
 0x1d6   : > { %1962 = vst.msk [vmem:[#allocation3 + $0x49] sm:$0xff] %vm1955_vm11, %v1920_v22  ;;  %v1918_v25 = vmax.f32 %v1852_v23, 0.0  ;;  %v1863_v26 = vadd.f32 %v4371_v24, %v5199_v54 }
 0x1d7   : > { %v1854_v27 = vpop.f32.mrf.mxu0 }
 0x1d8   : > { %1960 = vst.msk [vmem:[#allocation3 + $0x31] sm:$0xff] %vm1955_vm11, %v1918_v25  ;;  %v1921_v28 = vmax.f32 %v1863_v26, 0.0  ;;  %v1855_v29 = vadd.f32 %v5199_v54, %v1854_v27 }
 0x1da   : > { %1963 = vst.msk [vmem:[#allocation3 + $0x51] sm:$0xff] %vm1955_vm11, %v1921_v28  ;;  %v1919_v30 = vmax.f32 %v1855_v29, 0.0 }
 0x1dc   : > { %1961 = vst.msk [vmem:[#allocation3 + $0x39] sm:$0xff] %vm1955_vm11, %v1919_v30 }
 0x211   : > { %v4374_v31 = vpop.f32.mrf.mxu0 }
 0x212   : > { %v1876_v18 = vadd.f32 %v4374_v31, %v5199_v54 }
 0x213   : > { %v1867_v32 = vpop.f32.mrf.mxu0 }
 0x214   : > { %v1924_v19 = vmax.f32 %v1876_v18, 0.0  ;;  %v1868_v33 = vadd.f32 %v5199_v54, %v1867_v32 }
 0x215   : > { %v4375_v34 = vpop.f32.mrf.mxu0 }
 0x216   : > { %1966 = vst.msk [vmem:[#allocation3 + $0x79] sm:$0xff] %vm1955_vm11, %v1924_v19  ;;  %v1922_v37 = vmax.f32 %v1868_v33, 0.0  ;;  %v1879_v38 = vadd.f32 %v4375_v34, %v5199_v54 }
 0x217   : > { %v1870_v39 = vpop.f32.mrf.mxu0 }
 0x218   : > { %1964 = vst.msk [vmem:[#allocation3 + $0x61] sm:$0xff] %vm1955_vm11, %v1922_v37  ;;  %v1925_v40 = vmax.f32 %v1879_v38, 0.0  ;;  %v1871_v41 = vadd.f32 %v5199_v54, %v1870_v39 }
 0x21a   : > { %1967 = vst.msk [vmem:[#allocation3 + $0x81] sm:$0xff] %vm1955_vm11, %v1925_v40  ;;  %v1923_v55 = vmax.f32 %v1871_v41, 0.0 }
 0x21c   : > { %1965 = vst.msk [vmem:[#allocation3 + $0x69] sm:$0xff] %vm1955_vm11, %v1923_v55 }
 0x251   : > { %v4378_v43 = vpop.f32.mrf.mxu0 }
 0x252   : > { %v1892_v46 = vadd.f32 %v4378_v43, %v5199_v54 }
 0x253   : > { %v1883_v47 = vpop.f32.mrf.mxu0 }
 0x254   : > { %v1928_v48 = vmax.f32 %v1892_v46, 0.0  ;;  %v1884_v49 = vadd.f32 %v5199_v54, %v1883_v47 }
 0x255   : > { %v4379_v50 = vpop.f32.mrf.mxu0 }
 0x256   : > { %1970 = vst.msk [vmem:[#allocation3 + $0xa9] sm:$0xff] %vm1955_vm11, %v1928_v48  ;;  %v1926_v51 = vmax.f32 %v1884_v49, 0.0  ;;  %v1895_v35 = vadd.f32 %v4379_v50, %v5199_v54 }
 0x257   : > { %v1886_v52 = vpop.f32.mrf.mxu0 }
 0x258   : > { %1968 = vst.msk [vmem:[#allocation3 + $0x91] sm:$0xff] %vm1955_vm11, %v1926_v51  ;;  %v1929_v36 = vmax.f32 %v1895_v35, 0.0  ;;  %v1887_v53 = vadd.f32 %v5199_v54, %v1886_v52 }
 0x25a   : > { %1971 = vst.msk [vmem:[#allocation3 + $0xb1] sm:$0xff] %vm1955_vm11, %v1929_v36  ;;  %v1927_v56 = vmax.f32 %v1887_v53, 0.0 }
 0x25c   : > { %1969 = vst.msk [vmem:[#allocation3 + $0x99] sm:$0xff] %vm1955_vm11, %v1927_v56 }
 0x28d   : > { %v4382_v57 = vpop.f32.mrf.mxu0 }
 0x28e   : > { %v1908_v58 = vadd.f32 %v4382_v57, %v5199_v54 }
 0x28f   : > { %v1899_v59 = vpop.f32.mrf.mxu0 }
 0x290   : > { %v1932_v60 = vmax.f32 %v1908_v58, 0.0  ;;  %v1900_v61 = vadd.f32 %v5199_v54, %v1899_v59 }
 0x291   : > { %v4383_v62 = vpop.f32.mrf.mxu0 }
 0x292   : > { %1974 = vst.msk [vmem:[#allocation3 + $0xd9] sm:$0xff] %vm1955_vm11, %v1932_v60  ;;  %v1930_v63 = vmax.f32 %v1900_v61, 0.0  ;;  %v1911_v6 = vadd.f32 %v4383_v62, %v5199_v54 }
 0x293   : > { %v1902_v7 = vpop.f32.mrf.mxu0 }
 0x294   : > { %1972 = vst.msk [vmem:[#allocation3 + $0xc1] sm:$0xff] %vm1955_vm11, %v1930_v63  ;;  %v1933_v0 = vmax.f32 %v1911_v6, 0.0  ;;  %v1903_v1 = vadd.f32 %v5199_v54, %v1902_v7  ;;  %1979 = sbr.rel (%p3826_p7) target bundleno = 668 (0x29c), region = 44 }
 0x296   : > { %1975 = vst.msk [vmem:[#allocation3 + $0xe1] sm:$0xff] %vm1955_vm11, %v1933_v0  ;;  %v1931_v2 = vmax.f32 %v1903_v1, 0.0 }
 0x298   : > { %1973 = vst.msk [vmem:[#allocation3 + $0xc9] sm:$0xff] %vm1955_vm11, %v1931_v2 }
 0x299   : > { %vm1982_vm13 = vcmask 25600   ;;  %v4533_v3 = vmov 0.0  }
 0x29a   : > { %1980 = vst.msk [vmem:[#allocation3] sm:$0xff] %vm1955_vm11, %v4533_v3  ;;  %1981 = vst.msk [vmem:[#allocation3 + $0x8] sm:$0xff] %vm1955_vm11, %v4533_v3 }
 0x29b   : > { %1983 = vst.msk [vmem:[#allocation3 + $0x10] sm:$0x3] %vm1982_vm13, %v4533_v3 }
 0x29c PF: > { %p3827_p8 = scmp.ne.s32.totalorder %s4506_s18, 1 }
 0x29e   : > { %1987 = sbr.rel (%p3827_p8) target bundleno = 678 (0x2a6), region = 48 }
 0x2a3   : > { %vm1991_vm14 = vcmask 25600   ;;  %v4534_v54 = vmov 0.0  }
 0x2a4   : > { %1989 = vst.msk [vmem:[#allocation3 + $0xd8] sm:$0xff] %vm1955_vm11, %v4534_v54  ;;  %1990 = vst.msk [vmem:[#allocation3 + $0xe0] sm:$0xff] %vm1955_vm11, %v4534_v54 }
 0x2a5   : > { %1992 = vst.msk [vmem:[#allocation3 + $0xe8] sm:$0x3] %vm1991_vm14, %v4534_v54 }
 0x2a6 PF: > { %v2091_v4 = vld [vmem:[#allocation3 + $0x19] sm:$0xff]  ;;  %v2089_v5 = vld [vmem:[#allocation3 + $0x1] sm:$0xff]  ;;  %v2090_v44 = vld [vmem:[#allocation3 + $0x9] sm:$0xff] }
 0x2a7   : > { %v2092_v8 = vld [vmem:[#allocation3 + $0x21] sm:$0xff]  ;;  %v5296_v9 = vpack.c.bf16 %v2091_v4, %v2091_v4  ;;  %v4206_v10 = vpack.c.bf16 %v2089_v5, %v2089_v5  ;;  %v4207_v12 = vpack.c.bf16 %v2090_v44, %v2090_v44  ;;  %v2346_v14 = vld [vmem:[#allocation3 + $0x18] sm:$0xff]  ;;  %v2348_v16 = vld [vmem:[#allocation3 + $0x30] sm:$0xff] }
 0x2a8   : > { %v2347_v45 = vld [vmem:[#allocation3 + $0x20] sm:$0xff]  ;;  %v4209_v11 = vpack.c.bf16 %v2092_v8, %v2092_v8  ;;  %v2349_v15 = vld [vmem:[#allocation3 + $0x38] sm:$0xff]  ;;  %v2218_v17 = vld [vmem:[#allocation3 + $0xa] sm:$0xff]  ;;  %v4238_v21 = vpack.c.bf16 %v2346_v14, %v2346_v14  ;;  %v5303_v23 = vpack.c.bf16 %v2348_v16, %v2348_v16 }
 0x2a9   : > { %2157 = vrot.lane.b32.xlu1 %v5296_v9, %s4524_s14  ;;  %2153 = vrot.lane.b32.xlu0 %v4206_v10, %s4524_s14  ;;  %v4239_v13 = vpack.c.bf16 %v2347_v45, %v2347_v45  ;;  %v2217_v20 = vld [vmem:[#allocation3 + $0x2] sm:$0xff]  ;;  %v5301_v22 = vpack.c.bf16 %v2349_v15, %v2349_v15  ;;  %v2734_v24 = vld [vmem:[#allocation3 + $0x50] sm:$0xff]  ;;  %v4223_v28 = vpack.c.bf16 %v2218_v17, %v2218_v17  ;;  %v2219_v32 = vld [vmem:[#allocation3 + $0x1a] sm:$0xff] }
 0x2aa   : > { %v2733_v25 = vld [vmem:[#allocation3 + $0x48] sm:$0xff]  ;;  %v5306_v26 = vpack.c.bf16 %v2734_v24, %v2734_v24  ;;  %2075 = vst.msk [vmem:[#allocation4 + $0x8] sm:$0xf] %vm354_vm0, %v4238_v21  ;;  %2077 = vst.msk [vmem:[#allocation4 + $0x10] sm:$0xf] %vm354_vm0, %v5303_v23  ;;  %v4222_v29 = vpack.c.bf16 %v2217_v20, %v2217_v20  ;;  %v2352_v31 = vld [vmem:[#allocation3 + $0x60] sm:$0xff]  ;;  %v4224_v42 = vpack.c.bf16 %v2219_v32, %v2219_v32 }
 0x2ab   : > { %2076 = vst.msk [vmem:[#allocation4 + $0xc] sm:$0xf] %vm354_vm0, %v4239_v13  ;;  %v5308_v27 = vpack.c.bf16 %v2733_v25, %v2733_v25  ;;  %2078 = vst.msk [vmem:[#allocation4 + $0x14] sm:$0xf] %vm354_vm0, %v5301_v22  ;;  %v2353_v30 = vld [vmem:[#allocation3 + $0x68] sm:$0xff]  ;;  %v5319_v33 = vpack.c.bf16 %v2352_v31, %v2352_v31  ;;  %v2738_v34 = vld [vmem:[#allocation3 + $0x80] sm:$0xff] }
 0x2ac   : > { %v2220_v18 = vld [vmem:[#allocation3 + $0x22] sm:$0xff]  ;;  %v5317_v19 = vpack.c.bf16 %v2353_v30, %v2353_v30  ;;  %2080 = vst.msk [vmem:[#allocation4 + $0x1c] sm:$0xf] %vm354_vm0, %v5306_v26  ;;  %v2737_v37 = vld [vmem:[#allocation3 + $0x78] sm:$0xff]  ;;  %v5325_v38 = vpack.c.bf16 %v2738_v34, %v2738_v34  ;;  %v2356_v48 = vld [vmem:[#allocation3 + $0x90] sm:$0xff] }
 0x2ad   : > { %2159 = vrot.lane.b32.xlu1 %v4209_v11, %s4524_s14  ;;  %2155 = vrot.lane.b32.xlu0 %v4207_v12, %s4524_s14  ;;  %2079 = vst.msk [vmem:[#allocation4 + $0x18] sm:$0xf] %vm354_vm0, %v5308_v27  ;;  %v5327_v39 = vpack.c.bf16 %v2737_v37, %v2737_v37  ;;  %v1993_v40 = vld [vmem:[#allocation3] sm:$0xff]  ;;  %2081 = vst.msk [vmem:[#allocation4 + $0x20] sm:$0xf] %vm354_vm0, %v5319_v33  ;;  %v4225_v41 = vpack.c.bf16 %v2220_v18, %v2220_v18  ;;  %v1994_v43 = vld [vmem:[#allocation3 + $0x8] sm:$0xff] }
 0x2ae   : > { %2082 = vst.msk [vmem:[#allocation4 + $0x24] sm:$0xf] %vm354_vm0, %v5317_v19  ;;  %v4190_v55 = vpack.c.bf16 %v1993_v40, %v1993_v40  ;;  %v4191_v46 = vpack.c.bf16 %v1994_v43, %v1994_v43  ;;  %2084 = vst.msk [vmem:[#allocation4 + $0x2c] sm:$0xf] %vm354_vm0, %v5325_v38  ;;  %v2357_v47 = vld [vmem:[#allocation3 + $0x98] sm:$0xff]  ;;  %v5347_v50 = vpack.c.bf16 %v2356_v48, %v2356_v48  ;;  %v2742_v59 = vld [vmem:[#allocation3 + $0xb0] sm:$0xff] }
 0x2af   : > { %2083 = vst.msk [vmem:[#allocation4 + $0x28] sm:$0xf] %vm354_vm0, %v5327_v39  ;;  %v5345_v49 = vpack.c.bf16 %v2357_v47, %v2357_v47  ;;  %v2477_v51 = vld [vmem:[#allocation3 + $0x39] sm:$0xff]  ;;  %v2476_v35 = vld [vmem:[#allocation3 + $0x31] sm:$0xff]  ;;  %v2741_v60 = vld [vmem:[#allocation3 + $0xa8] sm:$0xff]  ;;  %v5370_v61 = vpack.c.bf16 %v2742_v59, %v2742_v59 }
 0x2b0   : > { %2073 = vst.msk [vmem:[#allocation4] sm:$0xf] %vm354_vm0, %v4190_v55  ;;  %2074 = vst.msk [vmem:[#allocation4 + $0x4] sm:$0xf] %vm354_vm0, %v4191_v46  ;;  %v4257_v52 = vpack.c.bf16 %v2477_v51, %v2477_v51  ;;  %v4256_v36 = vpack.c.bf16 %v2476_v35, %v2476_v35  ;;  %v2605_v53 = vld [vmem:[#allocation3 + $0x3a] sm:$0xff]  ;;  %v2604_v56 = vld [vmem:[#allocation3 + $0x32] sm:$0xff]  ;;  %v5372_v62 = vpack.c.bf16 %v2741_v60, %v2741_v60 }
 0x2b1   : > { %2283 = vrot.lane.b32.xlu1 %v4223_v28, %s4525_s15  ;;  %2281 = vrot.lane.b32.xlu0 %v4222_v29, %s4525_s15  ;;  %2086 = vst.msk [vmem:[#allocation4 + $0x34] sm:$0xf] %vm354_vm0, %v5345_v49  ;;  %2085 = vst.msk [vmem:[#allocation4 + $0x30] sm:$0xf] %vm354_vm0, %v5347_v50  ;;  %v4273_v57 = vpack.c.bf16 %v2605_v53, %v2605_v53  ;;  %v4272_v58 = vpack.c.bf16 %v2604_v56, %v2604_v56  ;;  %v2862_v63 = vld [vmem:[#allocation3 + $0x51] sm:$0xff]  ;;  %v2861_v6 = vld [vmem:[#allocation3 + $0x49] sm:$0xff] }
 0x2b2   : > { %2088 = vst.msk [vmem:[#allocation4 + $0x3c] sm:$0xf] %vm354_vm0, %v5370_v61  ;;  %2087 = vst.msk [vmem:[#allocation4 + $0x38] sm:$0xf] %vm354_vm0, %v5372_v62  ;;  %v4305_v0 = vpack.c.bf16 %v2862_v63, %v2862_v63  ;;  %v4304_v1 = vpack.c.bf16 %v2861_v6, %v2861_v6  ;;  %v4474_v3 = vld [vmem:[%s5787_s2 + $0x8] sm:$0xff]   ;;  %v4476_v54 = vld [vmem:[%s5787_s2] sm:$0xff]  }
 0x2b3   : > { %v4473_v7 = vld [vmem:[%s5787_s2 + $0x10] ss:$0 sps:$4 sm:$0x33]   ;;  %v2990_v4 = vld [vmem:[#allocation3 + $0x52] sm:$0xff]  ;;  %v2989_v5 = vld [vmem:[#allocation3 + $0x4a] sm:$0xff] }
 0x2b4   : > { %v3223_v2 = vsel %vm1797_vm1, %v4473_v7, 0  ;;  %4407 = vmatprep.subr.msk.bf16.mxu1 %vm1797_vm1, %v4473_v7  ;;  %v4321_v8 = vpack.c.bf16 %v2990_v4, %v2990_v4  ;;  %v2481_v10 = vld [vmem:[#allocation3 + $0x69] sm:$0xff]  ;;  %v2480_v44 = vld [vmem:[#allocation3 + $0x61] sm:$0xff]  ;;  %v2865_v17 = vld [vmem:[#allocation3 + $0x79] sm:$0xff] }
 0x2b5   : > { %2287 = vrot.lane.b32.xlu1 %v4225_v41, %s4525_s15  ;;  %2285 = vrot.lane.b32.xlu0 %v4224_v42, %s4525_s15  ;;  %v4261_v45 = vpack.c.bf16 %v2481_v10, %v2481_v10  ;;  %v2609_v12 = vld [vmem:[#allocation3 + $0x6a] sm:$0xff]  ;;  %v2866_v16 = vld [vmem:[#allocation3 + $0x81] sm:$0xff]  ;;  %v2485_v47 = vld [vmem:[#allocation3 + $0x99] sm:$0xff] }
 0x2b6   : > { %4385 = vmatpush3.bf16.msra.mxu1 %v3223_v2  ;;  %v4277_v14 = vpack.c.bf16 %v2609_v12, %v2609_v12  ;;  %v5435_v20 = vpack.c.bf16 %v2866_v16, %v2866_v16  ;;  %v2484_v48 = vld [vmem:[#allocation3 + $0x91] sm:$0xff]  ;;  %v2613_v53 = vld [vmem:[#allocation3 + $0x9a] sm:$0xff] }
 0x2b7   : > { %4386 = vmatprep.subr.bf16.mxu1 %v4474_v3  ;;  %v2612_v56 = vld [vmem:[#allocation3 + $0x92] sm:$0xff]  ;;  %v5503_v59 = vpack.c.bf16 %v2613_v53, %v2613_v53  ;;  %v2997_v12 = vld [vmem:[#allocation3 + $0xaa] sm:$0xff] }
 0x2b8   : > { %v5505_v60 = vpack.c.bf16 %v2612_v56, %v2612_v56 }
 0x2b9   : > { %2412 = vrot.lane.b32.xlu1 %v4239_v13, %s4526_s16  ;;  %2410 = vrot.lane.b32.xlu0 %v4238_v21, %s4526_s16  ;;  %v2608_v13 = vld [vmem:[#allocation3 + $0x62] sm:$0xff]  ;;  %v5437_v21 = vpack.c.bf16 %v2865_v17, %v2865_v17  ;;  %v5556_v17 = vpack.c.bf16 %v2997_v12, %v2997_v12 }
 0x2ba   : > { %4387 = vmatpush3.bf16.msra.mxu1 %v4474_v3  ;;  %v4276_v15 = vpack.c.bf16 %v2608_v13, %v2608_v13  ;;  %v2870_v3 = vld [vmem:[#allocation3 + $0xb1] sm:$0xff] }
 0x2bb   : > { %4388 = vmatprep.subr.bf16.mxu1 %v4476_v54 }
 0x2bd   : > { %2416 = vrot.lane.b32.xlu1 %v5301_v22, %s4526_s16  ;;  %2414 = vrot.lane.b32.xlu0 %v5303_v23, %s4526_s16 }
 0x2be   : > { %4389 = vmatpush3.bf16.msra.mxu1 %v4476_v54  ;;  %v2869_v54 = vld [vmem:[#allocation3 + $0xa9] sm:$0xff] }
 0x2c1   : > { %2540 = vrot.lane.b32.xlu1 %v4209_v11, %s4527_s17  ;;  %2538 = vrot.lane.b32.xlu0 %v5296_v9, %s4527_s17  ;;  %v4320_v9 = vpack.c.bf16 %v2989_v5, %v2989_v5  ;;  %v4260_v11 = vpack.c.bf16 %v2480_v44, %v2480_v44 }
 0x2c5   : > { %2544 = vrot.lane.b32.xlu1 %v4257_v52, %s4527_s17  ;;  %2542 = vrot.lane.b32.xlu0 %v4256_v36, %s4527_s17 }
 0x2c9   : > { %2668 = vrot.lane.b32.xlu1 %v4225_v41, %s4528_s19  ;;  %2666 = vrot.lane.b32.xlu0 %v4224_v42, %s4528_s19 }
 0x2cd   : > { %2672 = vrot.lane.b32.xlu1 %v4273_v57, %s4528_s19  ;;  %2670 = vrot.lane.b32.xlu0 %v4272_v58, %s4528_s19 }
 0x2d1   : > { %2797 = vrot.lane.b32.xlu1 %v5301_v22, %s4529_s25  ;;  %2795 = vrot.lane.b32.xlu0 %v5303_v23, %s4529_s25 }
 0x2d5   : > { %2801 = vrot.lane.b32.xlu1 %v5306_v26, %s4529_s25  ;;  %2799 = vrot.lane.b32.xlu0 %v5308_v27, %s4529_s25 }
 0x2d9   : > { %2925 = vrot.lane.b32.xlu1 %v4257_v52, %s4530_s28  ;;  %2923 = vrot.lane.b32.xlu0 %v4256_v36, %s4530_s28 }
 0x2dd   : > { %2929 = vrot.lane.b32.xlu1 %v4305_v0, %s4530_s28  ;;  %2927 = vrot.lane.b32.xlu0 %v4304_v1, %s4530_s28 }
 0x2e1   : > { %3053 = vrot.lane.b32.xlu1 %v4273_v57, %s4531_s8  ;;  %3051 = vrot.lane.b32.xlu0 %v4272_v58, %s4531_s8 }
 0x2e5   : > { %2163 = vrot.lane.b32.xlu1 %v4257_v52, %s4524_s14  ;;  %2161 = vrot.lane.b32.xlu0 %v4256_v36, %s4524_s14 }
 0x2e9   : > { %3057 = vrot.lane.b32.xlu1 %v4321_v8, %s4531_s8  ;;  %3055 = vrot.lane.b32.xlu0 %v4320_v9, %s4531_s8 }
 0x2ed   : > { %2167 = vrot.lane.b32.xlu1 %v4305_v0, %s4524_s14  ;;  %2165 = vrot.lane.b32.xlu0 %v4304_v1, %s4524_s14 }
 0x2f1   : > { %2291 = vrot.lane.b32.xlu1 %v4273_v57, %s4525_s15  ;;  %2289 = vrot.lane.b32.xlu0 %v4272_v58, %s4525_s15 }
 0x2f5   : > { %2295 = vrot.lane.b32.xlu1 %v4321_v8, %s4525_s15  ;;  %2293 = vrot.lane.b32.xlu0 %v4320_v9, %s4525_s15 }
 0x2f9   : > { %2420 = vrot.lane.b32.xlu1 %v5306_v26, %s4526_s16  ;;  %2418 = vrot.lane.b32.xlu0 %v5308_v27, %s4526_s16  ;;  %v2994_v26 = vld [vmem:[#allocation3 + $0x82] sm:$0xff]  ;;  %v2993_v27 = vld [vmem:[#allocation3 + $0x7a] sm:$0xff] }
 0x2fa   : > { %v4325_v30 = vpack.c.bf16 %v2994_v26, %v2994_v26  ;;  %v4324_v31 = vpack.c.bf16 %v2993_v27, %v2993_v27 }
 0x2fd   : > { %2424 = vrot.lane.b32.xlu1 %v5317_v19, %s4526_s16  ;;  %2422 = vrot.lane.b32.xlu0 %v5319_v33, %s4526_s16 }
 0x301   : > { %2548 = vrot.lane.b32.xlu1 %v4305_v0, %s4527_s17  ;;  %2546 = vrot.lane.b32.xlu0 %v4304_v1, %s4527_s17 }
 0x305   : > { %2552 = vrot.lane.b32.xlu1 %v4261_v45, %s4527_s17  ;;  %2550 = vrot.lane.b32.xlu0 %v4260_v11, %s4527_s17 }
 0x309   : > { %2676 = vrot.lane.b32.xlu1 %v4321_v8, %s4528_s19  ;;  %2674 = vrot.lane.b32.xlu0 %v4320_v9, %s4528_s19 }
 0x30d   : > { %2680 = vrot.lane.b32.xlu1 %v4277_v14, %s4528_s19  ;;  %2678 = vrot.lane.b32.xlu0 %v4276_v15, %s4528_s19 }
 0x311   : > { %2805 = vrot.lane.b32.xlu1 %v5317_v19, %s4529_s25  ;;  %2803 = vrot.lane.b32.xlu0 %v5319_v33, %s4529_s25 }
 0x315   : > { %2809 = vrot.lane.b32.xlu1 %v5325_v38, %s4529_s25  ;;  %2807 = vrot.lane.b32.xlu0 %v5327_v39, %s4529_s25 }
 0x319   : > { %2933 = vrot.lane.b32.xlu1 %v4261_v45, %s4530_s28  ;;  %2931 = vrot.lane.b32.xlu0 %v4260_v11, %s4530_s28 }
 0x31b   : > { %v2158_v22 = vpop.permute.xlu1 %2157  ;;  %v2154_v23 = vpop.permute.xlu0 %2153 }
 0x31c   : > { %2203 = vst.msk [vmem:[#allocation4 + $0x8] sm:$0xf] %vm515_vm2, %v2158_v22  ;;  %2201 = vst.msk [vmem:[#allocation4] sm:$0xf] %vm515_vm2, %v2154_v23 }
 0x31d   : > { %2937 = vrot.lane.b32.xlu1 %v5435_v20, %s4530_s28  ;;  %2935 = vrot.lane.b32.xlu0 %v5437_v21, %s4530_s28 }
 0x31f   : > { %v2160_v24 = vpop.permute.xlu1 %2159  ;;  %v2156_v25 = vpop.permute.xlu0 %2155 }
 0x320   : > { %2204 = vst.msk [vmem:[#allocation4 + $0xc] sm:$0xf] %vm515_vm2, %v2160_v24  ;;  %2202 = vst.msk [vmem:[#allocation4 + $0x4] sm:$0xf] %vm515_vm2, %v2156_v25 }
 0x321   : > { %3061 = vrot.lane.b32.xlu1 %v4277_v14, %s4531_s8  ;;  %3059 = vrot.lane.b32.xlu0 %v4276_v15, %s4531_s8 }
 0x323   : > { %v2284_v28 = vpop.permute.xlu1 %2283  ;;  %v2282_v29 = vpop.permute.xlu0 %2281 }
 0x324   : > { %2330 = vst.msk [vmem:[#allocation4 + $0x4] sm:$0xf] %vm676_vm3, %v2284_v28  ;;  %2329 = vst.msk [vmem:[#allocation4] sm:$0xf] %vm676_vm3, %v2282_v29  ;;  %v2361_v28 = vld [vmem:[#allocation3 + $0xc8] sm:$0xff]  ;;  %v2360_v29 = vld [vmem:[#allocation3 + $0xc0] sm:$0xff] }
 0x325   : > { %2171 = vrot.lane.b32.xlu1 %v4261_v45, %s4524_s14  ;;  %2169 = vrot.lane.b32.xlu0 %v4260_v11, %s4524_s14  ;;  %v2998_v11 = vld [vmem:[#allocation3 + $0xb2] sm:$0xff] }
 0x326   : > { %v5554_v16 = vpack.c.bf16 %v2998_v11, %v2998_v11 }
 0x327   : > { %v2288_v18 = vpop.permute.xlu1 %2287  ;;  %v2286_v32 = vpop.permute.xlu0 %2285 }
 0x328   : > { %2332 = vst.msk [vmem:[#allocation4 + $0xc] sm:$0xf] %vm676_vm3, %v2288_v18  ;;  %2331 = vst.msk [vmem:[#allocation4 + $0x8] sm:$0xf] %vm676_vm3, %v2286_v32  ;;  %v4253_v18 = vpack.c.bf16 %v2361_v28, %v2361_v28  ;;  %v4252_v32 = vpack.c.bf16 %v2360_v29, %v2360_v29 }
 0x329   : > { %3065 = vrot.lane.b32.xlu1 %v4325_v30, %s4531_s8  ;;  %3063 = vrot.lane.b32.xlu0 %v4324_v31, %s4531_s8 }
 0x32b   : > { %v2413_v19 = vpop.permute.xlu1 %2412  ;;  %v2411_v33 = vpop.permute.xlu0 %2410 }
 0x32c   : > { %2459 = vst.msk [vmem:[#allocation4 + $0x4] sm:$0xf] %vm840_vm4, %v2413_v19  ;;  %2458 = vst.msk [vmem:[#allocation4] sm:$0xf] %vm840_vm4, %v2411_v33 }
 0x32d   : > { %2175 = vrot.lane.b32.xlu1 %v5435_v20, %s4524_s14  ;;  %2173 = vrot.lane.b32.xlu0 %v5437_v21, %s4524_s14 }
 0x32f   : > { %v2417_v34 = vpop.permute.xlu1 %2416  ;;  %v2415_v37 = vpop.permute.xlu0 %2414 }
 0x330   : > { %2461 = vst.msk [vmem:[#allocation4 + $0xc] sm:$0xf] %vm840_vm4, %v2417_v34  ;;  %2460 = vst.msk [vmem:[#allocation4 + $0x8] sm:$0xf] %vm840_vm4, %v2415_v37  ;;  %v2489_v34 = vld [vmem:[#allocation3 + $0xc9] sm:$0xff]  ;;  %v2488_v37 = vld [vmem:[#allocation3 + $0xc1] sm:$0xff] }
 0x331   : > { %2299 = vrot.lane.b32.xlu1 %v4277_v14, %s4525_s15  ;;  %2297 = vrot.lane.b32.xlu0 %v4276_v15, %s4525_s15 }
 0x333   : > { %v2541_v40 = vpop.permute.xlu1 %2540  ;;  %v2539_v41 = vpop.permute.xlu0 %2538 }
 0x334   : > { %2587 = vst.msk [vmem:[#allocation4 + $0x4] sm:$0xf] %vm1001_vm5, %v2541_v40  ;;  %2586 = vst.msk [vmem:[#allocation4] sm:$0xf] %vm1001_vm5, %v2539_v41 }
 0x335   : > { %2303 = vrot.lane.b32.xlu1 %v4325_v30, %s4525_s15  ;;  %2301 = vrot.lane.b32.xlu0 %v4324_v31, %s4525_s15 }
 0x337   : > { %v2545_v42 = vpop.permute.xlu1 %2544  ;;  %v2543_v55 = vpop.permute.xlu0 %2542 }
 0x338   : > { %2589 = vst.msk [vmem:[#allocation4 + $0xc] sm:$0xf] %vm1001_vm5, %v2545_v42  ;;  %2588 = vst.msk [vmem:[#allocation4 + $0x8] sm:$0xf] %vm1001_vm5, %v2543_v55 }
 0x339   : > { %2428 = vrot.lane.b32.xlu1 %v5325_v38, %s4526_s16  ;;  %2426 = vrot.lane.b32.xlu0 %v5327_v39, %s4526_s16  ;;  %v5489_v38 = vpack.c.bf16 %v2485_v47, %v2485_v47  ;;  %v5491_v39 = vpack.c.bf16 %v2484_v48, %v2484_v48 }
 0x33b   : > { %v2669_v43 = vpop.permute.xlu1 %2668  ;;  %v2667_v46 = vpop.permute.xlu0 %2666 }
 0x33c   : > { %2715 = vst.msk [vmem:[#allocation4 + $0x4] sm:$0xf] %vm1162_vm6, %v2669_v43  ;;  %2714 = vst.msk [vmem:[#allocation4] sm:$0xf] %vm1162_vm6, %v2667_v46  ;;  %v2617_v43 = vld [vmem:[#allocation3 + $0xca] sm:$0xff]  ;;  %v2616_v46 = vld [vmem:[#allocation3 + $0xc2] sm:$0xff] }
 0x33d   : > { %2432 = vrot.lane.b32.xlu1 %v5345_v49, %s4526_s16  ;;  %2430 = vrot.lane.b32.xlu0 %v5347_v50, %s4526_s16 }
 0x33f   : > { %v2673_v51 = vpop.permute.xlu1 %2672  ;;  %v2671_v35 = vpop.permute.xlu0 %2670 }
 0x340   : > { %2717 = vst.msk [vmem:[#allocation4 + $0xc] sm:$0xf] %vm1162_vm6, %v2673_v51  ;;  %2716 = vst.msk [vmem:[#allocation4 + $0x8] sm:$0xf] %vm1162_vm6, %v2671_v35  ;;  %v4285_v51 = vpack.c.bf16 %v2617_v43, %v2617_v43  ;;  %v4284_v35 = vpack.c.bf16 %v2616_v46, %v2616_v46 }
 0x341   : > { %2556 = vrot.lane.b32.xlu1 %v5435_v20, %s4527_s17  ;;  %2554 = vrot.lane.b32.xlu0 %v5437_v21, %s4527_s17 }
 0x343   : > { %v2798_v52 = vpop.permute.xlu1 %2797  ;;  %v2796_v36 = vpop.permute.xlu0 %2795 }
 0x344   : > { %2844 = vst.msk [vmem:[#allocation4 + $0x4] sm:$0xf] %vm1326_vm7, %v2798_v52  ;;  %2843 = vst.msk [vmem:[#allocation4] sm:$0xf] %vm1326_vm7, %v2796_v36  ;;  %v2746_v52 = vld [vmem:[#allocation3 + $0xe0] sm:$0xff]  ;;  %v2745_v36 = vld [vmem:[#allocation3 + $0xd8] sm:$0xff] }
 0x345   : > { %2560 = vrot.lane.b32.xlu1 %v5489_v38, %s4527_s17  ;;  %2558 = vrot.lane.b32.xlu0 %v5491_v39, %s4527_s17 }
 0x347   : > { %v2802_v57 = vpop.permute.xlu1 %2801  ;;  %v2800_v58 = vpop.permute.xlu0 %2799 }
 0x348   : > { %2846 = vst.msk [vmem:[#allocation4 + $0xc] sm:$0xf] %vm1326_vm7, %v2802_v57  ;;  %2845 = vst.msk [vmem:[#allocation4 + $0x8] sm:$0xf] %vm1326_vm7, %v2800_v58  ;;  %v4301_v57 = vpack.c.bf16 %v2746_v52, %v2746_v52  ;;  %v4300_v58 = vpack.c.bf16 %v2745_v36, %v2745_v36 }
 0x349   : > { %2684 = vrot.lane.b32.xlu1 %v4325_v30, %s4528_s19  ;;  %2682 = vrot.lane.b32.xlu0 %v4324_v31, %s4528_s19 }
 0x34b   : > { %v2926_v63 = vpop.permute.xlu1 %2925  ;;  %v2924_v6 = vpop.permute.xlu0 %2923 }
 0x34c   : > { %2972 = vst.msk [vmem:[#allocation4 + $0x4] sm:$0xf] %vm1487_vm8, %v2926_v63  ;;  %2971 = vst.msk [vmem:[#allocation4] sm:$0xf] %vm1487_vm8, %v2924_v6  ;;  %v2874_v63 = vld [vmem:[#allocation3 + $0xe1] sm:$0xff]  ;;  %v2873_v6 = vld [vmem:[#allocation3 + $0xd9] sm:$0xff] }
 0x34d   : > { %2688 = vrot.lane.b32.xlu1 %v5503_v59, %s4528_s19  ;;  %2686 = vrot.lane.b32.xlu0 %v5505_v60, %s4528_s19 }
 0x34f   : > { %v2930_v7 = vpop.permute.xlu1 %2929  ;;  %v2928_v0 = vpop.permute.xlu0 %2927 }
 0x350   : > { %2974 = vst.msk [vmem:[#allocation4 + $0xc] sm:$0xf] %vm1487_vm8, %v2930_v7  ;;  %2973 = vst.msk [vmem:[#allocation4 + $0x8] sm:$0xf] %vm1487_vm8, %v2928_v0 }
 0x351   : > { %2813 = vrot.lane.b32.xlu1 %v5345_v49, %s4529_s25  ;;  %2811 = vrot.lane.b32.xlu0 %v5347_v50, %s4529_s25  ;;  %v5531_v49 = vpack.c.bf16 %v2870_v3, %v2870_v3  ;;  %v5533_v50 = vpack.c.bf16 %v2869_v54, %v2869_v54 }
 0x353   : > { %v3054_v1 = vpop.permute.xlu1 %3053  ;;  %v3052_v2 = vpop.permute.xlu0 %3051 }
 0x354   : > { %3100 = vst.msk [vmem:[#allocation4 + $0x4] sm:$0xf] %vm1648_vm9, %v3054_v1  ;;  %3099 = vst.msk [vmem:[#allocation4] sm:$0xf] %vm1648_vm9, %v3052_v2  ;;  %v4317_v1 = vpack.c.bf16 %v2874_v63, %v2874_v63  ;;  %v4316_v2 = vpack.c.bf16 %v2873_v6, %v2873_v6 }
 0x355   : > { %2817 = vrot.lane.b32.xlu1 %v5370_v61, %s4529_s25  ;;  %2815 = vrot.lane.b32.xlu0 %v5372_v62, %s4529_s25 }
 0x357   : > { %v2164_v4 = vpop.permute.xlu1 %2163  ;;  %v2162_v5 = vpop.permute.xlu0 %2161 }
 0x358   : > { %2206 = vst.msk [vmem:[#allocation4 + $0x14] sm:$0xf] %vm515_vm2, %v2164_v4  ;;  %2205 = vst.msk [vmem:[#allocation4 + $0x10] sm:$0xf] %vm515_vm2, %v2162_v5  ;;  %v3002_v5 = vld [vmem:[#allocation3 + $0xe2] sm:$0xff] }
 0x359   : > { %2941 = vrot.lane.b32.xlu1 %v5489_v38, %s4530_s28  ;;  %2939 = vrot.lane.b32.xlu0 %v5491_v39, %s4530_s28 }
 0x35b   : > { %v3058_v8 = vpop.permute.xlu1 %3057  ;;  %v3056_v9 = vpop.permute.xlu0 %3055  ;;  %v4475_v10 = vld [vmem:[#allocation4] sm:$0xff]  }
 0x35c   : > { %3102 = vst.msk [vmem:[#allocation4 + $0xc] sm:$0xf] %vm1648_vm9, %v3058_v8  ;;  %3101 = vst.msk [vmem:[#allocation4 + $0x8] sm:$0xf] %vm1648_vm9, %v3056_v9  ;;  %4390 = vmatprep.mubr.msk.bf16.mxu1 %vm1766_vm10, %v4475_v10  ;;  %v4333_v9 = vpack.c.bf16 %v3002_v5, %v3002_v5 }
 0x35d   : > { %2945 = vrot.lane.b32.xlu1 %v5531_v49, %s4530_s28  ;;  %2943 = vrot.lane.b32.xlu0 %v5533_v50, %s4530_s28 }
 0x35f   : > { %v2168_v44 = vpop.permute.xlu1 %2167  ;;  %v2166_v45 = vpop.permute.xlu0 %2165 }
 0x360   : > { %2208 = vst.msk [vmem:[#allocation4 + $0x1c] sm:$0xf] %vm515_vm2, %v2168_v44  ;;  %2207 = vst.msk [vmem:[#allocation4 + $0x18] sm:$0xf] %vm515_vm2, %v2166_v45 }
 0x361   : > { %3069 = vrot.lane.b32.xlu1 %v5503_v59, %s4531_s8  ;;  %3067 = vrot.lane.b32.xlu0 %v5505_v60, %s4531_s8 }
 0x363   : > { %v2292_v13 = vpop.permute.xlu1 %2291  ;;  %v2290_v14 = vpop.permute.xlu0 %2289  ;;  %v4477_v15 = vld [vmem:[#allocation4 + $0x8] sm:$0xff]  }
 0x364   : > { %2334 = vst.msk [vmem:[#allocation4 + $0x14] sm:$0xf] %vm676_vm3, %v2292_v13  ;;  %2333 = vst.msk [vmem:[#allocation4 + $0x10] sm:$0xf] %vm676_vm3, %v2290_v14  ;;  %4391 = vmatmul.mubr.msk.bf16.vlgmr.msra.gmra.mxu1 %vm1766_vm10, %v4477_v15 }
 0x365   : > { %2179 = vrot.lane.b32.xlu1 %v5489_v38, %s4524_s14  ;;  %2177 = vrot.lane.b32.xlu0 %v5491_v39, %s4524_s14 }
 0x367   : > { %v2296_v20 = vpop.permute.xlu1 %2295  ;;  %v2294_v21 = vpop.permute.xlu0 %2293 }
 0x368   : > { %2336 = vst.msk [vmem:[#allocation4 + $0x1c] sm:$0xf] %vm676_vm3, %v2296_v20  ;;  %2335 = vst.msk [vmem:[#allocation4 + $0x18] sm:$0xf] %vm676_vm3, %v2294_v21 }
 0x369   : > { %3073 = vrot.lane.b32.xlu1 %v5554_v16, %s4531_s8  ;;  %3071 = vrot.lane.b32.xlu0 %v5556_v17, %s4531_s8 }
 0x36b   : > { %v2421_v22 = vpop.permute.xlu1 %2420  ;;  %v2419_v23 = vpop.permute.xlu0 %2418 }
 0x36c   : > { %2463 = vst.msk [vmem:[#allocation4 + $0x14] sm:$0xf] %vm840_vm4, %v2421_v22  ;;  %2462 = vst.msk [vmem:[#allocation4 + $0x10] sm:$0xf] %vm840_vm4, %v2419_v23 }
 0x36d   : > { %2183 = vrot.lane.b32.xlu1 %v5531_v49, %s4524_s14  ;;  %2181 = vrot.lane.b32.xlu0 %v5533_v50, %s4524_s14 }
 0x36f   : > { %v2425_v24 = vpop.permute.xlu1 %2424  ;;  %v2423_v25 = vpop.permute.xlu0 %2422 }
 0x370   : > { %2465 = vst.msk [vmem:[#allocation4 + $0x1c] sm:$0xf] %vm840_vm4, %v2425_v24  ;;  %2464 = vst.msk [vmem:[#allocation4 + $0x18] sm:$0xf] %vm840_vm4, %v2423_v25 }
 0x371   : > { %2307 = vrot.lane.b32.xlu1 %v5503_v59, %s4525_s15  ;;  %2305 = vrot.lane.b32.xlu0 %v5505_v60, %s4525_s15 }
 0x373   : > { %v2549_v26 = vpop.permute.xlu1 %2548  ;;  %v2547_v27 = vpop.permute.xlu0 %2546 }
 0x374   : > { %2591 = vst.msk [vmem:[#allocation4 + $0x14] sm:$0xf] %vm1001_vm5, %v2549_v26  ;;  %2590 = vst.msk [vmem:[#allocation4 + $0x10] sm:$0xf] %vm1001_vm5, %v2547_v27 }
 0x375   : > { %2311 = vrot.lane.b32.xlu1 %v5554_v16, %s4525_s15  ;;  %2309 = vrot.lane.b32.xlu0 %v5556_v17, %s4525_s15 }
 0x377   : > { %v2553_v30 = vpop.permute.xlu1 %2552  ;;  %v2551_v31 = vpop.permute.xlu0 %2550 }
 0x378   : > { %2593 = vst.msk [vmem:[#allocation4 + $0x1c] sm:$0xf] %vm1001_vm5, %v2553_v30  ;;  %2592 = vst.msk [vmem:[#allocation4 + $0x18] sm:$0xf] %vm1001_vm5, %v2551_v31 }
 0x379   : > { %2436 = vrot.lane.b32.xlu1 %v5370_v61, %s4526_s16  ;;  %2434 = vrot.lane.b32.xlu0 %v5372_v62, %s4526_s16  ;;  %v4269_v61 = vpack.c.bf16 %v2489_v34, %v2489_v34  ;;  %v4268_v62 = vpack.c.bf16 %v2488_v37, %v2488_v37 }
 0x37b   : > { %v2677_v19 = vpop.permute.xlu1 %2676  ;;  %v2675_v33 = vpop.permute.xlu0 %2674 }
 0x37c   : > { %2719 = vst.msk [vmem:[#allocation4 + $0x14] sm:$0xf] %vm1162_vm6, %v2677_v19  ;;  %2718 = vst.msk [vmem:[#allocation4 + $0x10] sm:$0xf] %vm1162_vm6, %v2675_v33 }
 0x37d   : > { %2440 = vrot.lane.b32.xlu1 %v4253_v18, %s4526_s16  ;;  %2438 = vrot.lane.b32.xlu0 %v4252_v32, %s4526_s16 }
 0x37f   : > { %v2681_v40 = vpop.permute.xlu1 %2680  ;;  %v2679_v41 = vpop.permute.xlu0 %2678 }
 0x380   : > { %2721 = vst.msk [vmem:[#allocation4 + $0x1c] sm:$0xf] %vm1162_vm6, %v2681_v40  ;;  %2720 = vst.msk [vmem:[#allocation4 + $0x18] sm:$0xf] %vm1162_vm6, %v2679_v41 }
 0x381   : > { %2564 = vrot.lane.b32.xlu1 %v5531_v49, %s4527_s17  ;;  %2562 = vrot.lane.b32.xlu0 %v5533_v50, %s4527_s17  ;;  %v3001_v49 = vld [vmem:[#allocation3 + $0xda] sm:$0xff] }
 0x382   : > { %v4332_v10 = vpack.c.bf16 %v3001_v49, %v3001_v49 }
 0x383   : > { %v2806_v42 = vpop.permute.xlu1 %2805  ;;  %v2804_v55 = vpop.permute.xlu0 %2803 }
 0x384   : > { %2848 = vst.msk [vmem:[#allocation4 + $0x14] sm:$0xf] %vm1326_vm7, %v2806_v42  ;;  %2847 = vst.msk [vmem:[#allocation4 + $0x10] sm:$0xf] %vm1326_vm7, %v2804_v55 }
 0x385   : > { %2568 = vrot.lane.b32.xlu1 %v4269_v61, %s4527_s17  ;;  %2566 = vrot.lane.b32.xlu0 %v4268_v62, %s4527_s17 }
 0x387   : > { %v2810_v47 = vpop.permute.xlu1 %2809  ;;  %v2808_v48 = vpop.permute.xlu0 %2807 }
 0x388   : > { %2850 = vst.msk [vmem:[#allocation4 + $0x1c] sm:$0xf] %vm1326_vm7, %v2810_v47  ;;  %2849 = vst.msk [vmem:[#allocation4 + $0x18] sm:$0xf] %vm1326_vm7, %v2808_v48 }
 0x389   : > { %2692 = vrot.lane.b32.xlu1 %v5554_v16, %s4528_s19  ;;  %2690 = vrot.lane.b32.xlu0 %v5556_v17, %s4528_s19 }
 0x38b   : > { %v2934_v38 = vpop.permute.xlu1 %2933  ;;  %v2932_v39 = vpop.permute.xlu0 %2931 }
 0x38c   : > { %2976 = vst.msk [vmem:[#allocation4 + $0x14] sm:$0xf] %vm1487_vm8, %v2934_v38  ;;  %2975 = vst.msk [vmem:[#allocation4 + $0x10] sm:$0xf] %vm1487_vm8, %v2932_v39 }
 0x38d   : > { %2696 = vrot.lane.b32.xlu1 %v4285_v51, %s4528_s19  ;;  %2694 = vrot.lane.b32.xlu0 %v4284_v35, %s4528_s19 }
 0x38f   : > { %v2938_v53 = vpop.permute.xlu1 %2937  ;;  %v2936_v56 = vpop.permute.xlu0 %2935 }
 0x390   : > { %2978 = vst.msk [vmem:[#allocation4 + $0x1c] sm:$0xf] %vm1487_vm8, %v2938_v53  ;;  %2977 = vst.msk [vmem:[#allocation4 + $0x18] sm:$0xf] %vm1487_vm8, %v2936_v56 }
 0x391   : > { %2821 = vrot.lane.b32.xlu1 %v4253_v18, %s4529_s25  ;;  %2819 = vrot.lane.b32.xlu0 %v4252_v32, %s4529_s25 }
 0x393   : > { %v3062_v59 = vpop.permute.xlu1 %3061  ;;  %v3060_v60 = vpop.permute.xlu0 %3059 }
 0x394   : > { %3104 = vst.msk [vmem:[#allocation4 + $0x14] sm:$0xf] %vm1648_vm9, %v3062_v59  ;;  %3103 = vst.msk [vmem:[#allocation4 + $0x10] sm:$0xf] %vm1648_vm9, %v3060_v60 }
 0x395   : > { %2825 = vrot.lane.b32.xlu1 %v4301_v57, %s4529_s25  ;;  %2823 = vrot.lane.b32.xlu0 %v4300_v58, %s4529_s25 }
 0x397   : > { %v2172_v7 = vpop.permute.xlu1 %2171  ;;  %v2170_v0 = vpop.permute.xlu0 %2169 }
 0x398   : > { %2210 = vst.msk [vmem:[#allocation4 + $0x24] sm:$0xf] %vm515_vm2, %v2172_v7  ;;  %2209 = vst.msk [vmem:[#allocation4 + $0x20] sm:$0xf] %vm515_vm2, %v2170_v0 }
 0x399   : > { %2949 = vrot.lane.b32.xlu1 %v4269_v61, %s4530_s28  ;;  %2947 = vrot.lane.b32.xlu0 %v4268_v62, %s4530_s28 }
 0x39b   : > { %v3066_v3 = vpop.permute.xlu1 %3065  ;;  %v3064_v54 = vpop.permute.xlu0 %3063  ;;  %v4478_v4 = vld [vmem:[#allocation4 + $0x10] sm:$0xff]  }
 0x39c   : > { %3106 = vst.msk [vmem:[#allocation4 + $0x1c] sm:$0xf] %vm1648_vm9, %v3066_v3  ;;  %3105 = vst.msk [vmem:[#allocation4 + $0x18] sm:$0xf] %vm1648_vm9, %v3064_v54  ;;  %4394 = vmatprep.mubr.msk.bf16.mxu1 %vm1766_vm10, %v4478_v4 }
 0x39d   : > { %2953 = vrot.lane.b32.xlu1 %v4317_v1, %s4530_s28  ;;  %2951 = vrot.lane.b32.xlu0 %v4316_v2, %s4530_s28 }
 0x39f   : > { %v2176_v50 = vpop.permute.xlu1 %2175  ;;  %v2174_v8 = vpop.permute.xlu0 %2173 }
 0x3a0   : > { %2212 = vst.msk [vmem:[#allocation4 + $0x2c] sm:$0xf] %vm515_vm2, %v2176_v50  ;;  %2211 = vst.msk [vmem:[#allocation4 + $0x28] sm:$0xf] %vm515_vm2, %v2174_v8 }
 0x3a1   : > { %3077 = vrot.lane.b32.xlu1 %v4285_v51, %s4531_s8  ;;  %3075 = vrot.lane.b32.xlu0 %v4284_v35, %s4531_s8 }
 0x3a3   : > { %v2300_v44 = vpop.permute.xlu1 %2299  ;;  %v2298_v45 = vpop.permute.xlu0 %2297  ;;  %v4479_v11 = vld [vmem:[#allocation4 + $0x18] sm:$0xff]  }
 0x3a4   : > { %2338 = vst.msk [vmem:[#allocation4 + $0x24] sm:$0xf] %vm676_vm3, %v2300_v44  ;;  %2337 = vst.msk [vmem:[#allocation4 + $0x20] sm:$0xf] %vm676_vm3, %v2298_v45  ;;  %4395 = vmatmul.mubr.msk.bf16.gmra.mxu1 %vm1766_vm10, %v4479_v11  ;;  %v5704_v45 = vld [vmem:[%s5789_s4] ss:$0 sm:$0xff] }
 0x3a5   : > { %3081 = vrot.lane.b32.xlu1 %v4333_v9, %s4531_s8  ;;  %3079 = vrot.lane.b32.xlu0 %v4332_v10, %s4531_s8 }
 0x3a7   : > { %v2304_v12 = vpop.permute.xlu1 %2303  ;;  %v2302_v13 = vpop.permute.xlu0 %2301 }
 0x3a8   : > { %2340 = vst.msk [vmem:[#allocation4 + $0x2c] sm:$0xf] %vm676_vm3, %v2304_v12  ;;  %2339 = vst.msk [vmem:[#allocation4 + $0x28] sm:$0xf] %vm676_vm3, %v2302_v13  ;;  %v3994_v12 = vld [vmem:[%s4602_s10 + $0x49] sm:$0xff] }
 0x3ab   : > { %v2429_v14 = vpop.permute.xlu1 %2428  ;;  %v2427_v15 = vpop.permute.xlu0 %2426 }
 0x3ac   : > { %2467 = vst.msk [vmem:[#allocation4 + $0x24] sm:$0xf] %vm840_vm4, %v2429_v14  ;;  %2466 = vst.msk [vmem:[#allocation4 + $0x20] sm:$0xf] %vm840_vm4, %v2427_v15  ;;  %v3992_v15 = vld [vmem:[%s4602_s10 + $0x31] sm:$0xff] }
 0x3af   : > { %v2433_v16 = vpop.permute.xlu1 %2432  ;;  %v2431_v17 = vpop.permute.xlu0 %2430 }
 0x3b0   : > { %2469 = vst.msk [vmem:[#allocation4 + $0x2c] sm:$0xf] %vm840_vm4, %v2433_v16  ;;  %2468 = vst.msk [vmem:[#allocation4 + $0x28] sm:$0xf] %vm840_vm4, %v2431_v17 }
 0x3b3   : > { %v2557_v20 = vpop.permute.xlu1 %2556  ;;  %v2555_v21 = vpop.permute.xlu0 %2554 }
 0x3b4   : > { %2595 = vst.msk [vmem:[#allocation4 + $0x24] sm:$0xf] %vm1001_vm5, %v2557_v20  ;;  %2594 = vst.msk [vmem:[#allocation4 + $0x20] sm:$0xf] %vm1001_vm5, %v2555_v21  ;;  %v3995_v21 = vld [vmem:[%s4602_s10 + $0x51] sm:$0xff] }
 0x3b7   : > { %v2561_v22 = vpop.permute.xlu1 %2560  ;;  %v2559_v23 = vpop.permute.xlu0 %2558 }
 0x3b8   : > { %2597 = vst.msk [vmem:[#allocation4 + $0x2c] sm:$0xf] %vm1001_vm5, %v2561_v22  ;;  %2596 = vst.msk [vmem:[#allocation4 + $0x28] sm:$0xf] %vm1001_vm5, %v2559_v23 }
 0x3bb   : > { %v2685_v24 = vpop.permute.xlu1 %2684  ;;  %v2683_v25 = vpop.permute.xlu0 %2682 }
 0x3bc   : > { %2723 = vst.msk [vmem:[#allocation4 + $0x24] sm:$0xf] %vm1162_vm6, %v2685_v24  ;;  %2722 = vst.msk [vmem:[#allocation4 + $0x20] sm:$0xf] %vm1162_vm6, %v2683_v25 }
 0x3bf   : > { %v2689_v26 = vpop.permute.xlu1 %2688  ;;  %v2687_v27 = vpop.permute.xlu0 %2686 }
 0x3c0   : > { %2725 = vst.msk [vmem:[#allocation4 + $0x2c] sm:$0xf] %vm1162_vm6, %v2689_v26  ;;  %2724 = vst.msk [vmem:[#allocation4 + $0x28] sm:$0xf] %vm1162_vm6, %v2687_v27  ;;  %v3993_v26 = vld [vmem:[%s4602_s10 + $0x39] sm:$0xff] }
 0x3c3   : > { %v2814_v28 = vpop.permute.xlu1 %2813  ;;  %v2812_v29 = vpop.permute.xlu0 %2811 }
 0x3c4   : > { %2852 = vst.msk [vmem:[#allocation4 + $0x24] sm:$0xf] %vm1326_vm7, %v2814_v28  ;;  %2851 = vst.msk [vmem:[#allocation4 + $0x20] sm:$0xf] %vm1326_vm7, %v2812_v29 }
 0x3c7   : > { %v2818_v30 = vpop.permute.xlu1 %2817  ;;  %v2816_v31 = vpop.permute.xlu0 %2815 }
 0x3c8   : > { %2854 = vst.msk [vmem:[#allocation4 + $0x2c] sm:$0xf] %vm1326_vm7, %v2818_v30  ;;  %2853 = vst.msk [vmem:[#allocation4 + $0x28] sm:$0xf] %vm1326_vm7, %v2816_v31 }
 0x3cb   : > { %v2942_v18 = vpop.permute.xlu1 %2941  ;;  %v2940_v32 = vpop.permute.xlu0 %2939 }
 0x3cc   : > { %2980 = vst.msk [vmem:[#allocation4 + $0x24] sm:$0xf] %vm1487_vm8, %v2942_v18  ;;  %2979 = vst.msk [vmem:[#allocation4 + $0x20] sm:$0xf] %vm1487_vm8, %v2940_v32 }
 0x3cf   : > { %v2946_v19 = vpop.permute.xlu1 %2945  ;;  %v2944_v33 = vpop.permute.xlu0 %2943 }
 0x3d0   : > { %2982 = vst.msk [vmem:[#allocation4 + $0x2c] sm:$0xf] %vm1487_vm8, %v2946_v19  ;;  %2981 = vst.msk [vmem:[#allocation4 + $0x28] sm:$0xf] %vm1487_vm8, %v2944_v33  ;;  %v3998_v19 = vld [vmem:[%s4602_s10 + $0x79] sm:$0xff] }
 0x3d3   : > { %v3070_v34 = vpop.permute.xlu1 %3069  ;;  %v3068_v37 = vpop.permute.xlu0 %3067 }
 0x3d4   : > { %3108 = vst.msk [vmem:[#allocation4 + $0x24] sm:$0xf] %vm1648_vm9, %v3070_v34  ;;  %3107 = vst.msk [vmem:[#allocation4 + $0x20] sm:$0xf] %vm1648_vm9, %v3068_v37  ;;  %v3996_v37 = vld [vmem:[%s4602_s10 + $0x61] sm:$0xff] }
 0x3d7   : > { %v2180_v40 = vpop.permute.xlu1 %2179  ;;  %v2178_v41 = vpop.permute.xlu0 %2177 }
 0x3d8   : > { %2214 = vst.msk [vmem:[#allocation4 + $0x34] sm:$0xf] %vm515_vm2, %v2180_v40  ;;  %2213 = vst.msk [vmem:[#allocation4 + $0x30] sm:$0xf] %vm515_vm2, %v2178_v41 }
 0x3db   : > { %v3074_v61 = vpop.permute.xlu1 %3073  ;;  %v3072_v62 = vpop.permute.xlu0 %3071  ;;  %v4480_v42 = vld [vmem:[#allocation4 + $0x20] sm:$0xff]  }
 0x3dc   : > { %3110 = vst.msk [vmem:[#allocation4 + $0x2c] sm:$0xf] %vm1648_vm9, %v3074_v61  ;;  %3109 = vst.msk [vmem:[#allocation4 + $0x28] sm:$0xf] %vm1648_vm9, %v3072_v62  ;;  %4398 = vmatprep.mubr.msk.bf16.mxu1 %vm1766_vm10, %v4480_v42  ;;  %v3999_v62 = vld [vmem:[%s4602_s10 + $0x81] sm:$0xff] }
 0x3df   : > { %v2184_v55 = vpop.permute.xlu1 %2183  ;;  %v2182_v43 = vpop.permute.xlu0 %2181 }
 0x3e0   : > { %2216 = vst.msk [vmem:[#allocation4 + $0x3c] sm:$0xf] %vm515_vm2, %v2184_v55  ;;  %2215 = vst.msk [vmem:[#allocation4 + $0x38] sm:$0xf] %vm515_vm2, %v2182_v43 }
 0x3e3   : > { %v2308_v46 = vpop.permute.xlu1 %2307  ;;  %v2306_v47 = vpop.permute.xlu0 %2305  ;;  %v4481_v48 = vld [vmem:[#allocation4 + $0x28] sm:$0xff]  }
 0x3e4   : > { %2342 = vst.msk [vmem:[#allocation4 + $0x34] sm:$0xf] %vm676_vm3, %v2308_v46  ;;  %2341 = vst.msk [vmem:[#allocation4 + $0x30] sm:$0xf] %vm676_vm3, %v2306_v47  ;;  %4399 = vmatmul.mubr.msk.bf16.gmra.mxu1 %vm1766_vm10, %v4481_v48  ;;  %v3997_v47 = vld [vmem:[%s4602_s10 + $0x69] sm:$0xff] }
 0x3e7   : > { %v2312_v51 = vpop.permute.xlu1 %2311  ;;  %v2310_v35 = vpop.permute.xlu0 %2309 }
 0x3e8   : > { %2344 = vst.msk [vmem:[#allocation4 + $0x3c] sm:$0xf] %vm676_vm3, %v2312_v51  ;;  %2343 = vst.msk [vmem:[#allocation4 + $0x38] sm:$0xf] %vm676_vm3, %v2310_v35 }
 0x3eb   : > { %v2437_v38 = vpop.permute.xlu1 %2436  ;;  %v2435_v39 = vpop.permute.xlu0 %2434 }
 0x3ec   : > { %2471 = vst.msk [vmem:[#allocation4 + $0x34] sm:$0xf] %vm840_vm4, %v2437_v38  ;;  %2470 = vst.msk [vmem:[#allocation4 + $0x30] sm:$0xf] %vm840_vm4, %v2435_v39 }
 0x3ef   : > { %v2441_v52 = vpop.permute.xlu1 %2440  ;;  %v2439_v36 = vpop.permute.xlu0 %2438 }
 0x3f0   : > { %2473 = vst.msk [vmem:[#allocation4 + $0x3c] sm:$0xf] %vm840_vm4, %v2441_v52  ;;  %2472 = vst.msk [vmem:[#allocation4 + $0x38] sm:$0xf] %vm840_vm4, %v2439_v36 }
 0x3f3   : > { %v2565_v53 = vpop.permute.xlu1 %2564  ;;  %v2563_v56 = vpop.permute.xlu0 %2562 }
 0x3f4   : > { %2599 = vst.msk [vmem:[#allocation4 + $0x34] sm:$0xf] %vm1001_vm5, %v2565_v53  ;;  %2598 = vst.msk [vmem:[#allocation4 + $0x30] sm:$0xf] %vm1001_vm5, %v2563_v56  ;;  %v4002_v53 = vld [vmem:[%s4602_s10 + $0xa9] sm:$0xff] }
 0x3f7   : > { %v2569_v57 = vpop.permute.xlu1 %2568  ;;  %v2567_v58 = vpop.permute.xlu0 %2566 }
 0x3f8   : > { %2601 = vst.msk [vmem:[#allocation4 + $0x3c] sm:$0xf] %vm1001_vm5, %v2569_v57  ;;  %2600 = vst.msk [vmem:[#allocation4 + $0x38] sm:$0xf] %vm1001_vm5, %v2567_v58  ;;  %v4000_v58 = vld [vmem:[%s4602_s10 + $0x91] sm:$0xff] }
 0x3fb   : > { %v2693_v59 = vpop.permute.xlu1 %2692  ;;  %v2691_v60 = vpop.permute.xlu0 %2690 }
 0x3fc   : > { %2727 = vst.msk [vmem:[#allocation4 + $0x34] sm:$0xf] %vm1162_vm6, %v2693_v59  ;;  %2726 = vst.msk [vmem:[#allocation4 + $0x30] sm:$0xf] %vm1162_vm6, %v2691_v60 }
 0x3ff   : > { %v2697_v63 = vpop.permute.xlu1 %2696  ;;  %v2695_v6 = vpop.permute.xlu0 %2694 }
 0x400   : > { %2729 = vst.msk [vmem:[#allocation4 + $0x3c] sm:$0xf] %vm1162_vm6, %v2697_v63  ;;  %2728 = vst.msk [vmem:[#allocation4 + $0x38] sm:$0xf] %vm1162_vm6, %v2695_v6  ;;  %v4003_v6 = vld [vmem:[%s4602_s10 + $0xb1] sm:$0xff] }
 0x403   : > { %v2822_v7 = vpop.permute.xlu1 %2821  ;;  %v2820_v0 = vpop.permute.xlu0 %2819 }
 0x404   : > { %2856 = vst.msk [vmem:[#allocation4 + $0x34] sm:$0xf] %vm1326_vm7, %v2822_v7  ;;  %2855 = vst.msk [vmem:[#allocation4 + $0x30] sm:$0xf] %vm1326_vm7, %v2820_v0 }
 0x407   : > { %v2826_v1 = vpop.permute.xlu1 %2825  ;;  %v2824_v2 = vpop.permute.xlu0 %2823 }
 0x408   : > { %2858 = vst.msk [vmem:[#allocation4 + $0x3c] sm:$0xf] %vm1326_vm7, %v2826_v1  ;;  %2857 = vst.msk [vmem:[#allocation4 + $0x38] sm:$0xf] %vm1326_vm7, %v2824_v2 }
 0x40b   : > { %v2950_v3 = vpop.permute.xlu1 %2949  ;;  %v2948_v54 = vpop.permute.xlu0 %2947 }
 0x40c   : > { %2984 = vst.msk [vmem:[#allocation4 + $0x34] sm:$0xf] %vm1487_vm8, %v2950_v3  ;;  %2983 = vst.msk [vmem:[#allocation4 + $0x30] sm:$0xf] %vm1487_vm8, %v2948_v54  ;;  %v4001_v3 = vld [vmem:[%s4602_s10 + $0x99] sm:$0xff] }
 0x40f   : > { %v2954_v4 = vpop.permute.xlu1 %2953  ;;  %v2952_v5 = vpop.permute.xlu0 %2951 }
 0x410   : > { %2986 = vst.msk [vmem:[#allocation4 + $0x3c] sm:$0xf] %vm1487_vm8, %v2954_v4  ;;  %2985 = vst.msk [vmem:[#allocation4 + $0x38] sm:$0xf] %vm1487_vm8, %v2952_v5 }
 0x413   : > { %v3078_v49 = vpop.permute.xlu1 %3077  ;;  %v3076_v50 = vpop.permute.xlu0 %3075 }
 0x414   : > { %3112 = vst.msk [vmem:[#allocation4 + $0x34] sm:$0xf] %vm1648_vm9, %v3078_v49  ;;  %3111 = vst.msk [vmem:[#allocation4 + $0x30] sm:$0xf] %vm1648_vm9, %v3076_v50 }
 0x417   : > { %v3082_v8 = vpop.permute.xlu1 %3081  ;;  %v3080_v9 = vpop.permute.xlu0 %3079 }
 0x418   : > { %3114 = vst.msk [vmem:[#allocation4 + $0x3c] sm:$0xf] %vm1648_vm9, %v3082_v8  ;;  %3113 = vst.msk [vmem:[#allocation4 + $0x38] sm:$0xf] %vm1648_vm9, %v3080_v9 }
 0x41b   : > { %v4482_v10 = vld [vmem:[#allocation4 + $0x30] sm:$0xff]  }
 0x41c   : > { %4402 = vmatprep.mubr.msk.bf16.mxu1 %vm1766_vm10, %v4482_v10  ;;  %v4006_v10 = vld [vmem:[%s4602_s10 + $0xd9] sm:$0xff] }
 0x41f   : > { %v4483_v44 = vld [vmem:[#allocation4 + $0x38] sm:$0xff]  }
 0x420   : > { %4403 = vmatmul.mubr.msk.bf16.gmra.mxu1 %vm1766_vm10, %v4483_v44 }
 0x424   : > { %v4392_v11 = vpop.f32.mrf.mxu1 }
 0x425   : > { %v3268_v13 = vadd.f32 %v4392_v11, %v5704_v45 }
 0x426   : > { %v3259_v14 = vpop.f32.mrf.mxu1 }
 0x427   : > { %v3340_v16 = vadd.f32 %v3994_v12, %v3268_v13  ;;  %v3260_v17 = vadd.f32 %v5704_v45, %v3259_v14  ;;  %v4004_v12 = vld [vmem:[%s4602_s10 + $0xc1] sm:$0xff] }
 0x428   : > { %v4393_v20 = vpop.f32.mrf.mxu1 }
 0x429   : > { %v3356_v22 = vmax.f32 %v3340_v16, 0.0  ;;  %v3338_v23 = vadd.f32 %v3992_v15, %v3260_v17  ;;  %v3271_v24 = vadd.f32 %v4393_v20, %v5704_v45  ;;  %v4007_v16 = vld [vmem:[%s4602_s10 + $0xe1] sm:$0xff] }
 0x42a   : > { %v3262_v25 = vpop.f32.mrf.mxu1 }
 0x42b   : > { %3372 = vst.msk [vmem:[%s4607_s13 + $0x10] sm:$0xff] %vm1955_vm11, %v3356_v22  ;;  %v3354_v27 = vmax.f32 %v3338_v23, 0.0  ;;  %v3341_v28 = vadd.f32 %v3995_v21, %v3271_v24  ;;  %v3263_v29 = vadd.f32 %v5704_v45, %v3262_v25  ;;  %v4005_v23 = vld [vmem:[%s4602_s10 + $0xc9] sm:$0xff] }
 0x42d   : > { %3370 = vst.msk [vmem:[%s4607_s13] sm:$0xff] %vm1955_vm11, %v3354_v27  ;;  %v3357_v30 = vmax.f32 %v3341_v28, 0.0  ;;  %v3339_v31 = vadd.f32 %v3993_v26, %v3263_v29 }
 0x42f   : > { %3373 = vst.msk [vmem:[%s4607_s13 + $0x18] sm:$0xff] %vm1955_vm11, %v3357_v30  ;;  %v3355_v18 = vmax.f32 %v3339_v31, 0.0 }
 0x431   : > { %3371 = vst.msk [vmem:[%s4607_s13 + $0x8] sm:$0xff] %vm1955_vm11, %v3355_v18 }
 0x464   : > { %v4396_v32 = vpop.f32.mrf.mxu1 }
 0x465   : > { %v3284_v33 = vadd.f32 %v4396_v32, %v5704_v45 }
 0x466   : > { %v3275_v34 = vpop.f32.mrf.mxu1 }
 0x467   : > { %v3344_v40 = vadd.f32 %v3998_v19, %v3284_v33  ;;  %v3276_v41 = vadd.f32 %v5704_v45, %v3275_v34 }
 0x468   : > { %v4397_v61 = vpop.f32.mrf.mxu1 }
 0x469   : > { %v3360_v42 = vmax.f32 %v3344_v40, 0.0  ;;  %v3342_v55 = vadd.f32 %v3996_v37, %v3276_v41  ;;  %v3287_v43 = vadd.f32 %v4397_v61, %v5704_v45 }
 0x46a   : > { %v3278_v46 = vpop.f32.mrf.mxu1 }
 0x46b   : > { %3376 = vst.msk [vmem:[%s4607_s13 + $0x30] sm:$0xff] %vm1955_vm11, %v3360_v42  ;;  %v3358_v48 = vmax.f32 %v3342_v55, 0.0  ;;  %v3345_v51 = vadd.f32 %v3999_v62, %v3287_v43  ;;  %v3279_v35 = vadd.f32 %v5704_v45, %v3278_v46 }
 0x46d   : > { %3374 = vst.msk [vmem:[%s4607_s13 + $0x20] sm:$0xff] %vm1955_vm11, %v3358_v48  ;;  %v3361_v38 = vmax.f32 %v3345_v51, 0.0  ;;  %v3343_v39 = vadd.f32 %v3997_v47, %v3279_v35 }
 0x46f   : > { %3377 = vst.msk [vmem:[%s4607_s13 + $0x38] sm:$0xff] %vm1955_vm11, %v3361_v38  ;;  %v3359_v52 = vmax.f32 %v3343_v39, 0.0 }
 0x471   : > { %3375 = vst.msk [vmem:[%s4607_s13 + $0x28] sm:$0xff] %vm1955_vm11, %v3359_v52 }
 0x4a4   : > { %v4400_v36 = vpop.f32.mrf.mxu1 }
 0x4a5   : > { %v3300_v56 = vadd.f32 %v4400_v36, %v5704_v45 }
 0x4a6   : > { %v3291_v57 = vpop.f32.mrf.mxu1 }
 0x4a7   : > { %v3348_v59 = vadd.f32 %v4002_v53, %v3300_v56  ;;  %v3292_v60 = vadd.f32 %v5704_v45, %v3291_v57 }
 0x4a8   : > { %v4401_v63 = vpop.f32.mrf.mxu1 }
 0x4a9   : > { %v3364_v7 = vmax.f32 %v3348_v59, 0.0  ;;  %v3346_v0 = vadd.f32 %v4000_v58, %v3292_v60  ;;  %v3303_v1 = vadd.f32 %v4401_v63, %v5704_v45 }
 0x4aa   : > { %v3294_v2 = vpop.f32.mrf.mxu1 }
 0x4ab   : > { %3380 = vst.msk [vmem:[%s4607_s13 + $0x50] sm:$0xff] %vm1955_vm11, %v3364_v7  ;;  %v3362_v54 = vmax.f32 %v3346_v0, 0.0  ;;  %v3349_v4 = vadd.f32 %v4003_v6, %v3303_v1  ;;  %v3295_v5 = vadd.f32 %v5704_v45, %v3294_v2 }
 0x4ad   : > { %3378 = vst.msk [vmem:[%s4607_s13 + $0x40] sm:$0xff] %vm1955_vm11, %v3362_v54  ;;  %v3365_v49 = vmax.f32 %v3349_v4, 0.0  ;;  %v3347_v50 = vadd.f32 %v4001_v3, %v3295_v5 }
 0x4af   : > { %3381 = vst.msk [vmem:[%s4607_s13 + $0x58] sm:$0xff] %vm1955_vm11, %v3365_v49  ;;  %v3363_v8 = vmax.f32 %v3347_v50, 0.0 }
 0x4b1   : > { %3379 = vst.msk [vmem:[%s4607_s13 + $0x48] sm:$0xff] %vm1955_vm11, %v3363_v8 }
 0x4e0   : > { %v4404_v9 = vpop.f32.mrf.mxu1 }
 0x4e1   : > { %v3316_v44 = vadd.f32 %v4404_v9, %v5704_v45 }
 0x4e2   : > { %v3307_v11 = vpop.f32.mrf.mxu1 }
 0x4e3   : > { %v3352_v13 = vadd.f32 %v4006_v10, %v3316_v44  ;;  %v3308_v14 = vadd.f32 %v5704_v45, %v3307_v11 }
 0x4e4   : > { %v4405_v15 = vpop.f32.mrf.mxu1 }
 0x4e5   : > { %v3368_v17 = vmax.f32 %v3352_v13, 0.0  ;;  %v3350_v20 = vadd.f32 %v4004_v12, %v3308_v14  ;;  %v3319_v21 = vadd.f32 %v4405_v15, %v5704_v45 }
 0x4e6   : > { %v3310_v22 = vpop.f32.mrf.mxu1 }
 0x4e7   : > { %3384 = vst.msk [vmem:[%s4607_s13 + $0x70] sm:$0xff] %vm1955_vm11, %v3368_v17  ;;  %v3366_v24 = vmax.f32 %v3350_v20, 0.0  ;;  %v3353_v25 = vadd.f32 %v4007_v16, %v3319_v21  ;;  %v3311_v26 = vadd.f32 %v5704_v45, %v3310_v22 }
 0x4e9   : > { %3382 = vst.msk [vmem:[%s4607_s13 + $0x60] sm:$0xff] %vm1955_vm11, %v3366_v24  ;;  %v3369_v27 = vmax.f32 %v3353_v25, 0.0  ;;  %v3351_v28 = vadd.f32 %v4005_v23, %v3311_v26 }
 0x4eb   : > { %3385 = vst.msk [vmem:[%s4607_s13 + $0x78] sm:$0xff] %vm1955_vm11, %v3369_v27  ;;  %v3367_v29 = vmax.f32 %v3351_v28, 0.0 }
 0x4ed   : > { %3383 = vst.msk [vmem:[%s4607_s13 + $0x68] sm:$0xff] %vm1955_vm11, %v3367_v29 }
 0x4ee PF: > { %s15_s22 = sadd.s32 1, %s4522_s22   ;;  %s5791_s18 = smov %s4514_s20 }
 0x4ef   : > { %p12_p9 = scmp.ge.s32.totalorder %s15_s22, 6   ;;  %s5792_s19 = smov %s4518_s21 }
 0x4f0   : > { %s5793_s20 = smov %s5796_s23  ;;  %s5794_s21 = smov %s5800_s24 }
 0x4f1   :  { %14 = sbr.rel (!%p12_p9) target bundleno = 3 (0x3), region = 84 }

</bundles_post_ra>
